<compile_context>
chip_gen: v7x
topology: tpu7x:2x2x1
jax: 0.10.0
libtpu: 0.0.40
codegen_flags: <defaults>
</compile_context>

<pallas_src>
import functools
import math

import numpy as np

import jax
import jax.numpy as jnp
from jax.experimental import pallas as pl
from jax.experimental.pallas import tpu as pltpu


# ------------------------------ host helpers ---------------------------------

def get_rope_frequencies(head_dim, base=10000.0):
    dim = jnp.arange(0, head_dim, 2, dtype=jnp.float32)
    return 1.0 / (base ** (dim / head_dim))


def head_to_group_list(num_heads, num_groups):
    base = num_heads // num_groups
    rem = num_heads % num_groups
    h2g = []
    for g in range(num_groups):
        h2g.extend([g] * (base + (1 if g < rem else 0)))
    return h2g


@functools.lru_cache(maxsize=8)
def rope_tables_full(S, head_dim, num_heads, num_groups, scale):
    """Full-width interleaved-RoPE tables of shape (S, (H+2G)*hd), host-computed.

    cos table columns : [cos*scale (Q, H*hd) | cos (K, G*hd) | ones (V, G*hd)]
    sin table columns : [sin_signed*scale    | sin_signed    | zeros        ]
    where sin_signed has -sin at even lanes, +sin at odd lanes, so
        rope(x) = x_raw * cos + x_pair_swapped * sin_signed.
    `scale` (1/sqrt(hd)) is folded into the Q columns for free.
    """
    dim = np.arange(0, head_dim, 2, dtype=np.float32)
    freqs = 1.0 / (10000.0 ** (dim / head_dim))                  # (hd/2,)
    pos = np.arange(S, dtype=np.float32)
    angles = pos[:, None] * freqs[None, :]                       # (S, hd/2)
    cos_p = np.repeat(np.cos(angles), 2, axis=1)                 # (S, hd): c0,c0,c1,c1,...
    sin_p = np.repeat(np.sin(angles), 2, axis=1)
    sign = np.tile(np.array([-1.0, 1.0], np.float32), head_dim // 2)
    sin_s = sin_p * sign[None, :]                                # -s at even, +s at odd
    ones = np.ones((S, head_dim), np.float32)
    zeros = np.zeros((S, head_dim), np.float32)
    cos_full = np.concatenate(
        [np.tile(cos_p, (1, num_heads)) * scale,
         np.tile(cos_p, (1, num_groups)),
         np.tile(ones, (1, num_groups))], axis=1)
    sin_full = np.concatenate(
        [np.tile(sin_s, (1, num_heads)) * scale,
         np.tile(sin_s, (1, num_groups)),
         np.tile(zeros, (1, num_groups))], axis=1)
    return jnp.asarray(cos_full), jnp.asarray(sin_full)


def _pair_swap_cols(w):
    """Swap even/odd output columns of a (D, N) weight (host-side, exact)."""
    D = w.shape[0]
    return w.reshape(D, -1, 2)[:, :, ::-1].reshape(D, -1)


# ------------------------------ Pallas kernel ---------------------------------

def _block_kernel(m_ref, wbig_ref, cos_ref, sin_ref, wo_ref,
                  w1_ref, b1_ref, w2_ref, b2_ref, o_ref,
                  *, h2g, head_dim, num_groups, hidden):
    """One batch element per grid step: the full transformer block."""
    S = m_ref.shape[1]
    hd = head_dim
    H = len(h2g)
    G = num_groups
    W = (H + 2 * G) * hd                         # width of the rotated qkv slab
    k_off = H * hd
    v_off = (H + G) * hd

    x = m_ref[0]                                 # (S, D) f32

    # ---- RMSNorm 1 (f32), then bf16 for the MXU.
    ms = jnp.mean(x * x, axis=-1, keepdims=True)
    xn = (x * jax.lax.rsqrt(ms + 1e-8)).astype(jnp.bfloat16)

    # ---- Fused Q/K/V (+pre-swapped copies) projection: one wide bf16 matmul.
    proj = jnp.dot(xn, wbig_ref[...], preferred_element_type=jnp.float32)   # (S, 2W)

    # ---- Interleaved RoPE for Q and K (scale folded into Q tables); V passes
    #      through (cos=1, sin=0 columns).  Two full-width VPU FMAs, one cast.
    qkv = (proj[:, :W] * cos_ref[...] + proj[:, W:] * sin_ref[...]).astype(jnp.bfloat16)

    # ---- Causal mask built once, reused across all heads.
    row = jax.lax.broadcasted_iota(jnp.int32, (S, S), 0)
    col = jax.lax.broadcasted_iota(jnp.int32, (S, S), 1)
    causal = col > row

    # ---- Per-head causal attention; accumulate o_h @ W_O[h] straight onto the
    #      residual (bounds live ranges: nothing but `acc` survives the loop body).
    acc = x                                      # (S, D) f32, residual 1 seed
    for h, g in enumerate(h2g):                  # static unroll over heads (GQA map)
        qh = qkv[:, h * hd:(h + 1) * hd]                     # (S, hd)
        kh = qkv[:, k_off + g * hd: k_off + (g + 1) * hd]    # group-shared K
        vh = qkv[:, v_off + g * hd: v_off + (g + 1) * hd]    # group-shared V
        s = jax.lax.dot_general(qh, kh, (((1,), (1,)), ((), ())),
                                preferred_element_type=jnp.float32)          # (S, S)
        s = jnp.where(causal, jnp.float32(-1e9), s)          # masked_fill semantics
        m_max = jnp.max(s, axis=-1, keepdims=True)
        p = jnp.exp(s - m_max)
        l = jnp.sum(p, axis=-1, keepdims=True)
        oh = jnp.dot(p.astype(jnp.bfloat16), vh,
                     preferred_element_type=jnp.float32)                     # (S, hd)
        oh = (oh * pl.reciprocal(l, approx=True)).astype(jnp.bfloat16)
        acc = acc + jnp.dot(oh, wo_ref[h], preferred_element_type=jnp.float32)

    # ---- RMSNorm 2 -> W_1 + bias -> SwiGLU -> W_2 + bias -> residual.
    ms2 = jnp.mean(acc * acc, axis=-1, keepdims=True)
    xn2 = (acc * jax.lax.rsqrt(ms2 + 1e-8)).astype(jnp.bfloat16)
    ff = jnp.dot(xn2, w1_ref[...], preferred_element_type=jnp.float32) + b1_ref[...]
    x1 = ff[:, :hidden]
    x2 = ff[:, hidden:]
    gated = (x1 * (x2 * jax.nn.sigmoid(x2))).astype(jnp.bfloat16)            # x1*silu(x2)
    out = acc + jnp.dot(gated, w2_ref[...], preferred_element_type=jnp.float32) + b2_ref[...]
    o_ref[0] = out.astype(o_ref.dtype)


def transformer_block(M, wbig, cos_full, sin_full, wo_h, w1, b1, w2, b2,
                      *, h2g, head_dim, num_groups, hidden):
    B, S, D = M.shape
    H = len(h2g)
    W = (H + 2 * num_groups) * head_dim
    kern = functools.partial(_block_kernel, h2g=tuple(h2g), head_dim=head_dim,
                             num_groups=num_groups, hidden=hidden)
    return pl.pallas_call(
        kern,
        out_shape=jax.ShapeDtypeStruct((B, S, D), jnp.float32),
        grid=(B,),
        in_specs=[
            pl.BlockSpec((1, S, D), lambda b: (b, 0, 0)),
            pl.BlockSpec((D, 2 * W), lambda b: (0, 0)),
            pl.BlockSpec((S, W), lambda b: (0, 0)),
            pl.BlockSpec((S, W), lambda b: (0, 0)),
            pl.BlockSpec((H, head_dim, D), lambda b: (0, 0, 0)),
            pl.BlockSpec((D, 2 * hidden), lambda b: (0, 0)),
            pl.BlockSpec((1, 2 * hidden), lambda b: (0, 0)),
            pl.BlockSpec((hidden, D), lambda b: (0, 0)),
            pl.BlockSpec((1, D), lambda b: (0, 0)),
        ],
        out_specs=pl.BlockSpec((1, S, D), lambda b: (b, 0, 0)),
        compiler_params=pltpu.CompilerParams(dimension_semantics=("parallel",)),
    )(M, wbig, cos_full, sin_full, wo_h, w1, b1, w2, b2)


# ------------------------------ JAX glue --------------------------------------

def init_params(key, cfg):
    D, H, G = cfg["embedding_dim"], cfg["num_heads"], cfg["num_groups"]
    hd = D // H
    hidden = cfg["hidden_dim"]
    ks = jax.random.split(key, 8)
    s = 0.02
    return {
        "W_Q": jax.random.normal(ks[0], (D, H * hd), jnp.float32) * s,
        "W_K": jax.random.normal(ks[1], (D, G * hd), jnp.float32) * s,
        "W_V": jax.random.normal(ks[2], (D, G * hd), jnp.float32) * s,
        "W_O": jax.random.normal(ks[3], (D, D), jnp.float32) * s,
        "W_1_w": jax.random.normal(ks[4], (D, hidden * 2), jnp.float32) * s,
        "W_1_b": jax.random.normal(ks[5], (hidden * 2,), jnp.float32) * s,
        "W_2_w": jax.random.normal(ks[6], (hidden, D), jnp.float32) * s,
        "W_2_b": jax.random.normal(ks[7], (D,), jnp.float32) * s,
    }


def make_forward(cfg, params):
    D, H, G = cfg["embedding_dim"], cfg["num_heads"], cfg["num_groups"]
    hd = D // H
    hidden = cfg["hidden_dim"]
    h2g = head_to_group_list(H, G)
    scale = 1.0 / math.sqrt(hd)

    # Host-side weight prep (once): fused QKV+swapped weight, per-head W_O, bf16 MXU copies.
    wq, wk, wv = params["W_Q"], params["W_K"], params["W_V"]
    wbig = jnp.concatenate(
        [wq, wk, wv, _pair_swap_cols(wq), _pair_swap_cols(wk), jnp.zeros_like(wk)],
        axis=1).astype(jnp.bfloat16)                               # (D, 2*(H+2G)*hd)
    wo_h = params["W_O"].reshape(H, hd, D).astype(jnp.bfloat16)    # (H, hd, D)
    w1 = params["W_1_w"].astype(jnp.bfloat16)
    w2 = params["W_2_w"].astype(jnp.bfloat16)
    b1 = params["W_1_b"].reshape(1, -1).astype(jnp.float32)
    b2 = params["W_2_b"].reshape(1, -1).astype(jnp.float32)

    # TODO(synk): the padding `attention_mask` branch of the module is not
    # implemented; this forward matches attention_mask=None (causal mask only).
    def forward(M):
        B, S, _ = M.shape
        # Host-cached (numpy) RoPE tables -> constants at trace time, no per-call subgraph.
        cos_full, sin_full = rope_tables_full(S, hd, H, G, scale)
        return transformer_block(M, wbig, cos_full, sin_full, wo_h, w1, b1, w2, b2,
                                 h2g=h2g, head_dim=hd, num_groups=G, hidden=hidden)

    return forward


# ------------------------- pure-jnp reference ---------------------------------

def _rms_norm_ref(x, eps=1e-8):
    return x / jnp.sqrt(jnp.mean(x * x, axis=-1, keepdims=True) + eps)


def _apply_rope_ref(x, freqs):
    B, S, H, hd = x.shape
    half = hd // 2
    xr = x.reshape(B, S, H, half, 2)
    pos = jnp.arange(S, dtype=freqs.dtype)
    angles = pos[:, None] * freqs[None, :]
    cos = jnp.cos(angles)[None, :, None, :]
    sin = jnp.sin(angles)[None, :, None, :]
    x0, x1 = xr[..., 0], xr[..., 1]
    r0 = x0 * cos - x1 * sin
    r1 = x0 * sin + x1 * cos
    return jnp.stack([r0, r1], axis=-1).reshape(B, S, H, hd)


def reference_forward(M, params, cfg):
    D, H, G = cfg["embedding_dim"], cfg["num_heads"], cfg["num_groups"]
    hd = D // H
    hidden = cfg["hidden_dim"]
    h2g = jnp.array(head_to_group_list(H, G), dtype=jnp.int32)
    freqs = get_rope_frequencies(hd)
    B, S, _ = M.shape

    Mn = _rms_norm_ref(M)
    Q = (Mn.reshape(B * S, D) @ params["W_Q"]).reshape(B, S, H, hd)
    K = (Mn.reshape(B * S, D) @ params["W_K"]).reshape(B, S, G, hd)
    V = (Mn.reshape(B * S, D) @ params["W_V"]).reshape(B, S, G, hd)
    Kh = jnp.take(K, h2g, axis=2)
    Vh = jnp.take(V, h2g, axis=2)
    Q = _apply_rope_ref(Q, freqs)
    Kh = _apply_rope_ref(Kh, freqs)
    q = jnp.transpose(Q, (0, 2, 1, 3))
    k = jnp.transpose(Kh, (0, 2, 3, 1))
    v = jnp.transpose(Vh, (0, 2, 1, 3))
    s = jnp.matmul(q, k) / math.sqrt(hd)
    causal = jnp.triu(jnp.ones((S, S), dtype=bool), k=1)
    s = jnp.where(causal[None, None], jnp.float32(-1e9), s)
    p = jax.nn.softmax(s, axis=-1)
    o = jnp.matmul(p, v)
    o = jnp.transpose(o, (0, 2, 1, 3)).reshape(B * S, H * hd)
    M1 = M + (o @ params["W_O"]).reshape(B, S, D)

    Mn = _rms_norm_ref(M1)
    ff = Mn.reshape(B * S, D) @ params["W_1_w"] + params["W_1_b"]
    x1, x2 = ff[:, :hidden], ff[:, hidden:]
    f1 = x1 * (x2 * jax.nn.sigmoid(x2))
    f2 = f1 @ params["W_2_w"] + params["W_2_b"]
    return M1 + f2.reshape(B, S, D)


# --------------------------------- main ----------------------------------------

if __name__ == "__main__":
    # Small config consistent with the module's GQA structure:
    # embedding_dim=128, 4 heads, 2 KV groups, hidden_dim = 4 * embedding_dim.
    cfg = dict(embedding_dim=128, num_heads=4, num_groups=2, hidden_dim=512)
    B, S = 2, 128

    key = jax.random.PRNGKey(0)
    kp, kx = jax.random.split(key)
    params = init_params(kp, cfg)
    M = jax.random.normal(kx, (B, S, cfg["embedding_dim"]), jnp.float32)

    forward = jax.jit(make_forward(cfg, params))
    out = forward(M)
    out = jax.block_until_ready(out)

    ref = reference_forward(M, params, cfg)
    assert out.shape == (B, S, cfg["embedding_dim"])
    max_err = float(jnp.max(jnp.abs(out - ref)))
    assert bool(jnp.allclose(out, ref, atol=2e-2, rtol=2e-2)), max_err

    print("KERNEL_OK")
</pallas_src>

<mosaic_0001>
module attributes {stable_mosaic.version = 11 : i64} {
  func.func @_block_kernel(%arg0: i32, %arg1: memref<1x128x128xf32, #tpu.memory_space<vmem>>, %arg2: memref<128x512xbf16, #tpu.memory_space<vmem>>, %arg3: memref<128x256xf32, #tpu.memory_space<vmem>>, %arg4: memref<128x256xf32, #tpu.memory_space<vmem>>, %arg5: memref<4x32x128xbf16, #tpu.memory_space<vmem>>, %arg6: memref<128x1024xbf16, #tpu.memory_space<vmem>>, %arg7: memref<1x1024xf32, #tpu.memory_space<vmem>>, %arg8: memref<512x128xbf16, #tpu.memory_space<vmem>>, %arg9: memref<1x128xf32, #tpu.memory_space<vmem>>, %arg10: memref<1x128x128xf32, #tpu.memory_space<vmem>>) attributes {dimension_semantics = [#tpu.dimension_semantics<parallel>], iteration_bounds = array<i64: 2>, scalar_prefetch = 0 : i64, scratch_operands = 0 : i64, tpu.core_type = #tpu.core_type<tc>, window_params = [{transform_indices = @transform_0, window_bounds = array<i64: 1, 128, 128>}, {pipeline_mode = #tpu.pipeline_mode<synchronous>, transform_indices = @transform_1, window_bounds = array<i64: 128, 512>}, {pipeline_mode = #tpu.pipeline_mode<synchronous>, transform_indices = @transform_2, window_bounds = array<i64: 128, 256>}, {pipeline_mode = #tpu.pipeline_mode<synchronous>, transform_indices = @transform_3, window_bounds = array<i64: 128, 256>}, {pipeline_mode = #tpu.pipeline_mode<synchronous>, transform_indices = @transform_4, window_bounds = array<i64: 4, 32, 128>}, {pipeline_mode = #tpu.pipeline_mode<synchronous>, transform_indices = @transform_5, window_bounds = array<i64: 128, 1024>}, {pipeline_mode = #tpu.pipeline_mode<synchronous>, transform_indices = @transform_6, window_bounds = array<i64: 1, 1024>}, {pipeline_mode = #tpu.pipeline_mode<synchronous>, transform_indices = @transform_7, window_bounds = array<i64: 512, 128>}, {pipeline_mode = #tpu.pipeline_mode<synchronous>, transform_indices = @transform_8, window_bounds = array<i64: 1, 128>}, {transform_indices = @transform_9, window_bounds = array<i64: 1, 128, 128>}]} {
    %c0 = arith.constant 0 : index
    %c0_0 = arith.constant 0 : index
    %c0_1 = arith.constant 0 : index
    %0 = vector.load %arg1[%c0, %c0_0, %c0_1] : memref<1x128x128xf32, #tpu.memory_space<vmem>>, vector<1x128x128xf32>
    %1 = vector.shape_cast %0 : vector<1x128x128xf32> to vector<128x128xf32>
    %2 = arith.mulf %1, %1 : vector<128x128xf32>
    %cst = arith.constant dense<0.000000e+00> : vector<128xf32>
    %3 = vector.multi_reduction <add>, %2, %cst [1] : vector<128x128xf32> to vector<128xf32>
    %4 = vector.shape_cast %3 : vector<128xf32> to vector<128x1xf32>
    %cst_2 = arith.constant 1.280000e+02 : f32
    %5 = vector.broadcast %cst_2 : f32 to vector<128x1xf32>
    %6 = arith.divf %4, %5 : vector<128x1xf32>
    %cst_3 = arith.constant 9.99999993E-9 : f32
    %7 = vector.broadcast %cst_3 : f32 to vector<128x1xf32>
    %8 = arith.addf %6, %7 : vector<128x1xf32>
    %9 = math.rsqrt %8 : vector<128x1xf32>
    %10 = vector.broadcast %9 : vector<128x1xf32> to vector<128x128xf32>
    %11 = arith.mulf %1, %10 : vector<128x128xf32>
    %12 = arith.truncf %11 : vector<128x128xf32> to vector<128x128xbf16>
    %c0_4 = arith.constant 0 : index
    %c0_5 = arith.constant 0 : index
    %13 = vector.load %arg2[%c0_4, %c0_5] : memref<128x512xbf16, #tpu.memory_space<vmem>>, vector<128x512xbf16>
    %cst_6 = arith.constant dense<0.000000e+00> : vector<128x512xf32>
    %14 = tpu.matmul %12, %13, %cst_6 {dimension_numbers = #tpu.dot_dimension_numbers<[1], [0], [0], [1], [0, 0, 1, 1], [], []>} : vector<128x128xbf16>, vector<128x512xbf16>, vector<128x512xf32> -> vector<128x512xf32>
    %15 = vector.extract_strided_slice %14 {offsets = [0, 0], sizes = [128, 256], strides = [1, 1]} : vector<128x512xf32> to vector<128x256xf32>
    %c0_7 = arith.constant 0 : index
    %c0_8 = arith.constant 0 : index
    %16 = vector.load %arg3[%c0_7, %c0_8] : memref<128x256xf32, #tpu.memory_space<vmem>>, vector<128x256xf32>
    %17 = arith.mulf %15, %16 : vector<128x256xf32>
    %18 = vector.extract_strided_slice %14 {offsets = [0, 256], sizes = [128, 256], strides = [1, 1]} : vector<128x512xf32> to vector<128x256xf32>
    %c0_9 = arith.constant 0 : index
    %c0_10 = arith.constant 0 : index
    %19 = vector.load %arg4[%c0_9, %c0_10] : memref<128x256xf32, #tpu.memory_space<vmem>>, vector<128x256xf32>
    %20 = arith.mulf %18, %19 : vector<128x256xf32>
    %21 = arith.addf %17, %20 : vector<128x256xf32>
    %22 = arith.truncf %21 : vector<128x256xf32> to vector<128x256xbf16>
    %23 = tpu.iota {dimensions = array<i32: 0>} : vector<128x128xi32>
    %24 = tpu.iota {dimensions = array<i32: 1>} : vector<128x128xi32>
    %25 = arith.cmpi sgt, %24, %23 : vector<128x128xi32>
    %26 = vector.extract_strided_slice %22 {offsets = [0, 0], sizes = [128, 32], strides = [1, 1]} : vector<128x256xbf16> to vector<128x32xbf16>
    %27 = vector.extract_strided_slice %22 {offsets = [0, 128], sizes = [128, 32], strides = [1, 1]} : vector<128x256xbf16> to vector<128x32xbf16>
    %28 = vector.extract_strided_slice %22 {offsets = [0, 192], sizes = [128, 32], strides = [1, 1]} : vector<128x256xbf16> to vector<128x32xbf16>
    %cst_11 = arith.constant dense<0.000000e+00> : vector<128x128xf32>
    %29 = tpu.matmul %26, %27, %cst_11 {dimension_numbers = #tpu.dot_dimension_numbers<[1], [1], [0], [0], [0, 0, 1, 0], [], []>} : vector<128x32xbf16>, vector<128x32xbf16>, vector<128x128xf32> -> vector<128x128xf32>
    %cst_12 = arith.constant -1.000000e+09 : f32
    %30 = vector.broadcast %cst_12 : f32 to vector<128x128xf32>
    %31 = arith.select %25, %30, %29 : vector<128x128xi1>, vector<128x128xf32>
    %cst_13 = arith.constant dense<0xFF800000> : vector<128xf32>
    %32 = vector.multi_reduction <maximumf>, %31, %cst_13 [1] : vector<128x128xf32> to vector<128xf32>
    %33 = vector.shape_cast %32 : vector<128xf32> to vector<128x1xf32>
    %34 = vector.broadcast %33 : vector<128x1xf32> to vector<128x128xf32>
    %35 = arith.subf %31, %34 : vector<128x128xf32>
    %36 = math.exp %35 : vector<128x128xf32>
    %cst_14 = arith.constant dense<0.000000e+00> : vector<128xf32>
    %37 = vector.multi_reduction <add>, %36, %cst_14 [1] : vector<128x128xf32> to vector<128xf32>
    %38 = vector.shape_cast %37 : vector<128xf32> to vector<128x1xf32>
    %39 = arith.truncf %36 : vector<128x128xf32> to vector<128x128xbf16>
    %cst_15 = arith.constant dense<0.000000e+00> : vector<128x32xf32>
    %40 = tpu.matmul %39, %28, %cst_15 {dimension_numbers = #tpu.dot_dimension_numbers<[1], [0], [0], [1], [0, 0, 1, 1], [], []>} : vector<128x128xbf16>, vector<128x32xbf16>, vector<128x32xf32> -> vector<128x32xf32>
    %41 = tpu.reciprocal %38 {approx = true} : vector<128x1xf32> -> vector<128x1xf32>
    %42 = vector.broadcast %41 : vector<128x1xf32> to vector<128x32xf32>
    %43 = arith.mulf %40, %42 : vector<128x32xf32>
    %44 = arith.truncf %43 : vector<128x32xf32> to vector<128x32xbf16>
    %c0_16 = arith.constant 0 : index
    %c0_17 = arith.constant 0 : index
    %c0_18 = arith.constant 0 : index
    %45 = vector.load %arg5[%c0_16, %c0_17, %c0_18] : memref<4x32x128xbf16, #tpu.memory_space<vmem>>, vector<1x32x128xbf16>
    %46 = vector.shape_cast %45 : vector<1x32x128xbf16> to vector<32x128xbf16>
    %cst_19 = arith.constant dense<0.000000e+00> : vector<128x128xf32>
    %47 = tpu.matmul %44, %46, %cst_19 {dimension_numbers = #tpu.dot_dimension_numbers<[1], [0], [0], [1], [0, 0, 1, 1], [], []>} : vector<128x32xbf16>, vector<32x128xbf16>, vector<128x128xf32> -> vector<128x128xf32>
    %48 = arith.addf %1, %47 : vector<128x128xf32>
    %49 = vector.extract_strided_slice %22 {offsets = [0, 32], sizes = [128, 32], strides = [1, 1]} : vector<128x256xbf16> to vector<128x32xbf16>
    %50 = vector.extract_strided_slice %22 {offsets = [0, 128], sizes = [128, 32], strides = [1, 1]} : vector<128x256xbf16> to vector<128x32xbf16>
    %51 = vector.extract_strided_slice %22 {offsets = [0, 192], sizes = [128, 32], strides = [1, 1]} : vector<128x256xbf16> to vector<128x32xbf16>
    %cst_20 = arith.constant dense<0.000000e+00> : vector<128x128xf32>
    %52 = tpu.matmul %49, %50, %cst_20 {dimension_numbers = #tpu.dot_dimension_numbers<[1], [1], [0], [0], [0, 0, 1, 0], [], []>} : vector<128x32xbf16>, vector<128x32xbf16>, vector<128x128xf32> -> vector<128x128xf32>
    %cst_21 = arith.constant -1.000000e+09 : f32
    %53 = vector.broadcast %cst_21 : f32 to vector<128x128xf32>
    %54 = arith.select %25, %53, %52 : vector<128x128xi1>, vector<128x128xf32>
    %cst_22 = arith.constant dense<0xFF800000> : vector<128xf32>
    %55 = vector.multi_reduction <maximumf>, %54, %cst_22 [1] : vector<128x128xf32> to vector<128xf32>
    %56 = vector.shape_cast %55 : vector<128xf32> to vector<128x1xf32>
    %57 = vector.broadcast %56 : vector<128x1xf32> to vector<128x128xf32>
    %58 = arith.subf %54, %57 : vector<128x128xf32>
    %59 = math.exp %58 : vector<128x128xf32>
    %cst_23 = arith.constant dense<0.000000e+00> : vector<128xf32>
    %60 = vector.multi_reduction <add>, %59, %cst_23 [1] : vector<128x128xf32> to vector<128xf32>
    %61 = vector.shape_cast %60 : vector<128xf32> to vector<128x1xf32>
    %62 = arith.truncf %59 : vector<128x128xf32> to vector<128x128xbf16>
    %cst_24 = arith.constant dense<0.000000e+00> : vector<128x32xf32>
    %63 = tpu.matmul %62, %51, %cst_24 {dimension_numbers = #tpu.dot_dimension_numbers<[1], [0], [0], [1], [0, 0, 1, 1], [], []>} : vector<128x128xbf16>, vector<128x32xbf16>, vector<128x32xf32> -> vector<128x32xf32>
    %64 = tpu.reciprocal %61 {approx = true} : vector<128x1xf32> -> vector<128x1xf32>
    %65 = vector.broadcast %64 : vector<128x1xf32> to vector<128x32xf32>
    %66 = arith.mulf %63, %65 : vector<128x32xf32>
    %67 = arith.truncf %66 : vector<128x32xf32> to vector<128x32xbf16>
    %c1 = arith.constant 1 : index
    %c0_25 = arith.constant 0 : index
    %c0_26 = arith.constant 0 : index
    %68 = vector.load %arg5[%c1, %c0_25, %c0_26] : memref<4x32x128xbf16, #tpu.memory_space<vmem>>, vector<1x32x128xbf16>
    %69 = vector.shape_cast %68 : vector<1x32x128xbf16> to vector<32x128xbf16>
    %cst_27 = arith.constant dense<0.000000e+00> : vector<128x128xf32>
    %70 = tpu.matmul %67, %69, %cst_27 {dimension_numbers = #tpu.dot_dimension_numbers<[1], [0], [0], [1], [0, 0, 1, 1], [], []>} : vector<128x32xbf16>, vector<32x128xbf16>, vector<128x128xf32> -> vector<128x128xf32>
    %71 = arith.addf %48, %70 : vector<128x128xf32>
    %72 = vector.extract_strided_slice %22 {offsets = [0, 64], sizes = [128, 32], strides = [1, 1]} : vector<128x256xbf16> to vector<128x32xbf16>
    %73 = vector.extract_strided_slice %22 {offsets = [0, 160], sizes = [128, 32], strides = [1, 1]} : vector<128x256xbf16> to vector<128x32xbf16>
    %74 = vector.extract_strided_slice %22 {offsets = [0, 224], sizes = [128, 32], strides = [1, 1]} : vector<128x256xbf16> to vector<128x32xbf16>
    %cst_28 = arith.constant dense<0.000000e+00> : vector<128x128xf32>
    %75 = tpu.matmul %72, %73, %cst_28 {dimension_numbers = #tpu.dot_dimension_numbers<[1], [1], [0], [0], [0, 0, 1, 0], [], []>} : vector<128x32xbf16>, vector<128x32xbf16>, vector<128x128xf32> -> vector<128x128xf32>
    %cst_29 = arith.constant -1.000000e+09 : f32
    %76 = vector.broadcast %cst_29 : f32 to vector<128x128xf32>
    %77 = arith.select %25, %76, %75 : vector<128x128xi1>, vector<128x128xf32>
    %cst_30 = arith.constant dense<0xFF800000> : vector<128xf32>
    %78 = vector.multi_reduction <maximumf>, %77, %cst_30 [1] : vector<128x128xf32> to vector<128xf32>
    %79 = vector.shape_cast %78 : vector<128xf32> to vector<128x1xf32>
    %80 = vector.broadcast %79 : vector<128x1xf32> to vector<128x128xf32>
    %81 = arith.subf %77, %80 : vector<128x128xf32>
    %82 = math.exp %81 : vector<128x128xf32>
    %cst_31 = arith.constant dense<0.000000e+00> : vector<128xf32>
    %83 = vector.multi_reduction <add>, %82, %cst_31 [1] : vector<128x128xf32> to vector<128xf32>
    %84 = vector.shape_cast %83 : vector<128xf32> to vector<128x1xf32>
    %85 = arith.truncf %82 : vector<128x128xf32> to vector<128x128xbf16>
    %cst_32 = arith.constant dense<0.000000e+00> : vector<128x32xf32>
    %86 = tpu.matmul %85, %74, %cst_32 {dimension_numbers = #tpu.dot_dimension_numbers<[1], [0], [0], [1], [0, 0, 1, 1], [], []>} : vector<128x128xbf16>, vector<128x32xbf16>, vector<128x32xf32> -> vector<128x32xf32>
    %87 = tpu.reciprocal %84 {approx = true} : vector<128x1xf32> -> vector<128x1xf32>
    %88 = vector.broadcast %87 : vector<128x1xf32> to vector<128x32xf32>
    %89 = arith.mulf %86, %88 : vector<128x32xf32>
    %90 = arith.truncf %89 : vector<128x32xf32> to vector<128x32xbf16>
    %c2 = arith.constant 2 : index
    %c0_33 = arith.constant 0 : index
    %c0_34 = arith.constant 0 : index
    %91 = vector.load %arg5[%c2, %c0_33, %c0_34] : memref<4x32x128xbf16, #tpu.memory_space<vmem>>, vector<1x32x128xbf16>
    %92 = vector.shape_cast %91 : vector<1x32x128xbf16> to vector<32x128xbf16>
    %cst_35 = arith.constant dense<0.000000e+00> : vector<128x128xf32>
    %93 = tpu.matmul %90, %92, %cst_35 {dimension_numbers = #tpu.dot_dimension_numbers<[1], [0], [0], [1], [0, 0, 1, 1], [], []>} : vector<128x32xbf16>, vector<32x128xbf16>, vector<128x128xf32> -> vector<128x128xf32>
    %94 = arith.addf %71, %93 : vector<128x128xf32>
    %95 = vector.extract_strided_slice %22 {offsets = [0, 96], sizes = [128, 32], strides = [1, 1]} : vector<128x256xbf16> to vector<128x32xbf16>
    %96 = vector.extract_strided_slice %22 {offsets = [0, 160], sizes = [128, 32], strides = [1, 1]} : vector<128x256xbf16> to vector<128x32xbf16>
    %97 = vector.extract_strided_slice %22 {offsets = [0, 224], sizes = [128, 32], strides = [1, 1]} : vector<128x256xbf16> to vector<128x32xbf16>
    %cst_36 = arith.constant dense<0.000000e+00> : vector<128x128xf32>
    %98 = tpu.matmul %95, %96, %cst_36 {dimension_numbers = #tpu.dot_dimension_numbers<[1], [1], [0], [0], [0, 0, 1, 0], [], []>} : vector<128x32xbf16>, vector<128x32xbf16>, vector<128x128xf32> -> vector<128x128xf32>
    %cst_37 = arith.constant -1.000000e+09 : f32
    %99 = vector.broadcast %cst_37 : f32 to vector<128x128xf32>
    %100 = arith.select %25, %99, %98 : vector<128x128xi1>, vector<128x128xf32>
    %cst_38 = arith.constant dense<0xFF800000> : vector<128xf32>
    %101 = vector.multi_reduction <maximumf>, %100, %cst_38 [1] : vector<128x128xf32> to vector<128xf32>
    %102 = vector.shape_cast %101 : vector<128xf32> to vector<128x1xf32>
    %103 = vector.broadcast %102 : vector<128x1xf32> to vector<128x128xf32>
    %104 = arith.subf %100, %103 : vector<128x128xf32>
    %105 = math.exp %104 : vector<128x128xf32>
    %cst_39 = arith.constant dense<0.000000e+00> : vector<128xf32>
    %106 = vector.multi_reduction <add>, %105, %cst_39 [1] : vector<128x128xf32> to vector<128xf32>
    %107 = vector.shape_cast %106 : vector<128xf32> to vector<128x1xf32>
    %108 = arith.truncf %105 : vector<128x128xf32> to vector<128x128xbf16>
    %cst_40 = arith.constant dense<0.000000e+00> : vector<128x32xf32>
    %109 = tpu.matmul %108, %97, %cst_40 {dimension_numbers = #tpu.dot_dimension_numbers<[1], [0], [0], [1], [0, 0, 1, 1], [], []>} : vector<128x128xbf16>, vector<128x32xbf16>, vector<128x32xf32> -> vector<128x32xf32>
    %110 = tpu.reciprocal %107 {approx = true} : vector<128x1xf32> -> vector<128x1xf32>
    %111 = vector.broadcast %110 : vector<128x1xf32> to vector<128x32xf32>
    %112 = arith.mulf %109, %111 : vector<128x32xf32>
    %113 = arith.truncf %112 : vector<128x32xf32> to vector<128x32xbf16>
    %c3 = arith.constant 3 : index
    %c0_41 = arith.constant 0 : index
    %c0_42 = arith.constant 0 : index
    %114 = vector.load %arg5[%c3, %c0_41, %c0_42] : memref<4x32x128xbf16, #tpu.memory_space<vmem>>, vector<1x32x128xbf16>
    %115 = vector.shape_cast %114 : vector<1x32x128xbf16> to vector<32x128xbf16>
    %cst_43 = arith.constant dense<0.000000e+00> : vector<128x128xf32>
    %116 = tpu.matmul %113, %115, %cst_43 {dimension_numbers = #tpu.dot_dimension_numbers<[1], [0], [0], [1], [0, 0, 1, 1], [], []>} : vector<128x32xbf16>, vector<32x128xbf16>, vector<128x128xf32> -> vector<128x128xf32>
    %117 = arith.addf %94, %116 : vector<128x128xf32>
    %118 = arith.mulf %117, %117 : vector<128x128xf32>
    %cst_44 = arith.constant dense<0.000000e+00> : vector<128xf32>
    %119 = vector.multi_reduction <add>, %118, %cst_44 [1] : vector<128x128xf32> to vector<128xf32>
    %120 = vector.shape_cast %119 : vector<128xf32> to vector<128x1xf32>
    %cst_45 = arith.constant 1.280000e+02 : f32
    %121 = vector.broadcast %cst_45 : f32 to vector<128x1xf32>
    %122 = arith.divf %120, %121 : vector<128x1xf32>
    %cst_46 = arith.constant 9.99999993E-9 : f32
    %123 = vector.broadcast %cst_46 : f32 to vector<128x1xf32>
    %124 = arith.addf %122, %123 : vector<128x1xf32>
    %125 = math.rsqrt %124 : vector<128x1xf32>
    %126 = vector.broadcast %125 : vector<128x1xf32> to vector<128x128xf32>
    %127 = arith.mulf %117, %126 : vector<128x128xf32>
    %128 = arith.truncf %127 : vector<128x128xf32> to vector<128x128xbf16>
    %c0_47 = arith.constant 0 : index
    %c0_48 = arith.constant 0 : index
    %129 = vector.load %arg6[%c0_47, %c0_48] : memref<128x1024xbf16, #tpu.memory_space<vmem>>, vector<128x1024xbf16>
    %cst_49 = arith.constant dense<0.000000e+00> : vector<128x1024xf32>
    %130 = tpu.matmul %128, %129, %cst_49 {dimension_numbers = #tpu.dot_dimension_numbers<[1], [0], [0], [1], [0, 0, 1, 1], [], []>} : vector<128x128xbf16>, vector<128x1024xbf16>, vector<128x1024xf32> -> vector<128x1024xf32>
    %c0_50 = arith.constant 0 : index
    %c0_51 = arith.constant 0 : index
    %131 = vector.load %arg7[%c0_50, %c0_51] : memref<1x1024xf32, #tpu.memory_space<vmem>>, vector<1x1024xf32>
    %132 = vector.broadcast %131 : vector<1x1024xf32> to vector<128x1024xf32>
    %133 = arith.addf %130, %132 : vector<128x1024xf32>
    %134 = vector.extract_strided_slice %133 {offsets = [0, 0], sizes = [128, 512], strides = [1, 1]} : vector<128x1024xf32> to vector<128x512xf32>
    %135 = vector.extract_strided_slice %133 {offsets = [0, 512], sizes = [128, 512], strides = [1, 1]} : vector<128x1024xf32> to vector<128x512xf32>
    %136 = arith.negf %135 : vector<128x512xf32>
    %137 = math.exp %136 : vector<128x512xf32>
    %cst_52 = arith.constant 1.000000e+00 : f32
    %138 = vector.broadcast %cst_52 : f32 to vector<128x512xf32>
    %139 = arith.addf %138, %137 : vector<128x512xf32>
    %140 = arith.divf %138, %139 : vector<128x512xf32>
    %141 = arith.mulf %135, %140 : vector<128x512xf32>
    %142 = arith.mulf %134, %141 : vector<128x512xf32>
    %143 = arith.truncf %142 : vector<128x512xf32> to vector<128x512xbf16>
    %c0_53 = arith.constant 0 : index
    %c0_54 = arith.constant 0 : index
    %144 = vector.load %arg8[%c0_53, %c0_54] : memref<512x128xbf16, #tpu.memory_space<vmem>>, vector<512x128xbf16>
    %cst_55 = arith.constant dense<0.000000e+00> : vector<128x128xf32>
    %145 = tpu.matmul %143, %144, %cst_55 {dimension_numbers = #tpu.dot_dimension_numbers<[1], [0], [0], [1], [0, 0, 1, 1], [], []>} : vector<128x512xbf16>, vector<512x128xbf16>, vector<128x128xf32> -> vector<128x128xf32>
    %146 = arith.addf %117, %145 : vector<128x128xf32>
    %c0_56 = arith.constant 0 : index
    %c0_57 = arith.constant 0 : index
    %147 = vector.load %arg9[%c0_56, %c0_57] : memref<1x128xf32, #tpu.memory_space<vmem>>, vector<1x128xf32>
    %148 = vector.broadcast %147 : vector<1x128xf32> to vector<128x128xf32>
    %149 = arith.addf %146, %148 : vector<128x128xf32>
    %c0_58 = arith.constant 0 : index
    %c0_59 = arith.constant 0 : index
    %c0_60 = arith.constant 0 : index
    %150 = vector.load %arg10[%c0_58, %c0_59, %c0_60] : memref<1x128x128xf32, #tpu.memory_space<vmem>>, vector<1x128x128xf32>
    %151 = vector.shape_cast %150 : vector<1x128x128xf32> to vector<128x128xf32>
    %152 = vector.shape_cast %149 : vector<128x128xf32> to vector<1x128x128xf32>
    tpu.vector_store %arg10[%c0_58, %c0_59, %c0_60], %152 {strides = array<i32>} : memref<1x128x128xf32, #tpu.memory_space<vmem>>, vector<1x128x128xf32>,
    return
  }
  func.func @transform_0(%arg0: i32) -> (i32, i32, i32) {
    %c0_i32 = arith.constant 0 : i32
    %c0_i32_0 = arith.constant 0 : i32
    %c0_i32_1 = arith.constant 0 : i32
    return %arg0, %c0_i32, %c0_i32_0 : i32, i32, i32
  }
  func.func @transform_1(%arg0: i32) -> (i32, i32) {
    %c0_i32 = arith.constant 0 : i32
    %c0_i32_0 = arith.constant 0 : i32
    %c0_i32_1 = arith.constant 0 : i32
    return %c0_i32, %c0_i32_0 : i32, i32
  }
  func.func @transform_2(%arg0: i32) -> (i32, i32) {
    %c0_i32 = arith.constant 0 : i32
    %c0_i32_0 = arith.constant 0 : i32
    %c0_i32_1 = arith.constant 0 : i32
    return %c0_i32, %c0_i32_0 : i32, i32
  }
  func.func @transform_3(%arg0: i32) -> (i32, i32) {
    %c0_i32 = arith.constant 0 : i32
    %c0_i32_0 = arith.constant 0 : i32
    %c0_i32_1 = arith.constant 0 : i32
    return %c0_i32, %c0_i32_0 : i32, i32
  }
  func.func @transform_4(%arg0: i32) -> (i32, i32, i32) {
    %c0_i32 = arith.constant 0 : i32
    %c0_i32_0 = arith.constant 0 : i32
    %c0_i32_1 = arith.constant 0 : i32
    %c0_i32_2 = arith.constant 0 : i32
    return %c0_i32, %c0_i32_0, %c0_i32_1 : i32, i32, i32
  }
  func.func @transform_5(%arg0: i32) -> (i32, i32) {
    %c0_i32 = arith.constant 0 : i32
    %c0_i32_0 = arith.constant 0 : i32
    %c0_i32_1 = arith.constant 0 : i32
    return %c0_i32, %c0_i32_0 : i32, i32
  }
  func.func @transform_6(%arg0: i32) -> (i32, i32) {
    %c0_i32 = arith.constant 0 : i32
    %c0_i32_0 = arith.constant 0 : i32
    %c0_i32_1 = arith.constant 0 : i32
    return %c0_i32, %c0_i32_0 : i32, i32
  }
  func.func @transform_7(%arg0: i32) -> (i32, i32) {
    %c0_i32 = arith.constant 0 : i32
    %c0_i32_0 = arith.constant 0 : i32
    %c0_i32_1 = arith.constant 0 : i32
    return %c0_i32, %c0_i32_0 : i32, i32
  }
  func.func @transform_8(%arg0: i32) -> (i32, i32) {
    %c0_i32 = arith.constant 0 : i32
    %c0_i32_0 = arith.constant 0 : i32
    %c0_i32_1 = arith.constant 0 : i32
    return %c0_i32, %c0_i32_0 : i32, i32
  }
  func.func @transform_9(%arg0: i32) -> (i32, i32, i32) {
    %c0_i32 = arith.constant 0 : i32
    %c0_i32_0 = arith.constant 0 : i32
    %c0_i32_1 = arith.constant 0 : i32
    return %arg0, %c0_i32, %c0_i32_0 : i32, i32, i32
  }
}

</mosaic_0001>

<bundles_post_ra>
// kernel: forward.1
= control target key start
LH: loop header
LB: loop body
LE: loop exit
PB: predicated region body
PF: predicated region fallthrough
CT: control target
= control target key end

     0   :  { %14 = vsyncpa [#allocation3], 0  ;;  %s10710_s0 = inlined_call_operand.vmem [shape: f32[2,128,128], index: 0, kind: input, shape index: {}]   ;;  %s10711_s1 = inlined_call_operand.vmem [shape: bf16[128,512], index: 1, kind: input, shape index: {}]   ;;  %s10712_s2 = inlined_call_operand.vmem [shape: f32[128,256], index: 2, kind: input, shape index: {}]   ;;  %s10713_s3 = inlined_call_operand.vmem [shape: f32[128,256], index: 3, kind: input, shape index: {}]   ;;  %s10714_s4 = inlined_call_operand.hbm [shape: bf16[4,32,128], index: 4, kind: input, shape index: {}]   ;;  %s10715_s5 = inlined_call_operand.vmem [shape: bf16[128,1024], index: 5, kind: input, shape index: {}]   ;;  %s10716_s6 = inlined_call_operand.vmem [shape: f32[1,1024], index: 6, kind: input, shape index: {}]   ;;  %s10717_s7 = inlined_call_operand.vmem [shape: bf16[512,128], index: 7, kind: input, shape index: {}]   ;;  %s10718_s8 = inlined_call_operand.vmem [shape: f32[1,128], index: 8, kind: input, shape index: {}]   ;;  %s10719_s9 = inlined_call_operand.hbm [shape: f32[2,128,128], index: 9, kind: output, shape index: {}]  }
   0x1   :  { %15 = vsyncpa [#allocation4], 0 }
   0x2   :  { %17 = vsyncpa [#allocation4 + $0x1], 0  ;;  %s7544_s30 = smov 0   ;;  %s7546_s10 = smov 0  }
   0x3   :  { %s7548_s11 = smov 0   ;;  %s7550_s12 = smov 0  }
   0x4 LB: > { %s7565_s13 = sadd.s32 4294967295, %s7482_s12   ;;  %s5616_s14 = sadd.s32 4294967294, %s7482_s12   ;;  %s7482_s12 = sphi %s7550_s12, %s11054_s12   ;;  %s7478_s11 = sphi %s7548_s11, %s11053_s11   ;;  %s7474_s10 = sphi %s7546_s10, %s11052_s10   ;;  %s7470_s30 = sphi %s7544_s30, %s11051_s30  }
   0x5   : > { %s7569_s15 = sadd.s32 1, %s7482_s12   ;;  %s224_s16 = sadd.s32 1, %s7478_s11 }
   0x6   : > { %s221_s17 = ssub.s32 %s7482_s12, %s7569_s15  ;;  %p234_p0 = scmp.ne.s32.totalorder %s7478_s11, %s7474_s10 }
   0x7   : > { %p222_p1 = scmp.eq.s32.totalorder %s221_s17, 0  ;;  %p235_p2 = scmp.eq.s32.totalorder %s7565_s13, 1 }
   0x8   : > { %p240_p3 = scmp.ne.s32.totalorder %s7474_s10, %s7470_s30  ;;  %p241_p4 = scmp.eq.s32.totalorder %s5616_s14, 1 }
   0x9   : > { %s7580_s18 = scalar_select %p222_p1, %s7478_s11, %s224_s16  }
   0xa   : > { %p7582_p5 = por %p235_p2, %p234_p0  ;;  %p7586_p6 = por %p241_p4, %p240_p3 }
   0xb   : > { %p5617_p7 = scmp.ge.s32.totalorder %s7482_s12, 1  ;;  %p248_p8 = scmp.lt.s32.totalorder %s7482_s12, 3 }
   0xc   : > { %s10784_s19 = scalar_select %p7582_p5, 1, 0 }
   0xd   : > { %s10785_s20 = scalar_select %p7586_p6, 1, 0 }
   0xe   : > { %p10720_p9 = scmp.eq.s32.totalorder %s7565_s13, 0  ;;  %p7593_p10 = pnand %p5617_p7, %p248_p8 }
   0xf   : > { %s7484_s22 = smov [#allocation2]   ;;  %s7388_s27 = scalar_lea.hbm %s10714_s4, 1024 }
  0x10   : > { %s10786_s21 = scalar_select %p7593_p10, 1, 0 }
  0x11   : > { %s269_s23 = sshll.u32 %s7484_s22, 4  ;;  %p6647_p11 = pneg %p7593_p10  ;;  %s270_s23 = int_to_ptr.vmem [resolvable:$true] %s269_s23 }
  0x12   : > { %p7389_p13 = scmp.ne.s32.totalorder %s10714_s4, %s7388_s27  ;;  %p7395_p3 = scmp.lt.u32.totalorder %s7388_s27, %s10714_s4 }
  0x13   : > { %p7601_p12 = pnand %p10720_p9, %p6647_p11 }
  0x15   : > { %p7390_p0 = pneg %p7601_p12 }
  0x17   : > { %p7391_p1 = pnand %p7390_p0, %p7389_p13 }
  0x19   : > { %p7392_p2 = pneg %p7391_p1 }
  0x1b   : > { %p7397_p4 = pnand %p7395_p3, %p7392_p2 }
  0x1d   : > { %7400 = shalt.err (!%p7397_p4)
}
  0x1e   : > { %s7401_s17 = scalar_lea.vmem %s270_s23, 1024  ;;  %p7409_p9 = scmp.lt.s32.totalorder %s270_s23, %s270_s23 }
  0x1f   : > { %p7402_p7 = scmp.ne.s32.totalorder %s270_s23, %s7401_s17  ;;  %p7410_p6 = scmp.lt.s32.totalorder %s7401_s17, %s7401_s17 }
  0x21   : > { %p7404_p8 = pnand %p7402_p7, %p7390_p0  ;;  %p7411_p5 = por %p7410_p6, %p7409_p9 }
  0x23   : > { %p7405_p11 = pneg %p7404_p8 }
  0x25   : > { %p7412_p10 = pnand %p7411_p5, %p7405_p11 }
  0x27   : > { %7415 = shalt.err (!%p7412_p10)
}
  0x28   : > { %s7485_s22 = smov 64   ;;  %s7486_s25 = smov 4  }
  0x29   : > { %6650 = dma.hbm_to_vmem [thread:$0]  (!%p7601_p12), %s10714_s4, 1024, %s270_s23, [#allocation3], %s7485_s22, %s7485_s22, %s7486_s25  }
  0x2a   : > { %p10788_p13 = scmp.ne.s32.totalorder %s10786_s21, 0 }
  0x2c   : > { %305 = sbr.rel (%p10788_p13) target bundleno = 3155 (0xc53), region = 56 }
  0x33   : > { %p10789_p1 = scmp.eq.s32.totalorder %s7565_s13, 0 }
  0x35   : > { %7461 = dma.done.wait (%p10789_p1), [#allocation3], 1024   ;;  %p10790_p0 = pmov %p10789_p1 }
  0x36   : > { %p341_p5 = scmp.lt.s32.totalorder %s7565_s13, 1  ;;  %v6699_v12 = vld [vmem:[%s10711_s1 + $0x4] ss:$16 sps:$4 sm:$0xff]   ;;  %v6701_v15 = vld [vmem:[%s10711_s1 + $0xc] ss:$16 sps:$4 sm:$0xff]   ;;  %vm1113_vm0 = vcmask 261120  }
  0x37   : > { %7463 = vsyncadd (%p10790_p0), [#allocation3], 4294966272  ;;  %v6703_v16 = vld [vmem:[%s10711_s1] ss:$16 sps:$4 sm:$0xff]   ;;  %v6704_v17 = vld [vmem:[%s10711_s1 + $0x8] ss:$16 sps:$4 sm:$0xff]   ;;  %676 = vmatprep.subr.bf16.mxu0 %v6699_v12  ;;  %789 = vmatprep.subr.bf16.mxu1 %v6701_v15 }
  0x38   : > { %s342_s27 = scalar_select %p341_p5, %s7565_s13, 1  ;;  %v6705_v18 = vld [vmem:[%s10711_s1 + $0x24] ss:$16 sps:$4 sm:$0xff]   ;;  %677 = vmatpush1.bf16.msra.mxu0 %v6703_v16  ;;  %v6707_v19 = vld [vmem:[%s10711_s1 + $0x2c] ss:$16 sps:$4 sm:$0xff]   ;;  %790 = vmatpush1.bf16.msra.mxu1 %v6704_v17 }
  0x39   : > { %678 = vmatprep.subr.bf16.mxu0 %v6705_v18  ;;  %v6709_v22 = vld [vmem:[%s10711_s1 + $0x20] ss:$16 sps:$4 sm:$0xff]   ;;  %v6710_v23 = vld [vmem:[%s10711_s1 + $0x28] ss:$16 sps:$4 sm:$0xff]   ;;  %v6711_v26 = vld [vmem:[%s10711_s1 + $0x44] ss:$16 sps:$4 sm:$0xff]   ;;  %791 = vmatprep.subr.bf16.mxu1 %v6707_v19 }
  0x3a   : > { %s5895_s29 = sshll.u32 %s342_s27, 7  ;;  %v6713_v27 = vld [vmem:[%s10711_s1 + $0x4c] ss:$16 sps:$4 sm:$0xff]   ;;  %v6715_v32 = vld [vmem:[%s10711_s1 + $0x40] ss:$16 sps:$4 sm:$0xff]   ;;  %s7489_s25 = smov 96  }
  0x3b   : > { %s7632_s16 = scalar_lea.vmem %s10710_s0, %s5895_s29  ;;  %v6716_v33 = vld [vmem:[%s10711_s1 + $0x48] ss:$16 sps:$4 sm:$0xff]   ;;  %v6717_v36 = vld [vmem:[%s10711_s1 + $0x64] ss:$16 sps:$4 sm:$0xff]   ;;  %v6719_v37 = vld [vmem:[%s10711_s1 + $0x6c] ss:$16 sps:$4 sm:$0xff]  }
  0x3c   : > { %v7635_v0 = vld [vmem:[%s7632_s16] sm:$0xff]  ;;  %v7638_v1 = vld [vmem:[%s7632_s16 + $0x10] sm:$0xff]  ;;  %v7641_v2 = vld [vmem:[%s7632_s16 + $0x8] sm:$0xff]  ;;  %679 = vmatpush1.bf16.msra.mxu0 %v6709_v22  ;;  %792 = vmatpush1.bf16.msra.mxu1 %v6710_v23  ;;  %s7488_s29 = smov 64   ;;  %s338_s27 = sand.u32 1, %s7474_s10  }
  0x3d   : > { %v363_v3 = vmul.f32 %v7635_v0, %v7635_v0  ;;  %v365_v4 = vmul.f32 %v7638_v1, %v7638_v1  ;;  %v7648_v5 = vld [vmem:[%s7632_s16 + $0x18] sm:$0xff]  ;;  %v364_v6 = vmul.f32 %v7641_v2, %v7641_v2  ;;  %v7655_v8 = vld [vmem:[%s7632_s16 + $0x28] sm:$0xff]  ;;  %v7658_v9 = vld [vmem:[%s7632_s16 + $0x20] sm:$0xff]  ;;  %680 = vmatprep.subr.bf16.mxu0 %v6711_v26  ;;  %793 = vmatprep.subr.bf16.mxu1 %v6713_v27  ;;  %s5622_s14 = sshll.u32 %s338_s27, 7  ;;  %s5896_s23 = sshll.u32 %s7565_s13, 11 }
  0x3e   : > { %v366_v7 = vmul.f32 %v7648_v5, %v7648_v5  ;;  %v7661_v10 = vld [vmem:[%s7632_s16 + $0x38] sm:$0xff]  ;;  %v7664_v11 = vld [vmem:[%s7632_s16 + $0x30] sm:$0xff]  ;;  %v368_v13 = vmul.f32 %v7655_v8, %v7655_v8  ;;  %v367_v14 = vmul.f32 %v7658_v9, %v7658_v9  ;;  %v7689_v20 = vld [vmem:[%s7632_s16 + $0x48] sm:$0xff]  ;;  %s10611_s21 = scalar_lea.vmem [#allocation5], %s5622_s14  ;;  %s10669_s13 = scalar_lea.sflag [#allocation4], %s338_s27 }
  0x3f   : > { %379 = vadd.xlane.f32.xlu0 %v363_v3  ;;  %383 = vadd.xlane.f32.xlu1 %v365_v4  ;;  %v7692_v21 = vld [vmem:[%s7632_s16 + $0x40] sm:$0xff]  ;;  %v370_v24 = vmul.f32 %v7661_v10, %v7661_v10  ;;  %v369_v25 = vmul.f32 %v7664_v11, %v7664_v11  ;;  %v7711_v28 = vld [vmem:[%s7632_s16 + $0x58] sm:$0xff]  ;;  %v7714_v29 = vld [vmem:[%s7632_s16 + $0x50] sm:$0xff]  ;;  %v372_v30 = vmul.f32 %v7689_v20, %v7689_v20  ;;  %v10723_v3 = vmov 0   ;;  %s5542_s17 = sshll.u32 %s10611_s21, 4  ;;  %p11049_p9 = scmp.ne.s32.totalorder %s10784_s19, 0  ;;  %s10662_s17 = int_to_ptr.vmem [resolvable:$true] %s5542_s17 }
  0x40   : > { %v371_v31 = vmul.f32 %v7692_v21, %v7692_v21  ;;  %681 = vmatpush1.bf16.msra.mxu0 %v6715_v32  ;;  %v7727_v34 = vld [vmem:[%s7632_s16 + $0x68] sm:$0xff]  ;;  %v7730_v35 = vld [vmem:[%s7632_s16 + $0x60] sm:$0xff]  ;;  %794 = vmatpush1.bf16.msra.mxu1 %v6716_v33  ;;  %v374_v38 = vmul.f32 %v7711_v28, %v7711_v28  ;;  %v373_v39 = vmul.f32 %v7714_v29, %v7714_v29  ;;  %v7749_v42 = vld [vmem:[%s7632_s16 + $0x78] sm:$0xff]  ;;  %s7416_s26 = scalar_lea.vmem %s10662_s17, 2048  ;;  %s7491_s28 = smov [#allocation5]  }
  0x41   : > { %v6721_v40 = vld [vmem:[%s10711_s1 + $0x60] ss:$16 sps:$4 sm:$0xff]   ;;  %v6722_v41 = vld [vmem:[%s10711_s1 + $0x68] ss:$16 sps:$4 sm:$0xff]   ;;  %682 = vmatprep.subr.bf16.mxu0 %v6717_v36  ;;  %795 = vmatprep.subr.bf16.mxu1 %v6719_v37  ;;  %v6723_v44 = vld [vmem:[%s10711_s1 + $0x84] ss:$16 sps:$4 sm:$0xff]   ;;  %v376_v46 = vmul.f32 %v7727_v34, %v7727_v34  ;;  %v375_v47 = vmul.f32 %v7730_v35, %v7730_v35  ;;  %v378_v53 = vmul.f32 %v7749_v42, %v7749_v42  ;;  %p7417_p6 = scmp.ne.s32.totalorder %s10662_s17, %s7416_s26 }
  0x42   : > { %v7752_v43 = vld [vmem:[%s7632_s16 + $0x70] sm:$0xff]  ;;  %v6725_v45 = vld [vmem:[%s10711_s1 + $0x8c] ss:$16 sps:$4 sm:$0xff]   ;;  %v6728_v49 = vld [vmem:[%s10711_s1 + $0x88] ss:$16 sps:$4 sm:$0xff]   ;;  %708 = vmatprep.mubr.bf16.mxu0 %v10723_v3  ;;  %821 = vmatprep.mubr.bf16.mxu1 %v10723_v3  ;;  %s7420_s14 = sshll.u32 %s7491_s28, 4  ;;  %s7421_s14 = int_to_ptr.vmem [resolvable:$false] %s7420_s14 }
  0x43   : > { %381 = vadd.xlane.f32.xlu0 %v364_v6  ;;  %385 = vadd.xlane.f32.xlu1 %v366_v7  ;;  %v6727_v48 = vld [vmem:[%s10711_s1 + $0x80] ss:$16 sps:$4 sm:$0xff]   ;;  %v6729_v50 = vld [vmem:[%s10711_s1 + $0xa4] ss:$16 sps:$4 sm:$0xff]   ;;  %v6731_v51 = vld [vmem:[%s10711_s1 + $0xac] ss:$16 sps:$4 sm:$0xff]   ;;  %v377_v54 = vmul.f32 %v7752_v43, %v7752_v43  ;;  %p7418_p10 = pnand %p7417_p6, %p11049_p9  ;;  %p7423_p2 = scmp.lt.s32.totalorder %s10662_s17, %s7421_s14 }
  0x44   : > { %683 = vmatpush1.bf16.msra.mxu0 %v6721_v40  ;;  %796 = vmatpush1.bf16.msra.mxu1 %v6722_v41  ;;  %v6733_v52 = vld [vmem:[%s10711_s1 + $0xa0] ss:$16 sps:$4 sm:$0xff]   ;;  %v6734_v55 = vld [vmem:[%s10711_s1 + $0xa8] ss:$16 sps:$4 sm:$0xff]   ;;  %v6735_v56 = vld [vmem:[%s10711_s1 + $0xc4] ss:$16 sps:$4 sm:$0xff]  }
  0x45   : > { %684 = vmatprep.subr.bf16.mxu0 %v6723_v44  ;;  %797 = vmatprep.subr.bf16.mxu1 %v6725_v45  ;;  %v6737_v57 = vld [vmem:[%s10711_s1 + $0xcc] ss:$16 sps:$4 sm:$0xff]   ;;  %v6739_v58 = vld [vmem:[%s10711_s1 + $0xc0] ss:$16 sps:$4 sm:$0xff]   ;;  %v6740_v59 = vld [vmem:[%s10711_s1 + $0xc8] ss:$16 sps:$4 sm:$0xff]   ;;  %p7419_p12 = pneg %p7418_p10 }
  0x46   : > { %v6741_v60 = vld [vmem:[%s10711_s1 + $0xe4] ss:$16 sps:$4 sm:$0xff]   ;;  %v6743_v61 = vld [vmem:[%s10711_s1 + $0xec] ss:$16 sps:$4 sm:$0xff]   ;;  %v6745_v62 = vld [vmem:[%s10711_s1 + $0xe0] ss:$16 sps:$4 sm:$0xff]  }
  0x47   : > { %389 = vadd.xlane.f32.xlu1 %v368_v13  ;;  %387 = vadd.xlane.f32.xlu0 %v367_v14  ;;  %v6746_v63 = vld [vmem:[%s10711_s1 + $0xe8] ss:$16 sps:$4 sm:$0xff]  }
  0x48   : > { %685 = vmatpush1.bf16.msra.mxu0 %v6727_v48  ;;  %798 = vmatpush1.bf16.msra.mxu1 %v6728_v49 }
  0x49   : > { %686 = vmatprep.subr.bf16.mxu0 %v6729_v50  ;;  %799 = vmatprep.subr.bf16.mxu1 %v6731_v51 }
  0x4b   : > { %393 = vadd.xlane.f32.xlu1 %v370_v24  ;;  %391 = vadd.xlane.f32.xlu0 %v369_v25 }
  0x4c   : > { %687 = vmatpush1.bf16.msra.mxu0 %v6733_v52  ;;  %800 = vmatpush1.bf16.msra.mxu1 %v6734_v55 }
  0x4d   : > { %688 = vmatprep.subr.bf16.mxu0 %v6735_v56  ;;  %801 = vmatprep.subr.bf16.mxu1 %v6737_v57 }
  0x4f   : > { %397 = vadd.xlane.f32.xlu1 %v372_v30  ;;  %395 = vadd.xlane.f32.xlu0 %v371_v31 }
  0x50   : > { %689 = vmatpush1.bf16.msra.mxu0 %v6739_v58  ;;  %802 = vmatpush1.bf16.msra.mxu1 %v6740_v59 }
  0x51   : > { %690 = vmatprep.subr.bf16.mxu0 %v6741_v60  ;;  %803 = vmatprep.subr.bf16.mxu1 %v6743_v61 }
  0x53   : > { %401 = vadd.xlane.f32.xlu1 %v374_v38  ;;  %399 = vadd.xlane.f32.xlu0 %v373_v39 }
  0x54   : > { %691 = vmatpush1.bf16.msra.mxu0 %v6745_v62  ;;  %804 = vmatpush1.bf16.msra.mxu1 %v6746_v63 }
  0x57   : > { %405 = vadd.xlane.f32.xlu1 %v376_v46  ;;  %403 = vadd.xlane.f32.xlu0 %v375_v47 }
  0x5b   : > { %409 = vadd.xlane.f32.xlu1 %v378_v53  ;;  %407 = vadd.xlane.f32.xlu0 %v377_v54 }
  0xcc   : > { %v380_v4 = vpop.xlane.xlu0 %379  ;;  %v384_v6 = vpop.xlane.xlu1 %383 }
  0xcd   : > { %v412_v7 = vmul.f32 0.0078125, %v380_v4  ;;  %v414_v13 = vmul.f32 0.0078125, %v384_v6 }
  0xcf   : > { %v428_v12 = vadd.f32 1e-08, %v412_v7  ;;  %v430_v19 = vadd.f32 1e-08, %v414_v13 }
  0xd0   : > { %v382_v14 = vpop.xlane.xlu0 %381  ;;  %v386_v15 = vpop.xlane.xlu1 %385 }
  0xd1   : > { %v413_v16 = vmul.f32 0.0078125, %v382_v14  ;;  %v415_v17 = vmul.f32 0.0078125, %v386_v15  ;;  %6787 = vrsqrt.f32 %v428_v12 }
  0xd3   : > { %v429_v18 = vadd.f32 1e-08, %v413_v16  ;;  %v431_v24 = vadd.f32 1e-08, %v415_v17 }
  0xd4   : > { %v390_v22 = vpop.xlane.xlu1 %389  ;;  %v388_v23 = vpop.xlane.xlu0 %387 }
  0xd5   : > { %6789 = vrsqrt.f32 %v429_v18  ;;  %v417_v25 = vmul.f32 0.0078125, %v390_v22  ;;  %v416_v26 = vmul.f32 0.0078125, %v388_v23 }
  0xd6   : > { %6791 = vrsqrt.f32 %v430_v19 }
  0xd7   : > { %6793 = vrsqrt.f32 %v431_v24  ;;  %v433_v27 = vadd.f32 1e-08, %v417_v25  ;;  %v432_v30 = vadd.f32 1e-08, %v416_v26 }
  0xd8   : > { %v394_v31 = vpop.xlane.xlu1 %393  ;;  %v392_v32 = vpop.xlane.xlu0 %391 }
  0xd9   : > { %6795 = vrsqrt.f32 %v433_v27  ;;  %v419_v36 = vmul.f32 0.0078125, %v394_v31  ;;  %v418_v38 = vmul.f32 0.0078125, %v392_v32 }
  0xda   : > { %6797 = vrsqrt.f32 %v432_v30 }
  0xdb   : > { %v6788_v33 = vpop.eup %6787  ;;  %v435_v45 = vadd.f32 1e-08, %v419_v36  ;;  %v434_v47 = vadd.f32 1e-08, %v418_v38 }
  0xdc   : > { %v460_v39 = vmul.f32 %v6788_v33, %v7635_v0  ;;  %v398_v48 = vpop.xlane.xlu1 %397  ;;  %v396_v49 = vpop.xlane.xlu0 %395 }
  0xdd   : > { %6799 = vrsqrt.f32 %v435_v45  ;;  %v421_v51 = vmul.f32 0.0078125, %v398_v48  ;;  %v966_v45 = vld [vmem:[%s10713_s3] sm:$0xff]  ;;  %v904_v48 = vld [vmem:[%s10712_s2 + $0x10] sm:$0xff] }
  0xde   : > { %6801 = vrsqrt.f32 %v434_v47 }
  0xdf   : > { %v6790_v37 = vpop.eup %6789  ;;  %v437_v55 = vadd.f32 1e-08, %v421_v51 }
  0xe0   : > { %v461_v40 = vmul.f32 %v6790_v37, %v7641_v2  ;;  %v6792_v41 = vpop.eup %6791  ;;  %v420_v2 = vmul.f32 0.0078125, %v396_v49  ;;  %v402_v57 = vpop.xlane.xlu1 %401  ;;  %v968_v49 = vld [vmem:[%s10713_s3 + $0x10] sm:$0xff] }
  0xe1   : > { %v6794_v46 = vpop.eup %6793  ;;  %v462_v50 = vmul.f32 %v6792_v41, %v7638_v1  ;;  %v400_v60 = vpop.xlane.xlu0 %399  ;;  %6803 = vrsqrt.f32 %v437_v55  ;;  %v423_v1 = vmul.f32 0.0078125, %v402_v57 }
  0xe2   : > { %v476_v44 = vpack.c.bf16 %v461_v40, %v460_v39  ;;  %v463_v0 = vmul.f32 %v6794_v46, %v7648_v5  ;;  %v436_v56 = vadd.f32 1e-08, %v420_v2  ;;  %v422_v5 = vmul.f32 0.0078125, %v400_v60 }
  0xe3   : > { %v6796_v52 = vpop.eup %6795  ;;  %v439_v4 = vadd.f32 1e-08, %v423_v1 }
  0xe4   : > { %709 = vmatmul.mubr.bf16.vlgmr.msra.gmra.mrb[0].mxu0 %v476_v44  ;;  %822 = vmatmul.mubr.bf16.vlgmr.msra.gmra.mrb[0].mxu1 %v476_v44  ;;  %v6798_v53 = vpop.eup %6797  ;;  %v477_v54 = vpack.c.bf16 %v463_v0, %v462_v50  ;;  %v465_v59 = vmul.f32 %v6796_v52, %v7655_v8  ;;  %6805 = vrsqrt.f32 %v436_v56  ;;  %v438_v6 = vadd.f32 1e-08, %v422_v5  ;;  %v406_v7 = vpop.xlane.xlu1 %405  ;;  %v905_v52 = vld [vmem:[%s10712_s2 + $0x18] sm:$0xff] }
  0xe5   : > { %718 = vmatprep.mubr.bf16.mxu0 %v10723_v3  ;;  %831 = vmatprep.mubr.bf16.mxu1 %v10723_v3  ;;  %v464_v58 = vmul.f32 %v6798_v53, %v7658_v9  ;;  %v404_v12 = vpop.xlane.xlu0 %403  ;;  %6807 = vrsqrt.f32 %v439_v4  ;;  %v425_v13 = vmul.f32 0.0078125, %v406_v7  ;;  %v969_v53 = vld [vmem:[%s10713_s3 + $0x18] sm:$0xff]  ;;  %v906_v7 = vld [vmem:[%s10712_s2 + $0x20] sm:$0xff] }
  0xe6   : > { %6809 = vrsqrt.f32 %v438_v6  ;;  %v424_v14 = vmul.f32 0.0078125, %v404_v12  ;;  %v907_v12 = vld [vmem:[%s10712_s2 + $0x28] sm:$0xff] }
  0xe7   : > { %v6800_v61 = vpop.eup %6799  ;;  %v478_v62 = vpack.c.bf16 %v465_v59, %v464_v58  ;;  %v441_v18 = vadd.f32 1e-08, %v425_v13  ;;  %v971_v13 = vld [vmem:[%s10713_s3 + $0x28] sm:$0xff] }
  0xe8   : > { %v6802_v63 = vpop.eup %6801  ;;  %v467_v8 = vmul.f32 %v6800_v61, %v7661_v10  ;;  %v440_v19 = vadd.f32 1e-08, %v424_v14  ;;  %v410_v22 = vpop.xlane.xlu1 %409 }
  0xe9   : > { %v466_v9 = vmul.f32 %v6802_v63, %v7664_v11  ;;  %v408_v23 = vpop.xlane.xlu0 %407  ;;  %6811 = vrsqrt.f32 %v441_v18  ;;  %v427_v24 = vmul.f32 0.0078125, %v410_v22  ;;  %v908_v18 = vld [vmem:[%s10712_s2 + $0x30] sm:$0xff] }
  0xea   : > { %6813 = vrsqrt.f32 %v440_v19  ;;  %v426_v25 = vmul.f32 0.0078125, %v408_v23  ;;  %v909_v23 = vld [vmem:[%s10712_s2 + $0x38] sm:$0xff] }
  0xeb   : > { %v6804_v15 = vpop.eup %6803  ;;  %v479_v16 = vpack.c.bf16 %v467_v8, %v466_v9  ;;  %v443_v31 = vadd.f32 1e-08, %v427_v24  ;;  %v970_v9 = vld [vmem:[%s10713_s3 + $0x20] sm:$0xff]  ;;  %v973_v24 = vld [vmem:[%s10713_s3 + $0x38] sm:$0xff] }
  0xec   : > { %719 = vmatmul.mubr.bf16.gmra.mrb[4].mxu0 %v477_v54  ;;  %832 = vmatmul.mubr.bf16.gmra.mrb[4].mxu1 %v477_v54  ;;  %v469_v10 = vmul.f32 %v6804_v15, %v7689_v20  ;;  %v442_v32 = vadd.f32 1e-08, %v426_v25 }
  0xed   : > { %728 = vmatprep.mubr.bf16.mxu0 %v10723_v3  ;;  %841 = vmatprep.mubr.bf16.mxu1 %v10723_v3  ;;  %6815 = vrsqrt.f32 %v443_v31 }
  0xee   : > { %v6806_v17 = vpop.eup %6805  ;;  %6817 = vrsqrt.f32 %v442_v32 }
  0xef   : > { %v468_v11 = vmul.f32 %v6806_v17, %v7692_v21  ;;  %v6808_v26 = vpop.eup %6807  ;;  %v972_v17 = vld [vmem:[%s10713_s3 + $0x30] sm:$0xff] }
  0xf0   : > { %v6810_v30 = vpop.eup %6809  ;;  %v471_v20 = vmul.f32 %v6808_v26, %v7711_v28 }
  0xf1   : > { %v480_v27 = vpack.c.bf16 %v469_v10, %v468_v11  ;;  %v470_v21 = vmul.f32 %v6810_v30, %v7714_v29 }
  0xf3   : > { %v6812_v33 = vpop.eup %6811  ;;  %v481_v36 = vpack.c.bf16 %v471_v20, %v470_v21 }
  0xf4   : > { %729 = vmatmul.mubr.bf16.gmra.mrb[8].mxu0 %v478_v62  ;;  %842 = vmatmul.mubr.bf16.gmra.mrb[8].mxu1 %v478_v62  ;;  %v6814_v37 = vpop.eup %6813  ;;  %v473_v39 = vmul.f32 %v6812_v33, %v7727_v34  ;;  %v902_v34 = vld [vmem:[%s10712_s2] sm:$0xff] }
  0xf5   : > { %738 = vmatprep.mubr.bf16.mxu0 %v10723_v3  ;;  %851 = vmatprep.mubr.bf16.mxu1 %v10723_v3  ;;  %v472_v38 = vmul.f32 %v6814_v37, %v7730_v35 }
  0xf7   : > { %v6816_v28 = vpop.eup %6815  ;;  %v482_v29 = vpack.c.bf16 %v473_v39, %v472_v38 }
  0xf8   : > { %v6818_v40 = vpop.eup %6817  ;;  %v475_v44 = vmul.f32 %v6816_v28, %v7749_v42  ;;  %v967_v42 = vld [vmem:[%s10713_s3 + $0x8] sm:$0xff] }
  0xf9   : > { %v474_v41 = vmul.f32 %v6818_v40, %v7752_v43  ;;  %v903_v43 = vld [vmem:[%s10712_s2 + $0x8] sm:$0xff]  ;;  %v910_v40 = vld [vmem:[%s10712_s2 + $0x40] sm:$0xff] }
  0xfb   : > { %v483_v35 = vpack.c.bf16 %v475_v44, %v474_v41  ;;  %v974_v41 = vld [vmem:[%s10713_s3 + $0x40] sm:$0xff] }
  0xfc   : > { %739 = vmatmul.mubr.bf16.gmra.mrb[12].mxu0 %v479_v16  ;;  %852 = vmatmul.mubr.bf16.gmra.mrb[12].mxu1 %v479_v16 }
  0xfd   : > { %748 = vmatprep.mubr.bf16.mxu0 %v10723_v3  ;;  %861 = vmatprep.mubr.bf16.mxu1 %v10723_v3 }
 0x104   : > { %749 = vmatmul.mubr.bf16.gmra.mrb[16].mxu0 %v480_v27  ;;  %862 = vmatmul.mubr.bf16.gmra.mrb[16].mxu1 %v480_v27 }
 0x105   : > { %758 = vmatprep.mubr.bf16.mxu0 %v10723_v3  ;;  %871 = vmatprep.mubr.bf16.mxu1 %v10723_v3 }
 0x10c   : > { %759 = vmatmul.mubr.bf16.gmra.mrb[20].mxu0 %v481_v36  ;;  %872 = vmatmul.mubr.bf16.gmra.mrb[20].mxu1 %v481_v36 }
 0x10d   : > { %768 = vmatprep.mubr.bf16.mxu0 %v10723_v3  ;;  %881 = vmatprep.mubr.bf16.mxu1 %v10723_v3 }
 0x114   : > { %769 = vmatmul.mubr.bf16.gmra.mrb[24].mxu0 %v482_v29  ;;  %882 = vmatmul.mubr.bf16.gmra.mrb[24].mxu1 %v482_v29 }
 0x115   : > { %778 = vmatprep.mubr.bf16.mxu0 %v10723_v3  ;;  %891 = vmatprep.mubr.bf16.mxu1 %v10723_v3 }
 0x11c   : > { %779 = vmatmul.mubr.bf16.gmra.mrb[28].mxu0 %v483_v35  ;;  %892 = vmatmul.mubr.bf16.gmra.mrb[28].mxu1 %v483_v35  ;;  %v911_v35 = vld [vmem:[%s10712_s2 + $0x48] sm:$0xff] }
 0x1b7   : > { %v710_v46 = vpop.f32.mrb[0].mxu0  ;;  %v823_v47 = vpop.f32.mrb[0].mxu1 }
 0x1b8   : > { %v934_v50 = vmul.f32 %v902_v34, %v710_v46  ;;  %v998_v0 = vmul.f32 %v966_v45, %v823_v47  ;;  %v712_v51 = vpop.f32.mrb[1].mxu0  ;;  %v825_v2 = vpop.f32.mrb[1].mxu1  ;;  %v975_v34 = vld [vmem:[%s10713_s3 + $0x48] sm:$0xff]  ;;  %v912_v46 = vld [vmem:[%s10712_s2 + $0x50] sm:$0xff] }
 0x1b9   : > { %v935_v54 = vmul.f32 %v903_v43, %v712_v51  ;;  %v999_v55 = vmul.f32 %v967_v42, %v825_v2  ;;  %v714_v56 = vpop.f32.mrb[2].mxu0  ;;  %v827_v57 = vpop.f32.mrb[2].mxu1  ;;  %v976_v47 = vld [vmem:[%s10713_s3 + $0x50] sm:$0xff]  ;;  %v913_v51 = vld [vmem:[%s10712_s2 + $0x58] sm:$0xff] }
 0x1ba   : > { %v1030_v58 = vadd.f32 %v998_v0, %v934_v50  ;;  %v936_v59 = vmul.f32 %v904_v48, %v714_v56  ;;  %v1000_v60 = vmul.f32 %v968_v49, %v827_v57  ;;  %v716_v1 = vpop.f32.mrb[3].mxu0  ;;  %v829_v5 = vpop.f32.mrb[3].mxu1  ;;  %v977_v2 = vld [vmem:[%s10713_s3 + $0x58] sm:$0xff] }
 0x1bb   : > { %v1031_v61 = vadd.f32 %v999_v55, %v935_v54  ;;  %v937_v62 = vmul.f32 %v905_v52, %v716_v1  ;;  %v1001_v63 = vmul.f32 %v969_v53, %v829_v5 }
 0x1bc   : > { %v1032_v4 = vadd.f32 %v1000_v60, %v936_v59 }
 0x1bd   : > { %v1033_v6 = vadd.f32 %v1001_v63, %v937_v62 }
 0x1be   : > { %v7872_v8 = vpack.c.bf16 %v1032_v4, %v1030_v58 }
 0x1bf   : > { %v7880_v14 = vpack.c.bf16 %v1033_v6, %v1031_v61  ;;  %v720_v15 = vpop.f32.mrb[4].mxu0  ;;  %v833_v16 = vpop.f32.mrb[4].mxu1  ;;  %v914_v6 = vld [vmem:[%s10712_s2 + $0x60] sm:$0xff] }
 0x1c0   : > { %10791 = vst [vmem:[#allocation8_spill] sm:$0xff] %v7872_v8  ;;  %v938_v19 = vmul.f32 %v906_v7, %v720_v15  ;;  %v1002_v22 = vmul.f32 %v970_v9, %v833_v16  ;;  %v722_v11 = vpop.f32.mrb[5].mxu0  ;;  %v835_v10 = vpop.f32.mrb[5].mxu1  ;;  %6209 = vmatprep.mubr.msk.bf16.mxu0 %vm1113_vm0, %v7872_v8  ;;  %v978_v7 = vld [vmem:[%s10713_s3 + $0x60] sm:$0xff] }
 0x1c1   : > { %v939_v25 = vmul.f32 %v907_v12, %v722_v11  ;;  %v1003_v26 = vmul.f32 %v971_v13, %v835_v10  ;;  %v837_v27 = vpop.f32.mrb[6].mxu1  ;;  %1403 = vrot.lane.b32.xlu0 %v7880_v14, %s7488_s29  ;;  %v724_v30 = vpop.f32.mrb[6].mxu0  ;;  %6609 = vmatprep.subr.msk.bf16.mxu0 %vm1113_vm0, %v7880_v14  ;;  %v7902_v31 = vsel %vm1113_vm0, %v7880_v14, 0  ;;  %v915_v12 = vld [vmem:[%s10712_s2 + $0x68] sm:$0xff] }
 0x1c2   : > { %v1034_v32 = vadd.f32 %v1002_v22, %v938_v19  ;;  %v1004_v21 = vmul.f32 %v972_v17, %v837_v27  ;;  %v940_v20 = vmul.f32 %v908_v18, %v724_v30  ;;  %v726_v33 = vpop.f32.mrb[7].mxu0  ;;  %v839_v36 = vpop.f32.mrb[7].mxu1  ;;  %6194 = vmatpush3.bf16.xpose.msra.mxu0 %v7902_v31  ;;  %v979_v13 = vld [vmem:[%s10713_s3 + $0x68] sm:$0xff]  ;;  %v916_v18 = vld [vmem:[%s10712_s2 + $0x70] sm:$0xff] }
 0x1c3   : > { %v1035_v37 = vadd.f32 %v1003_v26, %v939_v25  ;;  %v941_v38 = vmul.f32 %v909_v23, %v726_v33  ;;  %v1005_v39 = vmul.f32 %v973_v24, %v839_v36  ;;  %v980_v19 = vld [vmem:[%s10713_s3 + $0x70] sm:$0xff]  ;;  %v917_v24 = vld [vmem:[%s10712_s2 + $0x78] sm:$0xff] }
 0x1c4   : > { %v1036_v28 = vadd.f32 %v1004_v21, %v940_v20  ;;  %v981_v25 = vld [vmem:[%s10713_s3 + $0x78] sm:$0xff] }
 0x1c5   : > { %v1037_v29 = vadd.f32 %v1005_v39, %v941_v38 }
 0x1c6   : > { %v7911_v44 = vpack.c.bf16 %v1036_v28, %v1034_v32 }
 0x1c7   : > { %v7919_v45 = vpack.c.bf16 %v1037_v29, %v1035_v37  ;;  %v730_v43 = vpop.f32.mrb[8].mxu0  ;;  %v843_v42 = vpop.f32.mrb[8].mxu1 }
 0x1c8   : > { %10792 = vst [vmem:[#allocation9_spill] sm:$0xff] %v7911_v44  ;;  %v942_v48 = vmul.f32 %v910_v40, %v730_v43  ;;  %v1006_v49 = vmul.f32 %v974_v41, %v843_v42  ;;  %v732_v50 = vpop.f32.mrb[9].mxu0  ;;  %v845_v0 = vpop.f32.mrb[9].mxu1  ;;  %v919_v42 = vld [vmem:[%s10712_s2 + $0x88] sm:$0xff] }
 0x1c9   : > { %v943_v52 = vmul.f32 %v911_v35, %v732_v50  ;;  %v1007_v53 = vmul.f32 %v975_v34, %v845_v0  ;;  %1405 = vrot.lane.b32.xlu1 %v7919_v45, %s7488_s29  ;;  %v734_v54 = vpop.f32.mrb[10].mxu0  ;;  %v847_v55 = vpop.f32.mrb[10].mxu1  ;;  %6610 = vmatprep.subr.msk.bf16.mxu0 %vm1113_vm0, %v7919_v45  ;;  %v7939_v56 = vsel %vm1113_vm0, %v7919_v45, 0  ;;  %v918_v35 = vld [vmem:[%s10712_s2 + $0x80] sm:$0xff]  ;;  %v920_v50 = vld [vmem:[%s10712_s2 + $0x90] sm:$0xff] }
 0x1ca   : > { %v1038_v57 = vadd.f32 %v1006_v49, %v942_v48  ;;  %v944_v58 = vmul.f32 %v912_v46, %v734_v54  ;;  %v1008_v59 = vmul.f32 %v976_v47, %v847_v55  ;;  %v736_v60 = vpop.f32.mrb[11].mxu0  ;;  %v849_v1 = vpop.f32.mrb[11].mxu1  ;;  %6196 = vmatpush3.bf16.xpose.msra.mxu0 %v7939_v56  ;;  %v982_v34 = vld [vmem:[%s10713_s3 + $0x80] sm:$0xff]  ;;  %v983_v46 = vld [vmem:[%s10713_s3 + $0x88] sm:$0xff]  ;;  %v984_v0 = vld [vmem:[%s10713_s3 + $0x90] sm:$0xff] }
 0x1cb   : > { %v1039_v5 = vadd.f32 %v1007_v53, %v943_v52  ;;  %v945_v61 = vmul.f32 %v913_v51, %v736_v60  ;;  %v1009_v62 = vmul.f32 %v977_v2, %v849_v1  ;;  %v921_v54 = vld [vmem:[%s10712_s2 + $0x98] sm:$0xff] }
 0x1cc   : > { %v1040_v63 = vadd.f32 %v1008_v59, %v944_v58  ;;  %v985_v55 = vld [vmem:[%s10713_s3 + $0x98] sm:$0xff] }
 0x1cd   : > { %v1041_v4 = vadd.f32 %v1009_v62, %v945_v61 }
 0x1ce   : > { %v7948_v9 = vpack.c.bf16 %v1040_v63, %v1038_v57 }
 0x1cf   : > { %v7956_v15 = vpack.c.bf16 %v1041_v4, %v1039_v5  ;;  %v740_v16 = vpop.f32.mrb[12].mxu0  ;;  %v853_v17 = vpop.f32.mrb[12].mxu1 }
 0x1d0   : > { %10793 = vst [vmem:[#allocation10_spill] sm:$0xff] %v7948_v9  ;;  %v946_v22 = vmul.f32 %v914_v6, %v740_v16  ;;  %v1010_v11 = vmul.f32 %v978_v7, %v853_v17  ;;  %v742_v10 = vpop.f32.mrb[13].mxu0  ;;  %v855_v23 = vpop.f32.mrb[13].mxu1  ;;  %v922_v17 = vld [vmem:[%s10712_s2 + $0xa0] sm:$0xff] }
 0x1d1   : > { %v947_v26 = vmul.f32 %v915_v12, %v742_v10  ;;  %v1011_v27 = vmul.f32 %v979_v13, %v855_v23  ;;  %1407 = vrot.lane.b32.xlu0 %v7956_v15, %s7488_s29  ;;  %v744_v30 = vpop.f32.mrb[14].mxu0  ;;  %v857_v32 = vpop.f32.mrb[14].mxu1  ;;  %6611 = vmatprep.subr.msk.bf16.mxu0 %vm1113_vm0, %v7956_v15  ;;  %v7976_v21 = vsel %vm1113_vm0, %v7956_v15, 0 }
 0x1d2   : > { %v1042_v20 = vadd.f32 %v1010_v11, %v946_v22  ;;  %v948_v33 = vmul.f32 %v916_v18, %v744_v30  ;;  %v1012_v36 = vmul.f32 %v980_v19, %v857_v32  ;;  %v746_v37 = vpop.f32.mrb[15].mxu0  ;;  %v859_v38 = vpop.f32.mrb[15].mxu1  ;;  %6198 = vmatpush3.bf16.xpose.msra.mxu0 %v7976_v21  ;;  %v986_v18 = vld [vmem:[%s10713_s3 + $0xa0] sm:$0xff]  ;;  %v923_v22 = vld [vmem:[%s10712_s2 + $0xa8] sm:$0xff] }
 0x1d3   : > { %v1043_v39 = vadd.f32 %v1011_v27, %v947_v26  ;;  %v949_v28 = vmul.f32 %v917_v24, %v746_v37  ;;  %v1013_v29 = vmul.f32 %v981_v25, %v859_v38  ;;  %v987_v11 = vld [vmem:[%s10713_s3 + $0xa8] sm:$0xff]  ;;  %v924_v25 = vld [vmem:[%s10712_s2 + $0xb0] sm:$0xff] }
 0x1d4   : > { %v1044_v40 = vadd.f32 %v1012_v36, %v948_v33  ;;  %v988_v26 = vld [vmem:[%s10713_s3 + $0xb0] sm:$0xff]  ;;  %v925_v33 = vld [vmem:[%s10712_s2 + $0xb8] sm:$0xff] }
 0x1d5   : > { %v1045_v41 = vadd.f32 %v1013_v29, %v949_v28  ;;  %v989_v36 = vld [vmem:[%s10713_s3 + $0xb8] sm:$0xff] }
 0x1d6   : > { %v7985_v43 = vpack.c.bf16 %v1044_v40, %v1042_v20 }
 0x1d7   : > { %v7993_v47 = vpack.c.bf16 %v1045_v41, %v1043_v39  ;;  %v750_v48 = vpop.f32.mrb[16].mxu0  ;;  %v863_v49 = vpop.f32.mrb[16].mxu1 }
 0x1d8   : > { %10794 = vst [vmem:[#allocation11_spill] sm:$0xff] %v7985_v43  ;;  %v950_v51 = vmul.f32 %v918_v35, %v750_v48  ;;  %v1014_v2 = vmul.f32 %v982_v34, %v863_v49  ;;  %v752_v52 = vpop.f32.mrb[17].mxu0  ;;  %v865_v53 = vpop.f32.mrb[17].mxu1 }
 0x1d9   : > { %v951_v57 = vmul.f32 %v919_v42, %v752_v52  ;;  %v1015_v58 = vmul.f32 %v983_v46, %v865_v53  ;;  %1409 = vrot.lane.b32.xlu1 %v7993_v47, %s7488_s29  ;;  %v754_v59 = vpop.f32.mrb[18].mxu0  ;;  %v867_v60 = vpop.f32.mrb[18].mxu1  ;;  %6612 = vmatprep.subr.msk.bf16.mxu0 %vm1113_vm0, %v7993_v47  ;;  %v8013_v1 = vsel %vm1113_vm0, %v7993_v47, 0  ;;  %v927_v53 = vld [vmem:[%s10712_s2 + $0xc8] sm:$0xff] }
 0x1da   : > { %v1046_v5 = vadd.f32 %v1014_v2, %v950_v51  ;;  %v952_v61 = vmul.f32 %v920_v50, %v754_v59  ;;  %v1016_v62 = vmul.f32 %v984_v0, %v867_v60  ;;  %v756_v63 = vpop.f32.mrb[19].mxu0  ;;  %v869_v4 = vpop.f32.mrb[19].mxu1  ;;  %6200 = vmatpush3.bf16.xpose.msra.mxu0 %v8013_v1  ;;  %v926_v51 = vld [vmem:[%s10712_s2 + $0xc0] sm:$0xff]  ;;  %v928_v59 = vld [vmem:[%s10712_s2 + $0xd0] sm:$0xff] }
 0x1db   : > { %v1047_v6 = vadd.f32 %v1015_v58, %v951_v57  ;;  %v953_v7 = vmul.f32 %v921_v54, %v756_v63  ;;  %v1017_v12 = vmul.f32 %v985_v55, %v869_v4  ;;  %v990_v2 = vld [vmem:[%s10713_s3 + $0xc0] sm:$0xff]  ;;  %v991_v54 = vld [vmem:[%s10713_s3 + $0xc8] sm:$0xff]  ;;  %v992_v60 = vld [vmem:[%s10713_s3 + $0xd0] sm:$0xff] }
 0x1dc   : > { %v1048_v13 = vadd.f32 %v1016_v62, %v952_v61  ;;  %v929_v4 = vld [vmem:[%s10712_s2 + $0xd8] sm:$0xff] }
 0x1dd   : > { %v1049_v16 = vadd.f32 %v1017_v12, %v953_v7 }
 0x1de   : > { %v8022_v19 = vpack.c.bf16 %v1048_v13, %v1046_v5 }
 0x1df   : > { %v8030_v10 = vpack.c.bf16 %v1049_v16, %v1047_v6  ;;  %v760_v23 = vpop.f32.mrb[20].mxu0  ;;  %v873_v24 = vpop.f32.mrb[20].mxu1  ;;  %v993_v6 = vld [vmem:[%s10713_s3 + $0xd8] sm:$0xff] }
 0x1e0   : > { %10795 = vst [vmem:[#allocation12_spill] sm:$0xff] %v8022_v19  ;;  %v954_v27 = vmul.f32 %v922_v17, %v760_v23  ;;  %v1018_v30 = vmul.f32 %v986_v18, %v873_v24  ;;  %v762_v32 = vpop.f32.mrb[21].mxu0  ;;  %v875_v20 = vpop.f32.mrb[21].mxu1 }
 0x1e1   : > { %v955_v37 = vmul.f32 %v923_v22, %v762_v32  ;;  %v1019_v38 = vmul.f32 %v987_v11, %v875_v20  ;;  %1411 = vrot.lane.b32.xlu1 %v8030_v10, %s7488_s29  ;;  %v764_v39 = vpop.f32.mrb[22].mxu0  ;;  %v877_v28 = vpop.f32.mrb[22].mxu1  ;;  %6613 = vmatprep.subr.msk.bf16.mxu0 %vm1113_vm0, %v8030_v10  ;;  %v8050_v29 = vsel %vm1113_vm0, %v8030_v10, 0  ;;  %v930_v20 = vld [vmem:[%s10712_s2 + $0xe0] sm:$0xff] }
 0x1e2   : > { %v1050_v40 = vadd.f32 %v1018_v30, %v954_v27  ;;  %v956_v41 = vmul.f32 %v924_v25, %v764_v39  ;;  %v1020_v35 = vmul.f32 %v988_v26, %v877_v28  ;;  %v766_v34 = vpop.f32.mrb[23].mxu0  ;;  %v879_v42 = vpop.f32.mrb[23].mxu1  ;;  %6202 = vmatpush3.bf16.xpose.msra.mxu0 %v8050_v29 }
 0x1e3   : > { %v1051_v46 = vadd.f32 %v1019_v38, %v955_v37  ;;  %v957_v48 = vmul.f32 %v925_v33, %v766_v34  ;;  %v1021_v49 = vmul.f32 %v989_v36, %v879_v42  ;;  %v994_v33 = vld [vmem:[%s10713_s3 + $0xe0] sm:$0xff]  ;;  %v931_v37 = vld [vmem:[%s10712_s2 + $0xe8] sm:$0xff] }
 0x1e4   : > { %v1052_v50 = vadd.f32 %v1020_v35, %v956_v41  ;;  %v995_v38 = vld [vmem:[%s10713_s3 + $0xe8] sm:$0xff]  ;;  %v932_v41 = vld [vmem:[%s10712_s2 + $0xf0] sm:$0xff] }
 0x1e5   : > { %v1053_v0 = vadd.f32 %v1021_v49, %v957_v48  ;;  %v996_v35 = vld [vmem:[%s10713_s3 + $0xf0] sm:$0xff]  ;;  %v933_v49 = vld [vmem:[%s10712_s2 + $0xf8] sm:$0xff] }
 0x1e6   : > { %v8059_v52 = vpack.c.bf16 %v1052_v50, %v1050_v40  ;;  %v997_v50 = vld [vmem:[%s10713_s3 + $0xf8] sm:$0xff] }
 0x1e7   : > { %v8067_v55 = vpack.c.bf16 %v1053_v0, %v1051_v46  ;;  %v770_v57 = vpop.f32.mrb[24].mxu0  ;;  %v883_v58 = vpop.f32.mrb[24].mxu1 }
 0x1e8   : > { %v958_v5 = vmul.f32 %v926_v51, %v770_v57  ;;  %v1022_v61 = vmul.f32 %v990_v2, %v883_v58  ;;  %v772_v62 = vpop.f32.mrb[25].mxu0  ;;  %v885_v63 = vpop.f32.mrb[25].mxu1 }
 0x1e9   : > { %v959_v7 = vmul.f32 %v927_v53, %v772_v62  ;;  %v1023_v12 = vmul.f32 %v991_v54, %v885_v63  ;;  %1413 = vrot.lane.b32.xlu1 %v8067_v55, %s7488_s29  ;;  %v774_v13 = vpop.f32.mrb[26].mxu0  ;;  %v887_v16 = vpop.f32.mrb[26].mxu1  ;;  %6614 = vmatprep.subr.msk.bf16.mxu0 %vm1113_vm0, %v8067_v55  ;;  %v8087_v17 = vsel %vm1113_vm0, %v8067_v55, 0 }
 0x1ea   : > { %v1054_v18 = vadd.f32 %v1022_v61, %v958_v5  ;;  %v960_v22 = vmul.f32 %v928_v59, %v774_v13  ;;  %v1024_v11 = vmul.f32 %v992_v60, %v887_v16  ;;  %v776_v23 = vpop.f32.mrb[27].mxu0  ;;  %v889_v24 = vpop.f32.mrb[27].mxu1  ;;  %6204 = vmatpush3.bf16.xpose.msra.mxu0 %v8087_v17  ;;  %v6747_v13 = vld [vmem:[#allocation2] sm:$0xff]  }
 0x1eb   : > { %v1055_v25 = vadd.f32 %v1023_v12, %v959_v7  ;;  %v961_v26 = vmul.f32 %v929_v4, %v776_v23  ;;  %v1025_v27 = vmul.f32 %v993_v6, %v889_v24 }
 0x1ec   : > { %v1056_v30 = vadd.f32 %v1024_v11, %v960_v22 }
 0x1ed   : > { %v1057_v32 = vadd.f32 %v1025_v27, %v961_v26  ;;  %v1078_v27 = vlaneseq }
 0x1ee   : > { %v8096_v36 = vpack.c.bf16 %v1056_v30, %v1054_v18  ;;  %v6748_v18 = vld [vmem:[#allocation2 + $0x8] sm:$0xff]  }
 0x1ef   : > { %v8104_v39 = vpack.c.bf16 %v1057_v32, %v1055_v25  ;;  %v780_v28 = vpop.f32.mrb[28].mxu0  ;;  %v893_v40 = vpop.f32.mrb[28].mxu1  ;;  %v8175_v30 = vshrl.u32 %v1078_v27, 7 }
 0x1f0   : > { %10796 = vst [vmem:[#allocation13_spill] sm:$0xff] %v8096_v36  ;;  %v962_v34 = vmul.f32 %v930_v20, %v780_v28  ;;  %v1026_v42 = vmul.f32 %v994_v33, %v893_v40  ;;  %v782_v46 = vpop.f32.mrb[29].mxu0  ;;  %v895_v48 = vpop.f32.mrb[29].mxu1  ;;  %v8180_v20 = vand.u32 127, %v1078_v27 }
 0x1f1   : > { %v963_v0 = vmul.f32 %v931_v37, %v782_v46  ;;  %v1027_v51 = vmul.f32 %v995_v38, %v895_v48  ;;  %v784_v2 = vpop.f32.mrb[30].mxu0  ;;  %v897_v53 = vpop.f32.mrb[30].mxu1  ;;  %6615 = vmatprep.subr.msk.bf16.mxu0 %vm1113_vm0, %v8104_v39  ;;  %v8122_v54 = vsel %vm1113_vm0, %v8104_v39, 0  ;;  %v8178_v32 = vadd.s32 16, %v8175_v30 }
 0x1f2   : > { %v1058_v57 = vadd.f32 %v1026_v42, %v962_v34  ;;  %v964_v58 = vmul.f32 %v932_v41, %v784_v2  ;;  %v1028_v59 = vmul.f32 %v996_v35, %v897_v53  ;;  %v786_v60 = vpop.f32.mrb[31].mxu0  ;;  %v899_v5 = vpop.f32.mrb[31].mxu1  ;;  %6206 = vmatpush3.bf16.xpose.msra.mxu0 %v8122_v54  ;;  %v8183_v33 = vadd.s32 8, %v8175_v30 }
 0x1f3   : > { %v1059_v61 = vadd.f32 %v1027_v51, %v963_v0  ;;  %v965_v62 = vmul.f32 %v933_v49, %v786_v60  ;;  %v1029_v63 = vmul.f32 %v997_v50, %v899_v5  ;;  %vm1099_vm1 = vcmp.gt.s32.totalorder %v8180_v20, %v8178_v32 }
 0x1f4   : > { %v1060_v4 = vadd.f32 %v1028_v59, %v964_v58  ;;  %vm1097_vm2 = vcmp.gt.s32.totalorder %v8180_v20, %v8175_v30  ;;  %v8190_v37 = vadd.s32 24, %v8175_v30  ;;  %vm1098_vm3 = vcmp.gt.s32.totalorder %v8180_v20, %v8183_v33 }
 0x1f5   : > { %v1061_v6 = vadd.f32 %v1029_v63, %v965_v62  ;;  %v8228_v62 = vadd.s32 40, %v8175_v30  ;;  %v8233_v63 = vadd.s32 48, %v8175_v30  ;;  %v8260_v27 = vadd.s32 88, %v8175_v30 }
 0x1f6   : > { %v8125_v7 = vpack.c.bf16 %v1060_v4, %v1058_v57  ;;  %vm1100_vm4 = vcmp.gt.s32.totalorder %v8180_v20, %v8190_v37  ;;  %v8238_v4 = vadd.s32 72, %v8175_v30  ;;  %v8320_v3 = vadd.s32 96, %v8175_v30 }
 0x1f7   : > { %v8127_v12 = vpack.c.bf16 %v1061_v6, %v1059_v61  ;;  %v8225_v61 = vadd.s32 32, %v8175_v30  ;;  %vm1102_vm6 = vcmp.gt.s32.totalorder %v8180_v20, %v8228_v62  ;;  %vm1103_vm7 = vcmp.gt.s32.totalorder %v8180_v20, %v8233_v63  ;;  %10798 = vst [vmem:[#allocation15_spill] sm:$0xff] %v8260_v27 }
 0x1f8   : > { %10797 = vst [vmem:[#allocation14_spill] sm:$0xff] %v8238_v4  ;;  %vm1106_vm8 = vcmp.gt.s32.totalorder %v8180_v20, %v8238_v4  ;;  %vm1108_vm10 = vcmp.gt.s32.totalorder %v8180_v20, %v8260_v27  ;;  %10802 = vst [vmem:[#allocation19_spill] sm:$0xff] %v8320_v3  ;;  %vm1109_vm15 = vcmp.gt.s32.totalorder %v8180_v20, %v8320_v3 }
 0x1f9   : > { %6616 = vmatprep.subr.msk.bf16.mxu0 %vm1113_vm0, %v8127_v12  ;;  %v8133_v16 = vsel %vm1113_vm0, %v8127_v12, 0  ;;  %vm1101_vm5 = vcmp.gt.s32.totalorder %v8180_v20, %v8225_v61 }
 0x1fa   : > { %6208 = vmatpush3.bf16.xpose.msra.mxu0 %v8133_v16 }
 0x1fb   : > { %6257 = vmatprep.subr.bf16.mxu0 %v6747_v13 }
 0x201   : > { %6210 = vmatmul.mubr.msk.bf16.vlgmr.msra.gmra.mrb[32].mxu0 %vm1113_vm0, %v7911_v44 }
 0x202   : > { %6213 = vmatprep.mubr.msk.bf16.mxu0 %vm1113_vm0, %v7948_v9  ;;  %6258 = vmatpush3.bf16.msra.mxu0 %v6747_v13 }
 0x203   : > { %6259 = vmatprep.subr.bf16.mxu0 %v6748_v18 }
 0x206   : > { %6260 = vmatpush3.bf16.msra.mxu0 %v6748_v18  ;;  %v8254_v18 = vadd.s32 56, %v8175_v30 }
 0x208   : > { %vm1104_vm9 = vcmp.gt.s32.totalorder %v8180_v20, %v8254_v18 }
 0x209   : > { %6214 = vmatmul.mubr.msk.bf16.gmra.mrb[36].mxu0 %vm1113_vm0, %v7985_v43 }
 0x20a   : > { %6217 = vmatprep.mubr.msk.bf16.mxu0 %vm1113_vm0, %v8022_v19 }
 0x211   : > { %6218 = vmatmul.mubr.msk.bf16.gmra.mrb[40].mxu0 %vm1113_vm0, %v8059_v52 }
 0x212   : > { %6221 = vmatprep.mubr.msk.bf16.mxu0 %vm1113_vm0, %v8096_v36 }
 0x219   : > { %6222 = vmatmul.mubr.msk.bf16.gmra.mrb[44].mxu0 %vm1113_vm0, %v8125_v7 }
 0x233   : > { %v8150_v22 = vpop.permute.xlu0 %1403 }
 0x234   : > { %6225 = vmatprep.subr.bf16.mxu1 %v8150_v22  ;;  %6309 = vmatprep.subr.bf16.mxu0 %v8150_v22 }
 0x235   : > { %6226 = vmatpush3.bf16.msra.mxu1 %v8150_v22 }
 0x23b   : > { %v8155_v11 = vpop.permute.xlu1 %1405 }
 0x23c   : > { %6227 = vmatprep.subr.bf16.mxu1 %v8155_v11 }
 0x23d   : > { %6228 = vmatpush3.bf16.msra.mxu1 %v8155_v11 }
 0x243   : > { %v8159_v23 = vpop.permute.xlu0 %1407 }
 0x244   : > { %6229 = vmatprep.subr.bf16.mxu1 %v8159_v23 }
 0x245   : > { %6230 = vmatpush3.bf16.msra.mxu1 %v8159_v23 }
 0x24b   : > { %v8163_v24 = vpop.permute.xlu1 %1409 }
 0x24c   : > { %6231 = vmatprep.subr.bf16.mxu1 %v8163_v24 }
 0x24d   : > { %6232 = vmatpush3.bf16.msra.mxu1 %v8163_v24 }
 0x253   : > { %v8167_v25 = vpop.permute.xlu1 %1411 }
 0x254   : > { %6233 = vmatprep.subr.bf16.mxu1 %v8167_v25 }
 0x255   : > { %6234 = vmatpush3.bf16.msra.mxu1 %v8167_v25 }
 0x25b   : > { %v8171_v26 = vpop.permute.xlu1 %1413 }
 0x25c   : > { %6235 = vmatprep.subr.bf16.mxu1 %v8171_v26 }
 0x25d   : > { %6236 = vmatpush3.bf16.msra.mxu1 %v8171_v26 }
 0x2d4   : > { %v6211_v38 = vpop.f32.mrb[32].mxu0 }
 0x2d5   : > { %v1196_v28 = vpop.f32.mrb[33].mxu0  ;;  %v8195_v40 = vsel %vm1099_vm1, -1e+09, %v6211_v38 }
 0x2d6   : > { %1279 = vmax.xlane.f32.xlu0 %v8195_v40  ;;  %v6212_v41 = vpop.f32.mrb[34].mxu0  ;;  %v8203_v35 = vsel %vm1097_vm2, -1e+09, %v1196_v28 }
 0x2d7   : > { %1275 = vmax.xlane.f32.xlu1 %v8203_v35  ;;  %v1199_v34 = vpop.f32.mrb[35].mxu0  ;;  %v8217_v46 = vsel %vm1100_vm4, -1e+09, %v6212_v41  ;;  %v8276_v41 = vadd.s32 64, %v8175_v30 }
 0x2d8   : > { %v8211_v42 = vsel %vm1098_vm3, -1e+09, %v1199_v34  ;;  %v8282_v34 = vadd.s32 104, %v8175_v30 }
 0x2d9   : > { %10799 = vst [vmem:[#allocation16_spill] sm:$0xff] %v8276_v41  ;;  %vm1105_vm11 = vcmp.gt.s32.totalorder %v8180_v20, %v8276_v41 }
 0x2da   : > { %1277 = vmax.xlane.f32.xlu0 %v8211_v42  ;;  %10800 = vst [vmem:[#allocation17_spill] sm:$0xff] %v8282_v34  ;;  %vm10727_vm12 = vcmp.gt.s32.totalorder %v8180_v20, %v8282_v34  ;;  %v8339_v34 = vadd.s32 112, %v8175_v30 }
 0x2db   : > { %1281 = vmax.xlane.f32.xlu1 %v8217_v46 }
 0x2dc   : > { %v6215_v48 = vpop.f32.mrb[36].mxu0  ;;  %10803 = vst [vmem:[#allocation20_spill] sm:$0xff] %v8339_v34 }
 0x2dd   : > { %v1212_v49 = vpop.f32.mrb[37].mxu0  ;;  %v8265_v38 = vsel %vm1103_vm7, -1e+09, %v6215_v48 }
 0x2de   : > { %v6216_v50 = vpop.f32.mrb[38].mxu0  ;;  %v8243_v6 = vsel %vm1101_vm5, -1e+09, %v1212_v49 }
 0x2df   : > { %v1215_v0 = vpop.f32.mrb[39].mxu0  ;;  %v8287_v48 = vsel %vm1104_vm9, -1e+09, %v6216_v50  ;;  %v8304_v50 = vadd.s32 120, %v8175_v30 }
 0x2e0   : > { %v8249_v13 = vsel %vm1102_vm6, -1e+09, %v1215_v0  ;;  %v8298_v0 = vadd.s32 80, %v8175_v30 }
 0x2e1   : > { %10801 = vst [vmem:[#allocation18_spill] sm:$0xff] %v8304_v50  ;;  %vm1112_vm14 = vcmp.gt.s32.totalorder %v8180_v20, %v8304_v50 }
 0x2e2   : > { %vm1107_vm13 = vcmp.gt.s32.totalorder %v8180_v20, %v8298_v0  ;;  %v6752_v0 = vld [vmem:[#allocation2 + $0x28] sm:$0xff]  }
 0x2e4   : > { %v6219_v51 = vpop.f32.mrb[40].mxu0 }
 0x2e5   : > { %v1228_v2 = vpop.f32.mrb[41].mxu0 }
 0x2e6   : > { %v6220_v53 = vpop.f32.mrb[42].mxu0 }
 0x2e7   : > { %v1231_v57 = vpop.f32.mrb[43].mxu0  ;;  %v8293_v49 = vsel %vm1108_vm10, -1e+09, %v6220_v53 }
 0x2e8   : > { %v8271_v28 = vsel %vm1106_vm8, -1e+09, %v1231_v57  ;;  %v8309_v57 = vsel %vm1105_vm11, -1e+09, %v1228_v2  ;;  %v8328_v2 = vsel %vm1107_vm13, -1e+09, %v6219_v51 }
 0x2ec   : > { %1417 = vrot.lane.b32.xlu1 %v8127_v12, %s7488_s29  ;;  %v6223_v58 = vpop.f32.mrb[44].mxu0 }
 0x2ed   : > { %v1244_v59 = vpop.f32.mrb[45].mxu0 }
 0x2ee   : > { %v6224_v60 = vpop.f32.mrb[46].mxu0  ;;  %v8345_v51 = vsel %vm1109_vm15, -1e+09, %v1244_v59 }
 0x2ef   : > { %v1247_v5 = vpop.f32.mrb[47].mxu0 }
 0x2f0   : > { %1415 = vrot.lane.b32.xlu0 %v8104_v39, %s7488_s29  ;;  %v8315_v53 = vsel %vm10727_vm12, -1e+09, %v1247_v5  ;;  %v8334_v5 = vsel %vm1112_vm14, -1e+09, %v6224_v60  ;;  %vm10744_vm12 = vcmp.gt.s32.totalorder %v8180_v20, %v8339_v34 }
 0x2f1   : > { %v8353_v60 = vsel %vm10744_vm12, -1e+09, %v6223_v58 }
 0x30f   : > { %1283 = vmax.xlane.f32.xlu0 %v8243_v6 }
 0x310   : > { %1285 = vmax.xlane.f32.xlu1 %v8249_v13 }
 0x313   : > { %1287 = vmax.xlane.f32.xlu0 %v8265_v38 }
 0x314   : > { %1293 = vmax.xlane.f32.xlu1 %v8271_v28 }
 0x317   : > { %1289 = vmax.xlane.f32.xlu0 %v8287_v48 }
 0x318   : > { %1297 = vmax.xlane.f32.xlu1 %v8293_v49 }
 0x31b   : > { %1291 = vmax.xlane.f32.xlu0 %v8309_v57 }
 0x31c   : > { %1301 = vmax.xlane.f32.xlu1 %v8315_v53 }
 0x31f   : > { %1295 = vmax.xlane.f32.xlu0 %v8328_v2 }
 0x320   : > { %1305 = vmax.xlane.f32.xlu1 %v8334_v5 }
 0x323   : > { %1299 = vmax.xlane.f32.xlu0 %v8345_v51 }
 0x327   : > { %1303 = vmax.xlane.f32.xlu0 %v8353_v60 }
 0x331   : > { %1727 = vrot.lane.b32.xlu1 %v7911_v44, %s7489_s25 }
 0x335   : > { %1729 = vrot.lane.b32.xlu1 %v7948_v9, %s7489_s25 }
 0x339   : > { %1731 = vrot.lane.b32.xlu1 %v7985_v43, %s7489_s25 }
 0x33d   : > { %1725 = vrot.lane.b32.xlu0 %v7872_v8, %s7489_s25  ;;  %1735 = vrot.lane.b32.xlu1 %v8059_v52, %s7489_s25 }
 0x341   : > { %1733 = vrot.lane.b32.xlu0 %v8022_v19, %s7489_s25  ;;  %1739 = vrot.lane.b32.xlu1 %v8125_v7, %s7489_s25 }
 0x345   : > { %1737 = vrot.lane.b32.xlu0 %v8096_v36, %s7489_s25  ;;  %2307 = vrot.lane.b32.xlu1 %v7919_v45, %s7489_s25 }
 0x349   : > { %2305 = vrot.lane.b32.xlu0 %v7880_v14, %s7489_s25  ;;  %2311 = vrot.lane.b32.xlu1 %v7993_v47, %s7489_s25 }
 0x34d   : > { %2309 = vrot.lane.b32.xlu0 %v7956_v15, %s7489_s25  ;;  %2315 = vrot.lane.b32.xlu1 %v8067_v55, %s7489_s25 }
 0x351   : > { %2313 = vrot.lane.b32.xlu0 %v8030_v10, %s7489_s25  ;;  %2289 = vrot.lane.b32.xlu1 %v7872_v8, %s7488_s29 }
 0x355   : > { %2317 = vrot.lane.b32.xlu0 %v8104_v39, %s7489_s25  ;;  %2293 = vrot.lane.b32.xlu1 %v7948_v9, %s7488_s29 }
 0x359   : > { %2319 = vrot.lane.b32.xlu0 %v8127_v12, %s7489_s25  ;;  %2297 = vrot.lane.b32.xlu1 %v8022_v19, %s7488_s29 }
 0x35d   : > { %2291 = vrot.lane.b32.xlu0 %v7911_v44, %s7488_s29  ;;  %2301 = vrot.lane.b32.xlu1 %v8096_v36, %s7488_s29 }
 0x361   : > { %2295 = vrot.lane.b32.xlu0 %v7985_v43, %s7488_s29 }
 0x363   : > { %v1280_v58 = vpop.xlane.xlu0 %1279 }
 0x364   : > { %v1309_v59 = vsub.f32 %v8195_v40, %v1280_v58  ;;  %v1276_v8 = vpop.xlane.xlu1 %1275 }
 0x365   : > { %v1307_v9 = vsub.f32 %v8203_v35, %v1276_v8  ;;  %2299 = vrot.lane.b32.xlu0 %v8059_v52, %s7488_s29 }
 0x366   : > { %v1327_v50 = vmul.f32 1.442695, %v1309_v59 }
 0x367   : > { %v1323_v19 = vmul.f32 1.442695, %v1307_v9  ;;  %v1278_v27 = vpop.xlane.xlu0 %1277 }
 0x368   : > { %v1308_v44 = vsub.f32 %v8211_v42, %v1278_v27  ;;  %v1282_v4 = vpop.xlane.xlu1 %1281  ;;  %6819 = vpow2.f32 %v1327_v50 }
 0x369   : > { %v1310_v36 = vsub.f32 %v8217_v46, %v1282_v4  ;;  %6821 = vpow2.f32 %v1323_v19 }
 0x36a   : > { %v1325_v34 = vmul.f32 1.442695, %v1308_v44 }
 0x36b   : > { %v1329_v43 = vmul.f32 1.442695, %v1310_v36  ;;  %v8390_v41 = vpop.permute.xlu0 %1415 }
 0x36c   : > { %6823 = vpow2.f32 %v1325_v34  ;;  %v8392_v40 = vpop.permute.xlu1 %1417  ;;  %6237 = vmatprep.subr.bf16.mxu1 %v8390_v41 }
 0x36d   : > { %6825 = vpow2.f32 %v1329_v43  ;;  %6238 = vmatpush3.bf16.msra.mxu1 %v8390_v41 }
 0x36e   : > { %6239 = vmatprep.subr.bf16.mxu1 %v8392_v40 }
 0x371   : > { %6240 = vmatpush3.bf16.msra.mxu1 %v8392_v40 }
 0x372   : > { %6617 = vmatprep.subr.msk.bf16.mxu1 %vm1113_vm0, %v7880_v14  ;;  %v6820_v8 = vpop.eup %6819 }
 0x373   : > { %v6822_v44 = vpop.eup %6821 }
 0x376   : > { %v6824_v9 = vpop.eup %6823 }
 0x377   : > { %v6826_v19 = vpop.eup %6825  ;;  %v1387_v36 = vpack.c.bf16 %v6824_v9, %v6822_v44 }
 0x378   : > { %v1388_v35 = vpack.c.bf16 %v6826_v19, %v6820_v8 }
 0x379   : > { %6241 = vmatprep.mubr.bf16.mxu1 %v1387_v36 }
 0x37a   : > { %6242 = vmatmul.mubr.bf16.vlgmr.msra.gmra.mrb[32].mxu1 %v1388_v35 }
 0x37b   : > { %6278 = vmatpush3.bf16.xpose.msra.mxu1 %v7902_v31 }
 0x37c   : > { %6618 = vmatprep.subr.msk.bf16.mxu1 %vm1113_vm0, %v7919_v45 }
 0x381   : > { %1359 = vadd.xlane.f32.xlu1 %v6820_v8 }
 0x383   : > { %6280 = vmatpush3.bf16.xpose.msra.mxu1 %v7939_v56 }
 0x384   : > { %6619 = vmatprep.subr.msk.bf16.mxu1 %vm1113_vm0, %v7956_v15  ;;  %1357 = vadd.xlane.f32.xlu0 %v6824_v9 }
 0x385   : > { %1355 = vadd.xlane.f32.xlu1 %v6822_v44 }
 0x389   : > { %1361 = vadd.xlane.f32.xlu1 %v6826_v19 }
 0x38b   : > { %6282 = vmatpush3.bf16.xpose.msra.mxu1 %v7976_v21 }
 0x38c   : > { %6620 = vmatprep.subr.msk.bf16.mxu1 %vm1113_vm0, %v7993_v47 }
 0x393   : > { %6284 = vmatpush3.bf16.xpose.msra.mxu1 %v8013_v1 }
 0x394   : > { %6621 = vmatprep.subr.msk.bf16.mxu1 %vm1113_vm0, %v8030_v10 }
 0x39b   : > { %6286 = vmatpush3.bf16.xpose.msra.mxu1 %v8050_v29 }
 0x39c   : > { %6622 = vmatprep.subr.msk.bf16.mxu1 %vm1113_vm0, %v8067_v55  ;;  %v1284_v31 = vpop.xlane.xlu0 %1283 }
 0x39d   : > { %v1311_v56 = vsub.f32 %v8243_v6, %v1284_v31  ;;  %v1286_v43 = vpop.xlane.xlu1 %1285 }
 0x39e   : > { %v1312_v42 = vsub.f32 %v8249_v13, %v1286_v43 }
 0x39f   : > { %v1331_v21 = vmul.f32 1.442695, %v1311_v56 }
 0x3a0   : > { %v1333_v46 = vmul.f32 1.442695, %v1312_v42  ;;  %v1288_v4 = vpop.xlane.xlu0 %1287 }
 0x3a1   : > { %6827 = vpow2.f32 %v1331_v21  ;;  %v1313_v1 = vsub.f32 %v8265_v38, %v1288_v4  ;;  %v1294_v27 = vpop.xlane.xlu1 %1293 }
 0x3a2   : > { %6829 = vpow2.f32 %v1333_v46  ;;  %v1316_v29 = vsub.f32 %v8271_v28, %v1294_v27 }
 0x3a3   : > { %v1335_v34 = vmul.f32 1.442695, %v1313_v1  ;;  %6288 = vmatpush3.bf16.xpose.msra.mxu1 %v8087_v17 }
 0x3a4   : > { %6623 = vmatprep.subr.msk.bf16.mxu1 %vm1113_vm0, %v8104_v39  ;;  %v1290_v6 = vpop.xlane.xlu0 %1289  ;;  %v1341_v59 = vmul.f32 1.442695, %v1316_v29 }
 0x3a5   : > { %6831 = vpow2.f32 %v1335_v34  ;;  %v1314_v13 = vsub.f32 %v8287_v48, %v1290_v6  ;;  %v1298_v50 = vpop.xlane.xlu1 %1297 }
 0x3a6   : > { %v1318_v8 = vsub.f32 %v8293_v49, %v1298_v50 }
 0x3a7   : > { %v1337_v58 = vmul.f32 1.442695, %v1314_v13 }
 0x3a8   : > { %v1292_v38 = vpop.xlane.xlu0 %1291  ;;  %v1345_v35 = vmul.f32 1.442695, %v1318_v8 }
 0x3a9   : > { %6833 = vpow2.f32 %v1337_v58  ;;  %v1315_v44 = vsub.f32 %v8309_v57, %v1292_v38  ;;  %v1302_v9 = vpop.xlane.xlu1 %1301 }
 0x3aa   : > { %v1320_v28 = vsub.f32 %v8315_v53, %v1302_v9  ;;  %6835 = vpow2.f32 %v1341_v59 }
 0x3ab   : > { %v6828_v17 = vpop.eup %6827  ;;  %v1339_v19 = vmul.f32 1.442695, %v1315_v44  ;;  %6290 = vmatpush3.bf16.xpose.msra.mxu1 %v8122_v54 }
 0x3ac   : > { %v6830_v36 = vpop.eup %6829  ;;  %6624 = vmatprep.subr.msk.bf16.mxu1 %vm1113_vm0, %v8127_v12  ;;  %1363 = vadd.xlane.f32.xlu0 %v6828_v17  ;;  %v1296_v48 = vpop.xlane.xlu0 %1295  ;;  %v1349_v42 = vmul.f32 1.442695, %v1320_v28 }
 0x3ad   : > { %6837 = vpow2.f32 %v1339_v19  ;;  %v1317_v49 = vsub.f32 %v8328_v2, %v1296_v48  ;;  %v1306_v31 = vpop.xlane.xlu1 %1305  ;;  %v1389_v57 = vpack.c.bf16 %v6830_v36, %v6828_v17 }
 0x3ae   : > { %v1322_v56 = vsub.f32 %v8334_v5, %v1306_v31  ;;  %6839 = vpow2.f32 %v1345_v35 }
 0x3af   : > { %v6832_v43 = vpop.eup %6831  ;;  %v1343_v53 = vmul.f32 1.442695, %v1317_v49  ;;  %6245 = vmatprep.mubr.bf16.mxu1 %v1389_v57 }
 0x3b0   : > { %v1353_v54 = vmul.f32 1.442695, %v1322_v56  ;;  %1367 = vadd.xlane.f32.xlu1 %v6832_v43  ;;  %v1300_v21 = vpop.xlane.xlu0 %1299 }
 0x3b1   : > { %6841 = vpow2.f32 %v1343_v53  ;;  %v1319_v46 = vsub.f32 %v8345_v51, %v1300_v21  ;;  %v1728_v4 = vpop.permute.xlu1 %1727 }
 0x3b2   : > { %6843 = vpow2.f32 %v1349_v42 }
 0x3b3   : > { %v6834_v1 = vpop.eup %6833  ;;  %v1347_v27 = vmul.f32 1.442695, %v1319_v46  ;;  %6292 = vmatpush3.bf16.xpose.msra.mxu1 %v8133_v16  ;;  %6845 = vpow2.f32 %v1353_v54 }
 0x3b4   : > { %1369 = vadd.xlane.f32.xlu1 %v6834_v1  ;;  %v1304_v2 = vpop.xlane.xlu0 %1303  ;;  %v1390_v5 = vpack.c.bf16 %v6834_v1, %v6832_v43  ;;  %v6836_v29 = vpop.eup %6835 }
 0x3b5   : > { %6847 = vpow2.f32 %v1347_v27  ;;  %v1321_v34 = vsub.f32 %v8353_v60, %v1304_v2  ;;  %v1730_v50 = vpop.permute.xlu1 %1729 }
 0x3b6   : > { %6246 = vmatmul.mubr.bf16.gmra.mrb[36].mxu1 %v1390_v5 }
 0x3b7   : > { %v6838_v6 = vpop.eup %6837  ;;  %v1351_v13 = vmul.f32 1.442695, %v1321_v34 }
 0x3b8   : > { %1365 = vadd.xlane.f32.xlu1 %v6830_v36  ;;  %1371 = vadd.xlane.f32.xlu0 %v6838_v6  ;;  %v1726_v51 = vpop.permute.xlu0 %1725  ;;  %v1391_v58 = vpack.c.bf16 %v6836_v29, %v6838_v6  ;;  %v6840_v59 = vpop.eup %6839 }
 0x3b9   : > { %6849 = vpow2.f32 %v1351_v13  ;;  %v1732_v9 = vpop.permute.xlu1 %1731 }
 0x3ba   : > { %6249 = vmatprep.mubr.bf16.mxu1 %v1391_v58 }
 0x3bb   : > { %v6842_v16 = vpop.eup %6841 }
 0x3bc   : > { %1377 = vadd.xlane.f32.xlu0 %v6840_v59  ;;  %1375 = vadd.xlane.f32.xlu1 %v6842_v16  ;;  %v1734_v8 = vpop.permute.xlu0 %1733  ;;  %v1392_v38 = vpack.c.bf16 %v6840_v59, %v6842_v16  ;;  %v6844_v44 = vpop.eup %6843 }
 0x3bd   : > { %v6846_v60 = vpop.eup %6845  ;;  %v1736_v35 = vpop.permute.xlu1 %1735 }
 0x3be   : > { %6250 = vmatmul.mubr.bf16.gmra.mrb[40].mxu1 %v1392_v38 }
 0x3bf   : > { %v6848_v17 = vpop.eup %6847 }
 0x3c0   : > { %1385 = vadd.xlane.f32.xlu0 %v6846_v60  ;;  %1373 = vadd.xlane.f32.xlu1 %v6836_v29  ;;  %v1738_v19 = vpop.permute.xlu0 %1737  ;;  %v1393_v28 = vpack.c.bf16 %v6844_v44, %v6848_v17 }
 0x3c1   : > { %v1740_v31 = vpop.permute.xlu1 %1739 }
 0x3c2   : > { %6253 = vmatprep.mubr.bf16.mxu1 %v1393_v28 }
 0x3c3   : > { %v6850_v36 = vpop.eup %6849 }
 0x3c4   : > { %1381 = vadd.xlane.f32.xlu0 %v6844_v44  ;;  %1383 = vadd.xlane.f32.xlu1 %v6850_v36  ;;  %v2306_v48 = vpop.permute.xlu0 %2305  ;;  %v1394_v49 = vpack.c.bf16 %v6846_v60, %v6850_v36 }
 0x3c5   : > { %6625 = vmatprep.subr.msk.bf16.mxu1 %vm1113_vm0, %v2306_v48  ;;  %v2346_v57 = vsel %vm1113_vm0, %v2306_v48, 0  ;;  %v2308_v56 = vpop.permute.xlu1 %2307 }
 0x3c6   : > { %6254 = vmatmul.mubr.bf16.gmra.mrb[44].mxu1 %v1394_v49  ;;  %v2349_v43 = vsel %vm1113_vm0, %v2308_v56, 0 }
 0x3c7   : > { %6293 = vmatprep.mubr.msk.bf16.mxu1 %vm1113_vm0, %v1726_v51 }
 0x3c8   : > { %1379 = vadd.xlane.f32.xlu1 %v6848_v17  ;;  %v2310_v42 = vpop.permute.xlu0 %2309 }
 0x3c9   : > { %v2312_v53 = vpop.permute.xlu1 %2311  ;;  %v2352_v54 = vsel %vm1113_vm0, %v2310_v42, 0 }
 0x3cc   : > { %v2314_v1 = vpop.permute.xlu0 %2313 }
 0x3cd   : > { %v2316_v21 = vpop.permute.xlu1 %2315  ;;  %v2358_v27 = vsel %vm1113_vm0, %v2314_v1, 0 }
 0x3ce   : > { %6294 = vmatmul.mubr.msk.bf16.vlgmr.msra.gmra.mrb[48].mxu1 %vm1113_vm0, %v1728_v4  ;;  %v2355_v4 = vsel %vm1113_vm0, %v2312_v53, 0  ;;  %v2361_v2 = vsel %vm1113_vm0, %v2316_v21, 0 }
 0x3cf   : > { %6362 = vmatpush3.bf16.xpose.msra.mxu1 %v2346_v57  ;;  %6297 = vmatprep.mubr.msk.bf16.mxu1 %vm1113_vm0, %v1730_v50 }
 0x3d0   : > { %6626 = vmatprep.subr.msk.bf16.mxu1 %vm1113_vm0, %v2308_v56  ;;  %v2318_v5 = vpop.permute.xlu0 %2317 }
 0x3d1   : > { %v2290_v46 = vpop.permute.xlu1 %2289  ;;  %v2364_v34 = vsel %vm1113_vm0, %v2318_v5, 0 }
 0x3d4   : > { %v2320_v29 = vpop.permute.xlu0 %2319 }
 0x3d5   : > { %v2367_v6 = vsel %vm1113_vm0, %v2320_v29, 0  ;;  %v2294_v50 = vpop.permute.xlu1 %2293 }
 0x3d6   : > { %6298 = vmatmul.mubr.msk.bf16.gmra.mrb[52].mxu1 %vm1113_vm0, %v1732_v9 }
 0x3d7   : > { %6364 = vmatpush3.bf16.xpose.msra.mxu1 %v2349_v43  ;;  %6301 = vmatprep.mubr.msk.bf16.mxu1 %vm1113_vm0, %v1734_v8 }
 0x3d8   : > { %6627 = vmatprep.subr.msk.bf16.mxu1 %vm1113_vm0, %v2310_v42  ;;  %v2292_v13 = vpop.permute.xlu0 %2291 }
 0x3d9   : > { %v2298_v58 = vpop.permute.xlu1 %2297 }
 0x3da   : > { %2303 = vrot.lane.b32.xlu0 %v8125_v7, %s7488_s29  ;;  %s7490_s29 = smov 32  }
 0x3dc   : > { %v2296_v51 = vpop.permute.xlu0 %2295 }
 0x3dd   : > { %v2302_v16 = vpop.permute.xlu1 %2301 }
 0x3de   : > { %6302 = vmatmul.mubr.msk.bf16.gmra.mrb[56].mxu1 %vm1113_vm0, %v1736_v35 }
 0x3df   : > { %6366 = vmatpush3.bf16.xpose.msra.mxu1 %v2352_v54  ;;  %6305 = vmatprep.mubr.msk.bf16.mxu1 %vm1113_vm0, %v1738_v19 }
 0x3e0   : > { %6628 = vmatprep.subr.msk.bf16.mxu1 %vm1113_vm0, %v2312_v53  ;;  %v2300_v59 = vpop.permute.xlu0 %2299 }
 0x3e6   : > { %6306 = vmatmul.mubr.msk.bf16.gmra.mrb[60].mxu1 %vm1113_vm0, %v1740_v31 }
 0x3e7   : > { %6368 = vmatpush3.bf16.xpose.msra.mxu1 %v2355_v4  ;;  %6377 = vmatprep.mubr.msk.bf16.mxu1 %vm1113_vm0, %v2290_v46 }
 0x3e8   : > { %6629 = vmatprep.subr.msk.bf16.mxu1 %vm1113_vm0, %v2314_v1 }
 0x3ef   : > { %6370 = vmatpush3.bf16.xpose.msra.mxu1 %v2358_v27 }
 0x3f0   : > { %6630 = vmatprep.subr.msk.bf16.mxu1 %vm1113_vm0, %v2316_v21 }
 0x3f7   : > { %6372 = vmatpush3.bf16.xpose.msra.mxu1 %v2361_v2 }
 0x3f8   : > { %6631 = vmatprep.subr.msk.bf16.mxu1 %vm1113_vm0, %v2318_v5 }
 0x3ff   : > { %6374 = vmatpush3.bf16.xpose.msra.mxu1 %v2364_v34 }
 0x400   : > { %6632 = vmatprep.subr.msk.bf16.mxu1 %vm1113_vm0, %v2320_v29 }
 0x407   : > { %6376 = vmatpush3.bf16.xpose.msra.mxu1 %v2367_v6 }
 0x408   : > { %6633 = vmatprep.subr.msk.bf16.mxu1 %vm1113_vm0, %v2306_v48 }
 0x40e   : > { %6378 = vmatmul.mubr.msk.bf16.vlgmr.msra.gmra.mrb[64].mxu1 %vm1113_vm0, %v2292_v13  ;;  %v1360_v8 = vpop.xlane.xlu1 %1359 }
 0x40f   : > { %6381 = vmatprep.mubr.msk.bf16.mxu1 %vm1113_vm0, %v2294_v50  ;;  %6446 = vmatpush3.bf16.xpose.msra.mxu1 %v2346_v57  ;;  %6851 = vrcp.f32 %v1360_v8 }
 0x410   : > { %6634 = vmatprep.subr.msk.bf16.mxu1 %vm1113_vm0, %v2308_v56 }
 0x411   : > { %v1358_v44 = vpop.xlane.xlu0 %1357 }
 0x412   : > { %v1356_v38 = vpop.xlane.xlu1 %1355  ;;  %6853 = vrcp.f32 %v1358_v44 }
 0x416   : > { %6382 = vmatmul.mubr.msk.bf16.gmra.mrb[68].mxu1 %vm1113_vm0, %v2296_v51  ;;  %v1362_v60 = vpop.xlane.xlu1 %1361 }
 0x417   : > { %6385 = vmatprep.mubr.msk.bf16.mxu1 %vm1113_vm0, %v2298_v58  ;;  %6448 = vmatpush3.bf16.xpose.msra.mxu1 %v2349_v43  ;;  %6855 = vrcp.f32 %v1362_v60 }
 0x418   : > { %6635 = vmatprep.subr.msk.bf16.mxu1 %vm1113_vm0, %v2310_v42  ;;  %6857 = vrcp.f32 %v1356_v38 }
 0x419   : > { %v6852_v28 = vpop.eup %6851 }
 0x41c   : > { %v6854_v35 = vpop.eup %6853 }
 0x41e   : > { %6386 = vmatmul.mubr.msk.bf16.gmra.mrb[72].mxu1 %vm1113_vm0, %v2300_v59 }
 0x41f   : > { %6389 = vmatprep.mubr.msk.bf16.mxu1 %vm1113_vm0, %v2302_v16  ;;  %6450 = vmatpush3.bf16.xpose.msra.mxu1 %v2352_v54 }
 0x420   : > { %6636 = vmatprep.subr.msk.bf16.mxu1 %vm1113_vm0, %v2312_v53 }
 0x421   : > { %v6856_v31 = vpop.eup %6855 }
 0x422   : > { %v6858_v56 = vpop.eup %6857 }
 0x427   : > { %6452 = vmatpush3.bf16.xpose.msra.mxu1 %v2355_v4 }
 0x428   : > { %6637 = vmatprep.subr.msk.bf16.mxu1 %vm1113_vm0, %v2314_v1 }
 0x42f   : > { %6454 = vmatpush3.bf16.xpose.msra.mxu1 %v2358_v27 }
 0x430   : > { %6638 = vmatprep.subr.msk.bf16.mxu1 %vm1113_vm0, %v2316_v21 }
 0x437   : > { %6456 = vmatpush3.bf16.xpose.msra.mxu1 %v2361_v2 }
 0x438   : > { %6639 = vmatprep.subr.msk.bf16.mxu1 %vm1113_vm0, %v2318_v5 }
 0x439   : > { %v1364_v9 = vpop.xlane.xlu0 %1363 }
 0x43a   : > { %6859 = vrcp.f32 %v1364_v9 }
 0x43f   : > { %6458 = vmatpush3.bf16.xpose.msra.mxu1 %v2364_v34 }
 0x440   : > { %6640 = vmatprep.subr.msk.bf16.mxu1 %vm1113_vm0, %v2320_v29 }
 0x444   : > { %v6860_v2 = vpop.eup %6859 }
 0x445   : > { %v1372_v17 = vpop.xlane.xlu0 %1371 }
 0x447   : > { %6460 = vmatpush3.bf16.xpose.msra.mxu1 %v2367_v6 }
 0x449   : > { %v1378_v19 = vpop.xlane.xlu0 %1377 }
 0x44d   : > { %v6243_v36 = vpop.f32.mrb[32].mxu1  ;;  %v1386_v48 = vpop.xlane.xlu0 %1385 }
 0x44e   : > { %v1461_v49 = vpop.f32.mrb[33].mxu1  ;;  %v1542_v43 = vmul.f32 %v6852_v28, %v6243_v36 }
 0x44f   : > { %v6244_v57 = vpop.f32.mrb[34].mxu1  ;;  %v1540_v54 = vmul.f32 %v6858_v56, %v1461_v49 }
 0x450   : > { %v1543_v42 = vmul.f32 %v6856_v31, %v6244_v57  ;;  %v1464_v53 = vpop.f32.mrb[35].mxu1 }
 0x451   : > { %v1541_v21 = vmul.f32 %v6854_v35, %v1464_v53  ;;  %v1382_v4 = vpop.xlane.xlu0 %1381 }
 0x452   : > { %v1557_v46 = vpack.c.bf16 %v1543_v42, %v1542_v43 }
 0x453   : > { %v1556_v1 = vpack.c.bf16 %v1541_v21, %v1540_v54 }
 0x455   : > { %6261 = vmatprep.mubr.msk.bf16.mxu0 %vm1113_vm0, %v1556_v1  ;;  %v2304_v27 = vpop.permute.xlu0 %2303 }
 0x456   : > { %6262 = vmatmul.mubr.msk.bf16.vlgmr.msra.gmra.mrb[48].mxu0 %vm1113_vm0, %v1557_v46  ;;  %6390 = vmatmul.mubr.msk.bf16.gmra.mrb[76].mxu1 %vm1113_vm0, %v2304_v27 }
 0x457   : > { %6310 = vmatpush3.bf16.msra.mxu0 %v8150_v22  ;;  %v1368_v22 = vpop.xlane.xlu1 %1367 }
 0x458   : > { %6311 = vmatprep.subr.bf16.mxu0 %v8155_v11  ;;  %6861 = vrcp.f32 %v1368_v22 }
 0x45b   : > { %6312 = vmatpush3.bf16.msra.mxu0 %v8155_v11  ;;  %v1370_v11 = vpop.xlane.xlu1 %1369 }
 0x45c   : > { %6313 = vmatprep.subr.bf16.mxu0 %v8159_v23  ;;  %6863 = vrcp.f32 %v1370_v11 }
 0x45f   : > { %6314 = vmatpush3.bf16.msra.mxu0 %v8159_v23  ;;  %v1366_v23 = vpop.xlane.xlu1 %1365 }
 0x460   : > { %6315 = vmatprep.subr.bf16.mxu0 %v8163_v24  ;;  %6865 = vrcp.f32 %v1366_v23 }
 0x461   : > { %6867 = vrcp.f32 %v1372_v17 }
 0x462   : > { %v6862_v34 = vpop.eup %6861 }
 0x463   : > { %6316 = vmatpush3.bf16.msra.mxu0 %v8163_v24  ;;  %v1376_v24 = vpop.xlane.xlu1 %1375 }
 0x464   : > { %6317 = vmatprep.subr.bf16.mxu0 %v8167_v25  ;;  %6869 = vrcp.f32 %v1376_v24 }
 0x465   : > { %6871 = vrcp.f32 %v1378_v19 }
 0x466   : > { %v6864_v29 = vpop.eup %6863 }
 0x467   : > { %6318 = vmatpush3.bf16.msra.mxu0 %v8167_v25  ;;  %v1374_v25 = vpop.xlane.xlu1 %1373 }
 0x468   : > { %6319 = vmatprep.subr.bf16.mxu0 %v8171_v26  ;;  %6873 = vrcp.f32 %v1374_v25 }
 0x469   : > { %6875 = vrcp.f32 %v1386_v48 }
 0x46a   : > { %v6866_v13 = vpop.eup %6865 }
 0x46b   : > { %6320 = vmatpush3.bf16.msra.mxu0 %v8171_v26  ;;  %v1384_v26 = vpop.xlane.xlu1 %1383  ;;  %v6868_v44 = vpop.eup %6867 }
 0x46c   : > { %6321 = vmatprep.subr.bf16.mxu0 %v8390_v41  ;;  %6877 = vrcp.f32 %v1384_v26 }
 0x46d   : > { %6879 = vrcp.f32 %v1382_v4 }
 0x46e   : > { %v6870_v60 = vpop.eup %6869 }
 0x46f   : > { %6322 = vmatpush3.bf16.msra.mxu0 %v8390_v41  ;;  %v1380_v8 = vpop.xlane.xlu1 %1379  ;;  %v6872_v19 = vpop.eup %6871 }
 0x470   : > { %6323 = vmatprep.subr.bf16.mxu0 %v8392_v40  ;;  %6881 = vrcp.f32 %v1380_v8 }
 0x472   : > { %v6874_v36 = vpop.eup %6873 }
 0x473   : > { %6324 = vmatpush3.bf16.msra.mxu0 %v8392_v40  ;;  %v6876_v42 = vpop.eup %6875 }
 0x476   : > { %v6878_v54 = vpop.eup %6877 }
 0x477   : > { %v6880_v46 = vpop.eup %6879 }
 0x47a   : > { %v6882_v1 = vpop.eup %6881 }
 0x489   : > { %v6247_v5 = vpop.f32.mrb[36].mxu1 }
 0x48a   : > { %v1477_v41 = vpop.f32.mrb[37].mxu1  ;;  %v1546_v40 = vmul.f32 %v6862_v34, %v6247_v5 }
 0x48b   : > { %v6248_v6 = vpop.f32.mrb[38].mxu1  ;;  %v1544_v58 = vmul.f32 %v6860_v2, %v1477_v41 }
 0x48c   : > { %v1547_v50 = vmul.f32 %v6864_v29, %v6248_v6  ;;  %v1480_v51 = vpop.f32.mrb[39].mxu1 }
 0x48d   : > { %v1545_v59 = vmul.f32 %v6866_v13, %v1480_v51 }
 0x48e   : > { %v1559_v16 = vpack.c.bf16 %v1547_v50, %v1546_v40 }
 0x48f   : > { %v1558_v38 = vpack.c.bf16 %v1545_v59, %v1544_v58 }
 0x491   : > { %v6251_v9 = vpop.f32.mrb[40].mxu1  ;;  %6265 = vmatprep.mubr.msk.bf16.mxu0 %vm1113_vm0, %v1558_v38 }
 0x492   : > { %v1493_v17 = vpop.f32.mrb[41].mxu1  ;;  %6266 = vmatmul.mubr.msk.bf16.gmra.mrb[52].mxu0 %vm1113_vm0, %v1559_v16  ;;  %v1550_v35 = vmul.f32 %v6870_v60, %v6251_v9 }
 0x493   : > { %v6252_v28 = vpop.f32.mrb[42].mxu1  ;;  %v1548_v48 = vmul.f32 %v6868_v44, %v1493_v17 }
 0x494   : > { %v1551_v49 = vmul.f32 %v6872_v19, %v6252_v28  ;;  %v1496_v31 = vpop.f32.mrb[43].mxu1 }
 0x495   : > { %v1549_v57 = vmul.f32 %v6874_v36, %v1496_v31 }
 0x496   : > { %v1561_v56 = vpack.c.bf16 %v1551_v49, %v1550_v35 }
 0x497   : > { %v1560_v43 = vpack.c.bf16 %v1549_v57, %v1548_v48 }
 0x499   : > { %v6255_v53 = vpop.f32.mrb[44].mxu1  ;;  %6269 = vmatprep.mubr.msk.bf16.mxu0 %vm1113_vm0, %v1560_v43  ;;  %v10805_v43 = vld [vmem:[#allocation20_spill] sm:$0xff] }
 0x49a   : > { %v1509_v21 = vpop.f32.mrb[45].mxu1  ;;  %6270 = vmatmul.mubr.msk.bf16.gmra.mrb[56].mxu0 %vm1113_vm0, %v1561_v56  ;;  %v1554_v27 = vmul.f32 %v6878_v54, %v6255_v53 }
 0x49b   : > { %v6256_v4 = vpop.f32.mrb[46].mxu1  ;;  %v1552_v23 = vmul.f32 %v6882_v1, %v1509_v21 }
 0x49c   : > { %v1555_v22 = vmul.f32 %v6876_v42, %v6256_v4  ;;  %v1512_v11 = vpop.f32.mrb[47].mxu1  ;;  %v10808_v4 = vld [vmem:[#allocation17_spill] sm:$0xff] }
 0x49d   : > { %v1553_v24 = vmul.f32 %v6880_v46, %v1512_v11  ;;  %v8595_v11 = vld [vmem:[#allocation2 + $0x10] sm:$0xff]  }
 0x49e   : > { %v1563_v25 = vpack.c.bf16 %v1555_v22, %v1554_v27  ;;  %6341 = vmatprep.subr.bf16.mxu0 %v8595_v11 }
 0x49f   : > { %v1562_v2 = vpack.c.bf16 %v1553_v24, %v1552_v23  ;;  %v10811_v23 = vld [vmem:[#allocation8_spill] sm:$0xff]  ;;  %v10812_v24 = vld [vmem:[#allocation10_spill] sm:$0xff] }
 0x4a1   : > { %6273 = vmatprep.mubr.msk.bf16.mxu0 %vm1113_vm0, %v1562_v2  ;;  %v6295_v26 = vpop.f32.mrb[48].mxu1 }
 0x4a2   : > { %6274 = vmatmul.mubr.msk.bf16.gmra.mrb[60].mxu0 %vm1113_vm0, %v1563_v25  ;;  %v1799_v5 = vpop.f32.mrb[49].mxu1  ;;  %v8502_v34 = vsel %vm1099_vm1, -1e+09, %v6295_v26  ;;  %v10813_v25 = vld [vmem:[#allocation9_spill] sm:$0xff] }
 0x4a3   : > { %1882 = vmax.xlane.f32.xlu1 %v8502_v34  ;;  %v6296_v41 = vpop.f32.mrb[50].mxu1  ;;  %v8508_v6 = vsel %vm1097_vm2, -1e+09, %v1799_v5 }
 0x4a4   : > { %v1802_v29 = vpop.f32.mrb[51].mxu1  ;;  %v8514_v50 = vsel %vm1100_vm4, -1e+09, %v6296_v41 }
 0x4a5   : > { %v8526_v16 = vsel %vm1098_vm3, -1e+09, %v1802_v29  ;;  %v10814_v29 = vld [vmem:[#allocation11_spill] sm:$0xff] }
 0x4a7   : > { %1878 = vmax.xlane.f32.xlu1 %v8508_v6 }
 0x4a9   : > { %v6299_v13 = vpop.f32.mrb[52].mxu1 }
 0x4aa   : > { %v1815_v40 = vpop.f32.mrb[53].mxu1  ;;  %v8544_v19 = vsel %vm1103_vm7, -1e+09, %v6299_v13 }
 0x4ab   : > { %1884 = vmax.xlane.f32.xlu1 %v8514_v50  ;;  %v6300_v51 = vpop.f32.mrb[54].mxu1  ;;  %v8532_v44 = vsel %vm1101_vm5, -1e+09, %v1815_v40 }
 0x4ac   : > { %v1818_v58 = vpop.f32.mrb[55].mxu1  ;;  %v8550_v35 = vsel %vm1104_vm9, -1e+09, %v6300_v51 }
 0x4ad   : > { %v8520_v59 = vsel %vm1102_vm6, -1e+09, %v1818_v58 }
 0x4ae   : > { %1888 = vmax.xlane.f32.xlu0 %v8520_v59 }
 0x4af   : > { %1880 = vmax.xlane.f32.xlu1 %v8526_v16 }
 0x4b1   : > { %v6303_v8 = vpop.f32.mrb[56].mxu1 }
 0x4b2   : > { %v1831_v38 = vpop.f32.mrb[57].mxu1  ;;  %v8537_v9 = vsel %vm1107_vm13, -1e+09, %v6303_v8 }
 0x4b3   : > { %1886 = vmax.xlane.f32.xlu1 %v8532_v44  ;;  %1898 = vmax.xlane.f32.xlu0 %v8537_v9  ;;  %v6304_v60 = vpop.f32.mrb[58].mxu1  ;;  %v8562_v56 = vsel %vm1105_vm11, -1e+09, %v1831_v38 }
 0x4b4   : > { %v1834_v17 = vpop.f32.mrb[59].mxu1  ;;  %v8580_v46 = vsel %vm1108_vm10, -1e+09, %v6304_v60 }
 0x4b5   : > { %v8574_v54 = vsel %vm1106_vm8, -1e+09, %v1834_v17 }
 0x4b7   : > { %1890 = vmax.xlane.f32.xlu1 %v8544_v19 }
 0x4b9   : > { %v6307_v28 = vpop.f32.mrb[60].mxu1 }
 0x4ba   : > { %v1847_v36 = vpop.f32.mrb[61].mxu1  ;;  %v8568_v42 = vsel %vm10744_vm12, -1e+09, %v6307_v28  ;;  %vm10809_vm12 = vcmp.gt.s32.totalorder %v8180_v20, %v10808_v4 }
 0x4bb   : > { %1892 = vmax.xlane.f32.xlu1 %v8550_v35  ;;  %v6308_v49 = vpop.f32.mrb[62].mxu1  ;;  %v8556_v31 = vsel %vm1109_vm15, -1e+09, %v1847_v36 }
 0x4bc   : > { %1902 = vmax.xlane.f32.xlu0 %v8556_v31  ;;  %v1850_v48 = vpop.f32.mrb[63].mxu1  ;;  %v8592_v22 = vsel %vm1112_vm14, -1e+09, %v6308_v49 }
 0x4bd   : > { %v8586_v1 = vsel %vm10809_vm12, -1e+09, %v1850_v48 }
 0x4bf   : > { %1894 = vmax.xlane.f32.xlu1 %v8562_v56 }
 0x4c0   : > { %1906 = vmax.xlane.f32.xlu0 %v8568_v42 }
 0x4c3   : > { %1896 = vmax.xlane.f32.xlu1 %v8574_v54 }
 0x4c7   : > { %1900 = vmax.xlane.f32.xlu1 %v8580_v46 }
 0x4cb   : > { %1904 = vmax.xlane.f32.xlu1 %v8586_v1 }
 0x4cf   : > { %1908 = vmax.xlane.f32.xlu1 %v8592_v22 }
 0x4d6   : > { %2917 = vrot.lane.b32.xlu0 %v10811_v23, %s7490_s29 }
 0x4da   : > { %2921 = vrot.lane.b32.xlu0 %v10812_v24, %s7490_s29 }
 0x4de   : > { %2602 = vrot.lane.b32.xlu0 %v7880_v14, %s7490_s29 }
 0x4e0   : > { %2919 = vrot.lane.b32.xlu1 %v10813_v25, %s7490_s29 }
 0x4e1   : > { %v6379_v2 = vpop.f32.mrb[64].mxu1 }
 0x4e2   : > { %v2403_v26 = vpop.f32.mrb[65].mxu1  ;;  %2606 = vrot.lane.b32.xlu0 %v7956_v15, %s7490_s29  ;;  %v10815_v15 = vld [vmem:[#allocation12_spill] sm:$0xff] }
 0x4e3   : > { %v6380_v5 = vpop.f32.mrb[66].mxu1  ;;  %v8625_v38 = vsel %vm1097_vm2, -1e+09, %v2403_v26 }
 0x4e4   : > { %v2406_v41 = vpop.f32.mrb[67].mxu1  ;;  %2923 = vrot.lane.b32.xlu1 %v10814_v29, %s7490_s29  ;;  %v8649_v60 = vsel %vm1100_vm4, -1e+09, %v6380_v5 }
 0x4e6   : > { %2927 = vrot.lane.b32.xlu0 %v8059_v52, %s7490_s29 }
 0x4e8   : > { %2604 = vrot.lane.b32.xlu1 %v7919_v45, %s7490_s29 }
 0x4e9   : > { %v6383_v14 = vpop.f32.mrb[68].mxu1 }
 0x4ea   : > { %v2419_v13 = vpop.f32.mrb[69].mxu1  ;;  %2608 = vrot.lane.b32.xlu0 %v7993_v47, %s7490_s29  ;;  %v8631_v47 = vsel %vm1098_vm3, -1e+09, %v2406_v41  ;;  %v8661_v28 = vsel %vm1103_vm7, -1e+09, %v6383_v14 }
 0x4eb   : > { %v6384_v40 = vpop.f32.mrb[70].mxu1 }
 0x4ec   : > { %v2422_v51 = vpop.f32.mrb[71].mxu1  ;;  %2925 = vrot.lane.b32.xlu1 %v10815_v15, %s7490_s29  ;;  %v8667_v36 = vsel %vm1104_vm9, -1e+09, %v6384_v40 }
 0x4ed   : > { %v8673_v49 = vsel %vm1102_vm6, -1e+09, %v2422_v51 }
 0x4ee   : > { %2610 = vrot.lane.b32.xlu0 %v8030_v10, %s7490_s29  ;;  %v8637_v10 = vsel %vm1099_vm1, -1e+09, %v6379_v2 }
 0x4f0   : > { %2612 = vrot.lane.b32.xlu1 %v8067_v55, %s7490_s29  ;;  %v8642_v55 = vsel %vm1101_vm5, -1e+09, %v2419_v13 }
 0x4f1   : > { %v6387_v52 = vpop.f32.mrb[72].mxu1 }
 0x4f2   : > { %v2435_v58 = vpop.f32.mrb[73].mxu1  ;;  %v8679_v48 = vsel %vm1107_vm13, -1e+09, %v6387_v52 }
 0x4f3   : > { %v6388_v8 = vpop.f32.mrb[74].mxu1  ;;  %v8654_v17 = vsel %vm1105_vm11, -1e+09, %v2435_v58 }
 0x4f4   : > { %v2438_v45 = vpop.f32.mrb[75].mxu1  ;;  %v8687_v24 = vsel %vm1108_vm10, -1e+09, %v6388_v8 }
 0x4f5   : > { %v8701_v41 = vsel %vm1106_vm8, -1e+09, %v2438_v45 }
 0x50d   : > { %2482 = vmax.xlane.f32.xlu0 %v8625_v38 }
 0x511   : > { %2484 = vmax.xlane.f32.xlu0 %v8631_v47 }
 0x514   : > { %2486 = vmax.xlane.f32.xlu1 %v8637_v10 }
 0x515   : > { %2490 = vmax.xlane.f32.xlu0 %v8642_v55 }
 0x518   : > { %2488 = vmax.xlane.f32.xlu1 %v8649_v60 }
 0x519   : > { %2498 = vmax.xlane.f32.xlu0 %v8654_v17 }
 0x51c   : > { %2494 = vmax.xlane.f32.xlu1 %v8661_v28 }
 0x520   : > { %2496 = vmax.xlane.f32.xlu1 %v8667_v36 }
 0x524   : > { %2492 = vmax.xlane.f32.xlu1 %v8673_v49 }
 0x528   : > { %2502 = vmax.xlane.f32.xlu1 %v8679_v48 }
 0x529   : > { %v8682_v23 = vpop.f32.mrb[76].mxu1 }
 0x52a   : > { %v2451_v25 = vpop.f32.mrb[77].mxu1 }
 0x52b   : > { %v8692_v2 = vsel %vm1109_vm15, -1e+09, %v2451_v25  ;;  %v8694_v26 = vpop.f32.mrb[78].mxu1 }
 0x52c   : > { %2504 = vmax.xlane.f32.xlu1 %v8687_v24  ;;  %2506 = vmax.xlane.f32.xlu0 %v8692_v2  ;;  %v2454_v5 = vpop.f32.mrb[79].mxu1 }
 0x52d   : > { %v8708_v13 = vsel %vm10809_vm12, -1e+09, %v2454_v5  ;;  %vm10816_vm12 = vcmp.gt.s32.totalorder %v8180_v20, %v10805_v43 }
 0x530   : > { %v1883_v29 = vpop.xlane.xlu1 %1882  ;;  %2500 = vmax.xlane.f32.xlu1 %v8701_v41 }
 0x531   : > { %v1912_v14 = vsub.f32 %v8502_v34, %v1883_v29 }
 0x533   : > { %v1930_v40 = vmul.f32 1.442695, %v1912_v14 }
 0x534   : > { %v1879_v51 = vpop.xlane.xlu1 %1878  ;;  %2508 = vmax.xlane.f32.xlu1 %v8708_v13 }
 0x535   : > { %6883 = vpow2.f32 %v1930_v40  ;;  %v1910_v15 = vsub.f32 %v8508_v6, %v1879_v51 }
 0x537   : > { %v1926_v52 = vmul.f32 1.442695, %v1910_v15 }
 0x538   : > { %v1885_v58 = vpop.xlane.xlu1 %1884 }
 0x539   : > { %6885 = vpow2.f32 %v1926_v52  ;;  %v1913_v8 = vsub.f32 %v8514_v50, %v1885_v58 }
 0x53b   : > { %v1932_v45 = vmul.f32 1.442695, %v1913_v8  ;;  %v1889_v25 = vpop.xlane.xlu0 %1888 }
 0x53c   : > { %v1915_v34 = vsub.f32 %v8520_v59, %v1889_v25  ;;  %v1881_v29 = vpop.xlane.xlu1 %1880 }
 0x53d   : > { %6887 = vpow2.f32 %v1932_v45  ;;  %v1911_v5 = vsub.f32 %v8526_v16, %v1881_v29 }
 0x53e   : > { %v1936_v3 = vmul.f32 1.442695, %v1915_v34 }
 0x53f   : > { %v6884_v14 = vpop.eup %6883  ;;  %v1928_v4 = vmul.f32 1.442695, %v1911_v5  ;;  %v6750_v5 = vld [vmem:[#allocation2 + $0x18] sm:$0xff]  }
 0x540   : > { %v1887_v21 = vpop.xlane.xlu1 %1886  ;;  %1962 = vadd.xlane.f32.xlu0 %v6884_v14  ;;  %v1899_v40 = vpop.xlane.xlu0 %1898 }
 0x541   : > { %6889 = vpow2.f32 %v1928_v4  ;;  %v1914_v6 = vsub.f32 %v8532_v44, %v1887_v21  ;;  %v1920_v50 = vsub.f32 %v8537_v9, %v1899_v40 }
 0x542   : > { %6891 = vpow2.f32 %v1936_v3 }
 0x543   : > { %v6886_v51 = vpop.eup %6885  ;;  %v1934_v15 = vmul.f32 1.442695, %v1914_v6  ;;  %v1946_v8 = vmul.f32 1.442695, %v1920_v50 }
 0x544   : > { %v1891_v52 = vpop.xlane.xlu1 %1890  ;;  %1958 = vadd.xlane.f32.xlu0 %v6886_v51 }
 0x545   : > { %6893 = vpow2.f32 %v1934_v15  ;;  %v1916_v59 = vsub.f32 %v8544_v19, %v1891_v52 }
 0x547   : > { %v6888_v16 = vpop.eup %6887  ;;  %v1938_v58 = vmul.f32 1.442695, %v1916_v59 }
 0x548   : > { %v1893_v45 = vpop.xlane.xlu1 %1892  ;;  %1964 = vadd.xlane.f32.xlu1 %v6888_v16  ;;  %v1991_v19 = vpack.c.bf16 %v6888_v16, %v6884_v14 }
 0x549   : > { %6895 = vpow2.f32 %v1938_v58  ;;  %v1917_v4 = vsub.f32 %v8550_v35, %v1893_v45  ;;  %v1903_v44 = vpop.xlane.xlu0 %1902 }
 0x54a   : > { %6897 = vpow2.f32 %v1946_v8  ;;  %v1922_v16 = vsub.f32 %v8556_v31, %v1903_v44 }
 0x54b   : > { %v6890_v21 = vpop.eup %6889  ;;  %v1940_v25 = vmul.f32 1.442695, %v1917_v4 }
 0x54c   : > { %v1895_v3 = vpop.xlane.xlu1 %1894  ;;  %1960 = vadd.xlane.f32.xlu1 %v6890_v21  ;;  %v1990_v9 = vpack.c.bf16 %v6890_v21, %v6886_v51  ;;  %v6892_v6 = vpop.eup %6891  ;;  %v1950_v21 = vmul.f32 1.442695, %v1922_v16 }
 0x54d   : > { %6899 = vpow2.f32 %v1940_v25  ;;  %v1918_v34 = vsub.f32 %v8562_v56, %v1895_v3  ;;  %v1907_v29 = vpop.xlane.xlu0 %1906 }
 0x54e   : > { %6325 = vmatprep.mubr.bf16.mxu0 %v1990_v9  ;;  %v1924_v35 = vsub.f32 %v8568_v42, %v1907_v29 }
 0x54f   : > { %v6894_v40 = vpop.eup %6893  ;;  %v1942_v15 = vmul.f32 1.442695, %v1918_v34  ;;  %6326 = vmatmul.mubr.bf16.vlgmr.msra.gmra.mrb[64].mxu0 %v1991_v19 }
 0x550   : > { %v1897_v50 = vpop.xlane.xlu1 %1896  ;;  %1966 = vadd.xlane.f32.xlu1 %v6894_v40  ;;  %v1992_v52 = vpack.c.bf16 %v6892_v6, %v6894_v40  ;;  %6342 = vmatpush3.bf16.msra.mxu0 %v8595_v11  ;;  %v1954_v58 = vmul.f32 1.442695, %v1924_v35 }
 0x551   : > { %6901 = vpow2.f32 %v1942_v15  ;;  %v1919_v51 = vsub.f32 %v8574_v54, %v1897_v50  ;;  %v2918_v59 = vpop.permute.xlu0 %2917  ;;  %6343 = vmatprep.subr.bf16.mxu0 %v6750_v5 }
 0x552   : > { %6329 = vmatprep.mubr.bf16.mxu0 %v1992_v52  ;;  %6461 = vmatprep.mubr.msk.bf16.mxu1 %vm1113_vm0, %v2918_v59 }
 0x553   : > { %v6896_v56 = vpop.eup %6895  ;;  %v1944_v14 = vmul.f32 1.442695, %v1919_v51  ;;  %v8737_v51 = vsel %vm10816_vm12, -1e+09, %v8682_v23  ;;  %v10817_v23 = vld [vmem:[#allocation13_spill] sm:$0xff] }
 0x554   : > { %v1901_v8 = vpop.xlane.xlu1 %1900  ;;  %1970 = vadd.xlane.f32.xlu0 %v6896_v56  ;;  %6344 = vmatpush3.bf16.msra.mxu0 %v6750_v5  ;;  %v6898_v45 = vpop.eup %6897 }
 0x555   : > { %6903 = vpow2.f32 %v1944_v14  ;;  %v1921_v42 = vsub.f32 %v8580_v46, %v1901_v8  ;;  %v2922_v11 = vpop.permute.xlu0 %2921 }
 0x556   : > { %6905 = vpow2.f32 %v1954_v58 }
 0x557   : > { %v6900_v4 = vpop.eup %6899  ;;  %v1948_v54 = vmul.f32 1.442695, %v1921_v42 }
 0x558   : > { %v1905_v25 = vpop.xlane.xlu1 %1904  ;;  %1972 = vadd.xlane.f32.xlu1 %v6900_v4  ;;  %1978 = vadd.xlane.f32.xlu0 %v6898_v45  ;;  %v1993_v3 = vpack.c.bf16 %v6900_v4, %v6896_v56  ;;  %v8761_v4 = vsel %vm1112_vm14, -1e+09, %v8694_v26 }
 0x559   : > { %6907 = vpow2.f32 %v1948_v54  ;;  %v1923_v31 = vsub.f32 %v8586_v1, %v1905_v25  ;;  %v8727_v44 = vpop.permute.xlu0 %2602 }
 0x55a   : > { %6330 = vmatmul.mubr.bf16.gmra.mrb[68].mxu0 %v1993_v3  ;;  %6393 = vmatprep.subr.bf16.mxu0 %v8727_v44  ;;  %6909 = vpow2.f32 %v1950_v21 }
 0x55b   : > { %v6902_v9 = vpop.eup %6901  ;;  %v1952_v46 = vmul.f32 1.442695, %v1923_v31 }
 0x55c   : > { %v1909_v34 = vpop.xlane.xlu1 %1908  ;;  %1968 = vadd.xlane.f32.xlu1 %v6892_v6  ;;  %1974 = vadd.xlane.f32.xlu0 %v6902_v9 }
 0x55d   : > { %6911 = vpow2.f32 %v1952_v46  ;;  %v1925_v29 = vsub.f32 %v8592_v22, %v1909_v34  ;;  %v8743_v14 = vpop.permute.xlu0 %2606 }
 0x55f   : > { %v6904_v19 = vpop.eup %6903  ;;  %v1956_v5 = vmul.f32 1.442695, %v1925_v29 }
 0x560   : > { %v2920_v40 = vpop.permute.xlu1 %2919  ;;  %1976 = vadd.xlane.f32.xlu0 %v6904_v19  ;;  %v1994_v15 = vpack.c.bf16 %v6904_v19, %v6902_v9  ;;  %v6906_v1 = vpop.eup %6905 }
 0x561   : > { %6913 = vpow2.f32 %v1956_v5  ;;  %6462 = vmatmul.mubr.msk.bf16.vlgmr.msra.gmra.mrb[80].mxu1 %vm1113_vm0, %v2920_v40  ;;  %v2928_v42 = vpop.permute.xlu0 %2927 }
 0x562   : > { %6333 = vmatprep.mubr.bf16.mxu0 %v1994_v15  ;;  %6465 = vmatprep.mubr.msk.bf16.mxu1 %vm1113_vm0, %v2922_v11 }
 0x563   : > { %v6908_v35 = vpop.eup %6907 }
 0x564   : > { %v2924_v50 = vpop.permute.xlu1 %2923  ;;  %1980 = vadd.xlane.f32.xlu1 %v6908_v35  ;;  %1986 = vadd.xlane.f32.xlu0 %v6906_v1  ;;  %v1995_v6 = vpack.c.bf16 %v6908_v35, %v6898_v45  ;;  %v6910_v52 = vpop.eup %6909 }
 0x565   : > { %v8753_v11 = vpop.permute.xlu0 %2608 }
 0x566   : > { %6334 = vmatmul.mubr.bf16.gmra.mrb[72].mxu0 %v1995_v6 }
 0x567   : > { %v6912_v22 = vpop.eup %6911 }
 0x568   : > { %v8739_v59 = vpop.permute.xlu1 %2604  ;;  %2510 = vmax.xlane.f32.xlu1 %v8737_v51  ;;  %v1996_v56 = vpack.c.bf16 %v6912_v22, %v6910_v52 }
 0x569   : > { %6466 = vmatmul.mubr.msk.bf16.gmra.mrb[84].mxu1 %vm1113_vm0, %v2924_v50  ;;  %v8755_v45 = vpop.permute.xlu0 %2610 }
 0x56a   : > { %6337 = vmatprep.mubr.bf16.mxu0 %v1996_v56 }
 0x56b   : > { %v6914_v16 = vpop.eup %6913 }
 0x56c   : > { %v2926_v58 = vpop.permute.xlu1 %2925  ;;  %v1997_v8 = vpack.c.bf16 %v6914_v16, %v6906_v1 }
 0x56d   : > { %6469 = vmatprep.mubr.msk.bf16.mxu1 %vm1113_vm0, %v2926_v58 }
 0x56e   : > { %6338 = vmatmul.mubr.bf16.gmra.mrb[76].mxu0 %v1997_v8 }
 0x570   : > { %v8765_v25 = vpop.permute.xlu1 %2612 }
 0x571   : > { %6470 = vmatmul.mubr.msk.bf16.gmra.mrb[88].mxu1 %vm1113_vm0, %v2928_v42 }
 0x579   : > { %2929 = vrot.lane.b32.xlu1 %v10817_v23, %s7490_s29 }
 0x57a   : > { %2614 = vrot.lane.b32.xlu0 %v8104_v39, %s7490_s29 }
 0x57d   : > { %2931 = vrot.lane.b32.xlu1 %v8125_v7, %s7490_s29 }
 0x599   : > { %2512 = vmax.xlane.f32.xlu0 %v8761_v4 }
 0x59a   : > { %v2483_v54 = vpop.xlane.xlu0 %2482 }
 0x59b   : > { %v2514_v21 = vsub.f32 %v8625_v38, %v2483_v54 }
 0x59d   : > { %v2530_v39 = vmul.f32 1.442695, %v2514_v21 }
 0x59e   : > { %v2485_v3 = vpop.xlane.xlu0 %2484 }
 0x59f   : > { %v2515_v7 = vsub.f32 %v8631_v47, %v2485_v3  ;;  %6915 = vpow2.f32 %v2530_v39 }
 0x5a1   : > { %v2532_v31 = vmul.f32 1.442695, %v2515_v7  ;;  %v2487_v9 = vpop.xlane.xlu1 %2486  ;;  %1982 = vadd.xlane.f32.xlu1 %v6910_v52 }
 0x5a2   : > { %v2516_v46 = vsub.f32 %v8637_v10, %v2487_v9  ;;  %v2491_v5 = vpop.xlane.xlu0 %2490 }
 0x5a3   : > { %6917 = vpow2.f32 %v2532_v31  ;;  %v2518_v10 = vsub.f32 %v8642_v55, %v2491_v5 }
 0x5a4   : > { %v2534_v26 = vmul.f32 1.442695, %v2516_v46 }
 0x5a5   : > { %v2489_v34 = vpop.xlane.xlu1 %2488  ;;  %1988 = vadd.xlane.f32.xlu1 %v6914_v16 }
 0x5a6   : > { %6919 = vpow2.f32 %v2534_v26  ;;  %v2517_v29 = vsub.f32 %v8649_v60, %v2489_v34  ;;  %v2499_v8 = vpop.xlane.xlu0 %2498 }
 0x5a7   : > { %v2522_v23 = vsub.f32 %v8654_v17, %v2499_v8 }
 0x5a8   : > { %v2536_v38 = vmul.f32 1.442695, %v2517_v29 }
 0x5a9   : > { %v2495_v19 = vpop.xlane.xlu1 %2494  ;;  %1984 = vadd.xlane.f32.xlu1 %v6912_v22  ;;  %v8771_v40 = vpop.eup %6915  ;;  %v2538_v22 = vmul.f32 1.442695, %v2518_v10  ;;  %v2546_v9 = vmul.f32 1.442695, %v2522_v23 }
 0x5aa   : > { %6921 = vpow2.f32 %v2536_v38  ;;  %v2520_v47 = vsub.f32 %v8661_v28, %v2495_v19 }
 0x5ac   : > { %v2542_v1 = vmul.f32 1.442695, %v2520_v47 }
 0x5ad   : > { %v8773_v15 = vpop.eup %6917  ;;  %v2497_v35 = vpop.xlane.xlu1 %2496 }
 0x5ae   : > { %v2521_v50 = vsub.f32 %v8667_v36, %v2497_v35  ;;  %6923 = vpow2.f32 %v2542_v1 }
 0x5b0   : > { %v8779_v6 = vpop.eup %6919  ;;  %v2544_v52 = vmul.f32 1.442695, %v2521_v50 }
 0x5b1   : > { %v2493_v56 = vpop.xlane.xlu1 %2492  ;;  %2566 = vadd.xlane.f32.xlu0 %v8779_v6 }
 0x5b2   : > { %6925 = vpow2.f32 %v2544_v52  ;;  %v2519_v28 = vsub.f32 %v8673_v49, %v2493_v56 }
 0x5b3   : > { %6927 = vpow2.f32 %v2538_v22 }
 0x5b4   : > { %v8783_v16 = vpop.eup %6921  ;;  %v2540_v55 = vmul.f32 1.442695, %v2519_v28 }
 0x5b5   : > { %v2503_v58 = vpop.xlane.xlu1 %2502  ;;  %2568 = vadd.xlane.f32.xlu0 %v8783_v16 }
 0x5b6   : > { %6929 = vpow2.f32 %v2540_v55  ;;  %v2524_v42 = vsub.f32 %v8679_v48, %v2503_v58 }
 0x5b8   : > { %v2550_v54 = vmul.f32 1.442695, %v2524_v42  ;;  %v8794_v3 = vpop.eup %6923 }
 0x5b9   : > { %v2505_v21 = vpop.xlane.xlu1 %2504  ;;  %2564 = vadd.xlane.f32.xlu0 %v8773_v15  ;;  %v2507_v39 = vpop.xlane.xlu0 %2506 }
 0x5ba   : > { %v2525_v49 = vsub.f32 %v8687_v24, %v2505_v21  ;;  %2616 = vrot.lane.b32.xlu1 %v8127_v12, %s7490_s29  ;;  %6931 = vpow2.f32 %v2550_v54  ;;  %v2526_v48 = vsub.f32 %v8692_v2, %v2507_v39  ;;  %s10660_s29 = scalar_lea.hbm %s10719_s9, %s5896_s23 }
 0x5bc   : > { %v8796_v7 = vpop.eup %6925  ;;  %v2552_v31 = vmul.f32 1.442695, %v2525_v49  ;;  %v2554_v29 = vmul.f32 1.442695, %v2526_v48 }
 0x5bd   : > { %v2501_v17 = vpop.xlane.xlu1 %2500  ;;  %2574 = vadd.xlane.f32.xlu0 %v8794_v3  ;;  %v8803_v26 = vpop.eup %6927 }
 0x5be   : > { %6933 = vpow2.f32 %v2552_v31  ;;  %v2523_v24 = vsub.f32 %v8701_v41, %v2501_v17 }
 0x5bf   : > { %6935 = vpow2.f32 %v2546_v9  ;;  %v10818_v9 = vmov 0  }
 0x5c0   : > { %v8805_v12 = vpop.eup %6929  ;;  %v2548_v34 = vmul.f32 1.442695, %v2523_v24 }
 0x5c1   : > { %v2509_v38 = vpop.xlane.xlu1 %2508  ;;  %2570 = vadd.xlane.f32.xlu0 %v8803_v26  ;;  %v10822_v53 = vpack.c.bf16 %v8805_v12, %v8803_v26 }
 0x5c2   : > { %6937 = vpow2.f32 %v2548_v34  ;;  %v2527_v19 = vsub.f32 %v8708_v13, %v2509_v38 }
 0x5c3   : > { %6939 = vpow2.f32 %v2554_v29 }
 0x5c4   : > { %v2556_v5 = vmul.f32 1.442695, %v2527_v19  ;;  %v8812_v41 = vpop.eup %6931 }
 0x5c5   : > { %2576 = vadd.xlane.f32.xlu0 %v8796_v7 }
 0x5c6   : > { %6941 = vpow2.f32 %v2556_v5 }
 0x5c8   : > { %v8814_v47 = vpop.eup %6933 }
 0x5c9   : > { %2572 = vadd.xlane.f32.xlu0 %v8805_v12  ;;  %v8819_v1 = vpop.eup %6935 }
 0x5cc   : > { %v8821_v35 = vpop.eup %6937 }
 0x5cd   : > { %2582 = vadd.xlane.f32.xlu0 %v8812_v41  ;;  %v8826_v50 = vpop.eup %6939  ;;  %v1963_v39 = vpop.xlane.xlu0 %1962 }
 0x5d0   : > { %v8828_v52 = vpop.eup %6941 }
 0x5d1   : > { %2578 = vadd.xlane.f32.xlu0 %v8819_v1  ;;  %v1959_v48 = vpop.xlane.xlu0 %1958 }
 0x5d5   : > { %v1965_v56 = vpop.xlane.xlu1 %1964 }
 0x5d9   : > { %v1961_v28 = vpop.xlane.xlu1 %1960 }
 0x5dd   : > { %v1967_v55 = vpop.xlane.xlu1 %1966 }
 0x5de   : > { %2562 = vadd.xlane.f32.xlu1 %v8771_v40 }
 0x5e1   : > { %v1971_v24 = vpop.xlane.xlu0 %1970 }
 0x5e2   : > { %2584 = vadd.xlane.f32.xlu1 %v8814_v47 }
 0x5e5   : > { %v1973_v58 = vpop.xlane.xlu1 %1972 }
 0x5e6   : > { %2580 = vadd.xlane.f32.xlu1 %v8821_v35 }
 0x5e9   : > { %v1969_v8 = vpop.xlane.xlu1 %1968 }
 0x5f1   : > { %v8836_v42 = vpop.xlane.xlu1 %1980 }
 0x5f5   : > { %v2511_v23 = vpop.xlane.xlu1 %2510 }
 0x5f6   : > { %v2528_v54 = vsub.f32 %v8737_v51, %v2511_v23  ;;  %v1979_v51 = vpop.xlane.xlu0 %1978 }
 0x5f8   : > { %v2558_v21 = vmul.f32 1.442695, %v2528_v54 }
 0x5f9   : > { %v2930_v49 = vpop.permute.xlu1 %2929 }
 0x5fa   : > { %6943 = vpow2.f32 %v2558_v21  ;;  %6473 = vmatprep.mubr.msk.bf16.mxu1 %vm1113_vm0, %v2930_v49  ;;  %v1975_v34 = vpop.xlane.xlu0 %1974 }
 0x5fb   : > { %6945 = vrcp.f32 %v1963_v39 }
 0x5fc   : > { %6947 = vrcp.f32 %v1959_v48 }
 0x5fd   : > { %v2932_v31 = vpop.permute.xlu1 %2931  ;;  %6949 = vrcp.f32 %v1965_v56 }
 0x5fe   : > { %6474 = vmatmul.mubr.msk.bf16.gmra.mrb[92].mxu1 %vm1113_vm0, %v2932_v31  ;;  %v1977_v29 = vpop.xlane.xlu0 %1976  ;;  %6951 = vrcp.f32 %v1961_v28 }
 0x5ff   : > { %4059 = vmatprep.mubr.bf16.mxu1 %v10818_v9  ;;  %6953 = vrcp.f32 %v1967_v55 }
 0x600   : > { %6955 = vrcp.f32 %v1971_v24 }
 0x601   : > { %6957 = vrcp.f32 %v1973_v58 }
 0x602   : > { %v1987_v38 = vpop.xlane.xlu0 %1986  ;;  %6959 = vrcp.f32 %v1969_v8 }
 0x604   : > { %v8842_v17 = vpop.eup %6943 }
 0x605   : > { %2590 = vadd.xlane.f32.xlu0 %v8842_v17  ;;  %v6946_v19 = vpop.eup %6945 }
 0x606   : > { %v8846_v5 = vpop.permute.xlu0 %2614  ;;  %v6948_v54 = vpop.eup %6947 }
 0x607   : > { %v6950_v49 = vpop.eup %6949 }
 0x608   : > { %v6952_v22 = vpop.eup %6951 }
 0x609   : > { %2586 = vadd.xlane.f32.xlu0 %v8826_v50  ;;  %v6954_v55 = vpop.eup %6953 }
 0x60a   : > { %v6956_v8 = vpop.eup %6955 }
 0x622   : > { %v6327_v23 = vpop.f32.mrb[64].mxu0 }
 0x623   : > { %v2032_v21 = vpop.f32.mrb[65].mxu0  ;;  %v2113_v10 = vmul.f32 %v6946_v19, %v6327_v23 }
 0x624   : > { %v6328_v31 = vpop.f32.mrb[66].mxu0  ;;  %v2111_v39 = vmul.f32 %v6948_v54, %v2032_v21 }
 0x625   : > { %v2114_v13 = vmul.f32 %v6950_v49, %v6328_v31  ;;  %v2035_v46 = vpop.f32.mrb[67].mxu0 }
 0x626   : > { %v2112_v56 = vmul.f32 %v6952_v22, %v2035_v46  ;;  %v2513_v28 = vpop.xlane.xlu0 %2512  ;;  %v6958_v22 = vpop.eup %6957 }
 0x627   : > { %v2128_v48 = vpack.c.bf16 %v2114_v13, %v2113_v10  ;;  %v2529_v2 = vsub.f32 %v8761_v4, %v2513_v28  ;;  %v6960_v13 = vpop.eup %6959 }
 0x628   : > { %v2127_v36 = vpack.c.bf16 %v2112_v56, %v2111_v39 }
 0x629   : > { %v2560_v60 = vmul.f32 1.442695, %v2529_v2 }
 0x62a   : > { %6345 = vmatprep.mubr.msk.bf16.mxu0 %vm1113_vm0, %v2127_v36 }
 0x62b   : > { %6961 = vpow2.f32 %v2560_v60  ;;  %6346 = vmatmul.mubr.msk.bf16.vlgmr.msra.gmra.mrb[48].mxu0 %vm1113_vm0, %v2128_v48 }
 0x62c   : > { %6394 = vmatpush3.bf16.msra.mxu0 %v8727_v44  ;;  %6963 = vrcp.f32 %v1979_v51 }
 0x62d   : > { %6395 = vmatprep.subr.bf16.mxu0 %v8739_v59  ;;  %v6331_v58 = vpop.f32.mrb[68].mxu0  ;;  %6965 = vrcp.f32 %v1975_v34 }
 0x62e   : > { %v2048_v24 = vpop.f32.mrb[69].mxu0  ;;  %v1983_v46 = vpop.xlane.xlu1 %1982  ;;  %v2117_v2 = vmul.f32 %v6956_v8, %v6331_v58  ;;  %6967 = vrcp.f32 %v8836_v42 }
 0x62f   : > { %v2115_v10 = vmul.f32 %v6954_v55, %v2048_v24  ;;  %v6332_v4 = vpop.f32.mrb[70].mxu0  ;;  %6969 = vrcp.f32 %v1977_v29 }
 0x630   : > { %v2118_v36 = vmul.f32 %v6958_v22, %v6332_v4  ;;  %6396 = vmatpush3.bf16.msra.mxu0 %v8739_v59  ;;  %v2051_v60 = vpop.f32.mrb[71].mxu0  ;;  %6971 = vrcp.f32 %v1987_v38 }
 0x631   : > { %v2116_v19 = vmul.f32 %v6960_v13, %v2051_v60  ;;  %6397 = vmatprep.subr.bf16.mxu0 %v8743_v14  ;;  %6973 = vrcp.f32 %v1983_v46 }
 0x632   : > { %v2130_v23 = vpack.c.bf16 %v2118_v36, %v2117_v2  ;;  %v1989_v54 = vpop.xlane.xlu1 %1988 }
 0x633   : > { %v2129_v21 = vpack.c.bf16 %v2116_v19, %v2115_v10  ;;  %6975 = vrcp.f32 %v1989_v54 }
 0x634   : > { %6398 = vmatpush3.bf16.msra.mxu0 %v8743_v14  ;;  %v6463_v51 = vpop.f32.mrb[80].mxu1 }
 0x635   : > { %v8857_v49 = vpop.eup %6961  ;;  %6399 = vmatprep.subr.bf16.mxu0 %v8753_v11  ;;  %6349 = vmatprep.mubr.msk.bf16.mxu0 %vm1113_vm0, %v2129_v21  ;;  %v2991_v34 = vpop.f32.mrb[81].mxu1  ;;  %v8874_v55 = vsel %vm1099_vm1, -1e+09, %v6463_v51 }
 0x636   : > { %v8864_v42 = vsel %vm1097_vm2, -1e+09, %v2991_v34  ;;  %6350 = vmatmul.mubr.msk.bf16.gmra.mrb[52].mxu0 %vm1113_vm0, %v2130_v23  ;;  %v6464_v29 = vpop.f32.mrb[82].mxu1  ;;  %2592 = vadd.xlane.f32.xlu1 %v8857_v49  ;;  %v1985_v31 = vpop.xlane.xlu1 %1984  ;;  %v2601_v26 = vpack.c.bf16 %v8857_v49, %v8842_v17  ;;  %vm10830_vm2 = vmmov %vm10816_vm12 }
 0x637   : > { %v2994_v39 = vpop.f32.mrb[83].mxu1  ;;  %3070 = vmax.xlane.f32.xlu0 %v8864_v42  ;;  %v6964_v56 = vpop.eup %6963  ;;  %6977 = vrcp.f32 %v1985_v31  ;;  %v8896_v51 = vsel %vm1100_vm4, -1e+09, %v6464_v29 }
 0x638   : > { %6400 = vmatpush3.bf16.msra.mxu0 %v8753_v11  ;;  %v6966_v48 = vpop.eup %6965  ;;  %v8882_v32 = vsel %vm1098_vm3, -1e+09, %v2994_v39 }
 0x639   : > { %6401 = vmatprep.subr.bf16.mxu0 %v8755_v45  ;;  %v6335_v28 = vpop.f32.mrb[72].mxu0  ;;  %v6968_v58 = vpop.eup %6967 }
 0x63a   : > { %v2064_v38 = vpop.f32.mrb[73].mxu0  ;;  %2588 = vadd.xlane.f32.xlu1 %v8828_v52  ;;  %v6970_v24 = vpop.eup %6969  ;;  %v2121_v46 = vmul.f32 %v6964_v56, %v6335_v28 }
 0x63b   : > { %v6336_v8 = vpop.f32.mrb[74].mxu0  ;;  %3074 = vmax.xlane.f32.xlu0 %v8874_v55  ;;  %v2119_v13 = vmul.f32 %v6966_v48, %v2064_v38  ;;  %v6972_v33 = vpop.eup %6971 }
 0x63c   : > { %v2122_v22 = vmul.f32 %v6968_v58, %v6336_v8  ;;  %6402 = vmatpush3.bf16.msra.mxu0 %v8755_v45  ;;  %v2067_v10 = vpop.f32.mrb[75].mxu0  ;;  %v6467_v4 = vpop.f32.mrb[84].mxu1 }
 0x63d   : > { %v2120_v2 = vmul.f32 %v6970_v24, %v2067_v10  ;;  %6403 = vmatprep.subr.bf16.mxu0 %v8765_v25  ;;  %v3007_v36 = vpop.f32.mrb[85].mxu1  ;;  %v6974_v34 = vpop.eup %6973  ;;  %v8903_v31 = vsel %vm1103_vm7, -1e+09, %v6467_v4  ;;  %v6751_v10 = vld [vmem:[#allocation2 + $0x20] sm:$0xff]  }
 0x63e   : > { %v2132_v60 = vpack.c.bf16 %v2122_v22, %v2121_v46  ;;  %v8888_v19 = vsel %vm1101_vm5, -1e+09, %v3007_v36  ;;  %v6468_v23 = vpop.f32.mrb[86].mxu1  ;;  %3072 = vmax.xlane.f32.xlu1 %v8882_v32  ;;  %v6976_v56 = vpop.eup %6975 }
 0x63f   : > { %v2131_v54 = vpack.c.bf16 %v2120_v2, %v2119_v13  ;;  %v3010_v21 = vpop.f32.mrb[87].mxu1  ;;  %3078 = vmax.xlane.f32.xlu0 %v8888_v19  ;;  %v8907_v37 = vpop.permute.xlu1 %2616  ;;  %v8928_v62 = vsel %vm1104_vm9, -1e+09, %v6468_v23 }
 0x640   : > { %6404 = vmatpush3.bf16.msra.mxu0 %v8765_v25  ;;  %v8914_v8 = vsel %vm1102_vm6, -1e+09, %v3010_v21  ;;  %v8975_v12 = vpop.xlane.xlu0 %2566 }
 0x641   : > { %6405 = vmatprep.subr.bf16.mxu0 %v8846_v5  ;;  %v6339_v61 = vpop.f32.mrb[76].mxu0  ;;  %6353 = vmatprep.mubr.msk.bf16.mxu0 %vm1113_vm0, %v2131_v54  ;;  %v6978_v28 = vpop.eup %6977  ;;  %v10819_v54 = vpack.c.bf16 %v8773_v15, %v8771_v40  ;;  %v10823_v40 = vpack.c.bf16 %v8796_v7, %v8794_v3  ;;  %v10824_v15 = vpack.c.bf16 %v8821_v35, %v8819_v1 }
 0x642   : > { %v2080_v39 = vpop.f32.mrb[77].mxu0  ;;  %6354 = vmatmul.mubr.msk.bf16.gmra.mrb[56].mxu0 %vm1113_vm0, %v2132_v60  ;;  %3076 = vmax.xlane.f32.xlu1 %v8896_v51  ;;  %v2125_v48 = vmul.f32 %v6972_v33, %v6339_v61  ;;  %v10821_v33 = vpack.c.bf16 %v8783_v16, %v8779_v6  ;;  %v10825_v6 = vpack.c.bf16 %v8814_v47, %v8812_v41 }
 0x643   : > { %v6340_v29 = vpop.f32.mrb[78].mxu0  ;;  %3082 = vmax.xlane.f32.xlu0 %v8903_v31  ;;  %v2123_v24 = vmul.f32 %v6974_v34, %v2080_v39  ;;  %v10826_v16 = vpack.c.bf16 %v8828_v52, %v8826_v50 }
 0x644   : > { %v2126_v38 = vmul.f32 %v6976_v56, %v6340_v29  ;;  %6406 = vmatpush3.bf16.msra.mxu0 %v8846_v5  ;;  %v2083_v58 = vpop.f32.mrb[79].mxu0  ;;  %v6471_v63 = vpop.f32.mrb[88].mxu1 }
 0x645   : > { %v2124_v46 = vmul.f32 %v6978_v28, %v2083_v58  ;;  %6407 = vmatprep.subr.bf16.mxu0 %v8907_v37  ;;  %v3023_v22 = vpop.f32.mrb[89].mxu1  ;;  %v8934_v57 = vsel %vm1107_vm13, -1e+09, %v6471_v63  ;;  %v8977_v3 = vpop.xlane.xlu0 %2568 }
 0x646   : > { %v2134_v4 = vpack.c.bf16 %v2126_v38, %v2125_v48  ;;  %v8920_v13 = vsel %vm1105_vm11, -1e+09, %v3023_v22  ;;  %v6472_v2 = vpop.f32.mrb[90].mxu1  ;;  %3080 = vmax.xlane.f32.xlu1 %v8914_v8 }
 0x647   : > { %v2133_v36 = vpack.c.bf16 %v2124_v46, %v2123_v24  ;;  %v3026_v60 = vpop.f32.mrb[91].mxu1  ;;  %3086 = vmax.xlane.f32.xlu0 %v8920_v13  ;;  %v8951_v21 = vsel %vm1108_vm10, -1e+09, %v6472_v2 }
 0x648   : > { %6408 = vmatpush3.bf16.msra.mxu0 %v8907_v37  ;;  %v8945_v18 = vsel %vm1106_vm8, -1e+09, %v3026_v60 }
 0x649   : > { %6357 = vmatprep.mubr.msk.bf16.mxu0 %vm1113_vm0, %v2133_v36  ;;  %6425 = vmatprep.subr.bf16.mxu0 %v6751_v10  ;;  %v8979_v7 = vpop.xlane.xlu0 %2564 }
 0x64a   : > { %6358 = vmatmul.mubr.msk.bf16.gmra.mrb[60].mxu0 %vm1113_vm0, %v2134_v4  ;;  %3084 = vmax.xlane.f32.xlu1 %v8928_v62 }
 0x64b   : > { %3090 = vmax.xlane.f32.xlu0 %v8934_v57  ;;  %6409 = vmatprep.mubr.bf16.mxu0 %v10819_v54 }
 0x64d   : > { %v8981_v1 = vpop.xlane.xlu0 %2574 }
 0x64e   : > { %3088 = vmax.xlane.f32.xlu1 %v8945_v18 }
 0x651   : > { %v8983_v35 = vpop.xlane.xlu0 %2570 }
 0x652   : > { %6410 = vmatmul.mubr.bf16.vlgmr.msra.gmra.mrb[80].mxu0 %v10821_v33  ;;  %3092 = vmax.xlane.f32.xlu1 %v8951_v21 }
 0x653   : > { %6426 = vmatpush3.bf16.msra.mxu0 %v6751_v10  ;;  %6413 = vmatprep.mubr.bf16.mxu0 %v10822_v53 }
 0x654   : > { %6427 = vmatprep.subr.bf16.mxu0 %v6752_v0 }
 0x655   : > { %v8985_v41 = vpop.xlane.xlu0 %2576 }
 0x657   : > { %6428 = vmatpush3.bf16.msra.mxu0 %v6752_v0 }
 0x658   : > { %6477 = vmatprep.subr.bf16.mxu0 %v8727_v44 }
 0x659   : > { %v8987_v47 = vpop.xlane.xlu0 %2572 }
 0x65a   : > { %6414 = vmatmul.mubr.bf16.gmra.mrb[84].mxu0 %v10823_v40 }
 0x65b   : > { %6417 = vmatprep.mubr.bf16.mxu0 %v10824_v15 }
 0x65d   : > { %v8989_v50 = vpop.xlane.xlu0 %2582 }
 0x661   : > { %v8993_v17 = vpop.xlane.xlu0 %2578 }
 0x662   : > { %6418 = vmatmul.mubr.bf16.gmra.mrb[88].mxu0 %v10825_v6 }
 0x663   : > { %6421 = vmatprep.mubr.bf16.mxu0 %v10826_v16  ;;  %v10828_v16 = vld [vmem:[#allocation17_spill] sm:$0xff] }
 0x664   : > { %vm10829_vm1 = vcmp.gt.s32.totalorder %v8180_v20, %v10828_v16 }
 0x66a   : > { %6422 = vmatmul.mubr.bf16.gmra.mrb[92].mxu0 %v2601_v26 }
 0x66b   : > { %v8991_v52 = vpop.xlane.xlu1 %2562 }
 0x66f   : > { %v8995_v49 = vpop.xlane.xlu1 %2584 }
 0x673   : > { %v8999_v34 = vpop.xlane.xlu1 %2580 }
 0x692   : > { %v8997_v61 = vpop.xlane.xlu0 %2590 }
 0x696   : > { %v9001_v39 = vpop.xlane.xlu0 %2586 }
 0x6c3   : > { %v9003_v56 = vpop.xlane.xlu1 %2592 }
 0x6c4   : > { %v3071_v29 = vpop.xlane.xlu0 %3070 }
 0x6c5   : > { %v3102_v28 = vsub.f32 %v8864_v42, %v3071_v29 }
 0x6c7   : > { %v9006_v48 = vpop.xlane.xlu1 %2588  ;;  %v3118_v58 = vmul.f32 1.442695, %v3102_v28 }
 0x6c8   : > { %v3075_v38 = vpop.xlane.xlu0 %3074 }
 0x6c9   : > { %v3104_v63 = vsub.f32 %v8874_v55, %v3075_v38  ;;  %6979 = vpow2.f32 %v3118_v58 }
 0x6cb   : > { %v3073_v24 = vpop.xlane.xlu1 %3072  ;;  %v3122_v4 = vmul.f32 1.442695, %v3104_v63 }
 0x6cc   : > { %v3103_v46 = vsub.f32 %v8882_v32, %v3073_v24  ;;  %v3079_v22 = vpop.xlane.xlu0 %3078 }
 0x6cd   : > { %v3106_v2 = vsub.f32 %v8888_v19, %v3079_v22 }
 0x6ce   : > { %v3120_v10 = vmul.f32 1.442695, %v3103_v46 }
 0x6cf   : > { %v3077_v36 = vpop.xlane.xlu1 %3076  ;;  %v3126_v33 = vmul.f32 1.442695, %v3106_v2 }
 0x6d0   : > { %6981 = vpow2.f32 %v3120_v10  ;;  %v3105_v60 = vsub.f32 %v8896_v51, %v3077_v36  ;;  %v3083_v42 = vpop.xlane.xlu0 %3082 }
 0x6d1   : > { %v6475_v54 = vpop.f32.mrb[92].mxu1  ;;  %6983 = vpow2.f32 %v3122_v4  ;;  %v3108_v55 = vsub.f32 %v8903_v31, %v3083_v42 }
 0x6d2   : > { %v3124_v0 = vmul.f32 1.442695, %v3105_v60  ;;  %v3039_v23 = vpop.f32.mrb[93].mxu1  ;;  %v9029_v28 = vsel %vm10830_vm2, -1e+09, %v6475_v54 }
 0x6d3   : > { %v9016_v53 = vsel %vm1109_vm15, -1e+09, %v3039_v23  ;;  %v6476_v40 = vpop.f32.mrb[94].mxu1  ;;  %v3081_v15 = vpop.xlane.xlu1 %3080  ;;  %v3130_v29 = vmul.f32 1.442695, %v3108_v55 }
 0x6d4   : > { %6985 = vpow2.f32 %v3124_v0  ;;  %v3107_v19 = vsub.f32 %v8914_v8, %v3081_v15  ;;  %v3042_v6 = vpop.f32.mrb[95].mxu1  ;;  %3094 = vmax.xlane.f32.xlu0 %v9016_v53  ;;  %v3087_v51 = vpop.xlane.xlu0 %3086  ;;  %v9039_v46 = vsel %vm1112_vm14, -1e+09, %v6476_v40 }
 0x6d5   : > { %v9023_v26 = vsel %vm10829_vm1, -1e+09, %v3042_v6  ;;  %6987 = vpow2.f32 %v3126_v33  ;;  %v3110_v8 = vsub.f32 %v8920_v13, %v3087_v51  ;;  %v9034_v24 = vpop.eup %6979 }
 0x6d6   : > { %v3128_v31 = vmul.f32 1.442695, %v3107_v19  ;;  %3096 = vmax.xlane.f32.xlu1 %v9023_v26 }
 0x6d7   : > { %v3085_v38 = vpop.xlane.xlu1 %3084  ;;  %v3134_v13 = vmul.f32 1.442695, %v3110_v8 }
 0x6d8   : > { %6989 = vpow2.f32 %v3128_v31  ;;  %v3109_v58 = vsub.f32 %v8928_v62, %v3085_v38  ;;  %3098 = vmax.xlane.f32.xlu0 %v9029_v28  ;;  %v3091_v63 = vpop.xlane.xlu0 %3090 }
 0x6d9   : > { %6991 = vpow2.f32 %v3130_v29  ;;  %v3112_v10 = vsub.f32 %v8934_v57, %v3091_v63 }
 0x6da   : > { %v9041_v22 = vpop.eup %6981  ;;  %v3132_v43 = vmul.f32 1.442695, %v3109_v58  ;;  %3100 = vmax.xlane.f32.xlu1 %v9039_v46 }
 0x6db   : > { %v3089_v62 = vpop.xlane.xlu1 %3088  ;;  %v3182_v4 = vpack.c.bf16 %v9041_v22, %v9034_v24  ;;  %v9049_v20 = vpop.eup %6983  ;;  %v3138_v60 = vmul.f32 1.442695, %v3112_v10 }
 0x6dc   : > { %6993 = vpow2.f32 %v3132_v43  ;;  %v3111_v2 = vsub.f32 %v8945_v18, %v3089_v62  ;;  %3150 = vadd.xlane.f32.xlu0 %v9034_v24 }
 0x6dd   : > { %6995 = vpow2.f32 %v3134_v13 }
 0x6de   : > { %v9051_v27 = vpop.eup %6985  ;;  %v3136_v36 = vmul.f32 1.442695, %v3111_v2  ;;  %3152 = vadd.xlane.f32.xlu1 %v9041_v22 }
 0x6df   : > { %v3093_v42 = vpop.xlane.xlu1 %3092  ;;  %v3183_v57 = vpack.c.bf16 %v9051_v27, %v9049_v20  ;;  %v9058_v18 = vpop.eup %6987 }
 0x6e0   : > { %6997 = vpow2.f32 %v3136_v36  ;;  %v3113_v54 = vsub.f32 %v8951_v21, %v3093_v42  ;;  %3154 = vadd.xlane.f32.xlu0 %v9049_v20 }
 0x6e1   : > { %6999 = vpow2.f32 %v3138_v60 }
 0x6e2   : > { %v9060_v0 = vpop.eup %6989  ;;  %v3140_v23 = vmul.f32 1.442695, %v3113_v54  ;;  %3156 = vadd.xlane.f32.xlu1 %v9051_v27 }
 0x6e3   : > { %v3184_v33 = vpack.c.bf16 %v9060_v0, %v9058_v18  ;;  %v9066_v55 = vpop.eup %6991 }
 0x6e4   : > { %7001 = vpow2.f32 %v3140_v23  ;;  %3158 = vadd.xlane.f32.xlu0 %v9058_v18 }
 0x6e5   : > { %7003 = vrcp.f32 %v8975_v12 }
 0x6e6   : > { %v9068_v32 = vpop.eup %6993  ;;  %3160 = vadd.xlane.f32.xlu1 %v9060_v0  ;;  %7005 = vrcp.f32 %v8991_v52 }
 0x6e7   : > { %v3185_v21 = vpack.c.bf16 %v9068_v32, %v9066_v55  ;;  %v9074_v40 = vpop.eup %6995  ;;  %7007 = vrcp.f32 %v8977_v3 }
 0x6e8   : > { %3162 = vadd.xlane.f32.xlu0 %v9066_v55  ;;  %7009 = vrcp.f32 %v8979_v7 }
 0x6e9   : > { %7011 = vrcp.f32 %v8981_v1 }
 0x6ea   : > { %v9076_v15 = vpop.eup %6997  ;;  %3164 = vadd.xlane.f32.xlu1 %v9068_v32  ;;  %7013 = vrcp.f32 %v8983_v35 }
 0x6eb   : > { %v3186_v19 = vpack.c.bf16 %v9076_v15, %v9074_v40  ;;  %v9082_v6 = vpop.eup %6999  ;;  %7015 = vrcp.f32 %v8985_v41 }
 0x6ec   : > { %3166 = vadd.xlane.f32.xlu0 %v9074_v40  ;;  %7017 = vrcp.f32 %v8987_v47  ;;  %v6754_v40 = vld [vmem:[#allocation2 + $0x38] sm:$0xff]  }
 0x6ed   : > { %7019 = vrcp.f32 %v8989_v50 }
 0x6ee   : > { %v9084_v51 = vpop.eup %7001  ;;  %3168 = vadd.xlane.f32.xlu1 %v9076_v15  ;;  %7021 = vrcp.f32 %v8993_v17 }
 0x6ef   : > { %v3187_v16 = vpack.c.bf16 %v9084_v51, %v9082_v6  ;;  %v7004_v31 = vpop.eup %7003  ;;  %7023 = vrcp.f32 %v8995_v49 }
 0x6f0   : > { %3170 = vadd.xlane.f32.xlu0 %v9082_v6  ;;  %v7006_v8 = vpop.eup %7005  ;;  %7025 = vrcp.f32 %v8999_v34 }
 0x6f1   : > { %v7008_v12 = vpop.eup %7007  ;;  %7027 = vrcp.f32 %v8997_v61 }
 0x6f2   : > { %3172 = vadd.xlane.f32.xlu1 %v9084_v51  ;;  %v7010_v43 = vpop.eup %7009  ;;  %7029 = vrcp.f32 %v9001_v39 }
 0x6f3   : > { %v7012_v35 = vpop.eup %7011  ;;  %7031 = vrcp.f32 %v9003_v56 }
 0x6f4   : > { %v7014_v47 = vpop.eup %7013  ;;  %7033 = vrcp.f32 %v9006_v48 }
 0x6f5   : > { %v7016_v36 = vpop.eup %7015 }
 0x6f6   : > { %v7018_v42 = vpop.eup %7017 }
 0x6f7   : > { %v7020_v34 = vpop.eup %7019 }
 0x725   : > { %v6411_v29 = vpop.f32.mrb[80].mxu0 }
 0x726   : > { %v2741_v38 = vmul.f32 %v7004_v31, %v6411_v29  ;;  %v2660_v58 = vpop.f32.mrb[81].mxu0  ;;  %v7022_v29 = vpop.eup %7021 }
 0x727   : > { %v2739_v63 = vmul.f32 %v7006_v8, %v2660_v58  ;;  %v6412_v52 = vpop.f32.mrb[82].mxu0  ;;  %v7024_v61 = vpop.eup %7023 }
 0x728   : > { %v2742_v3 = vmul.f32 %v7008_v12, %v6412_v52  ;;  %v2663_v13 = vpop.f32.mrb[83].mxu0  ;;  %v7026_v39 = vpop.eup %7025 }
 0x729   : > { %v2740_v7 = vmul.f32 %v7010_v43, %v2663_v13  ;;  %v7028_v48 = vpop.eup %7027 }
 0x72a   : > { %v2756_v10 = vpack.c.bf16 %v2742_v3, %v2741_v38  ;;  %v7030_v13 = vpop.eup %7029 }
 0x72b   : > { %v2755_v1 = vpack.c.bf16 %v2740_v7, %v2739_v63 }
 0x72d   : > { %v6415_v41 = vpop.f32.mrb[84].mxu0  ;;  %6429 = vmatprep.mubr.msk.bf16.mxu0 %vm1113_vm0, %v2755_v1 }
 0x72e   : > { %v2745_v62 = vmul.f32 %v7012_v35, %v6415_v41  ;;  %v2676_v2 = vpop.f32.mrb[85].mxu0  ;;  %6430 = vmatmul.mubr.msk.bf16.vlgmr.msra.gmra.mrb[48].mxu0 %vm1113_vm0, %v2756_v10  ;;  %v7032_v10 = vpop.eup %7031 }
 0x72f   : > { %v2743_v60 = vmul.f32 %v7014_v47, %v2676_v2  ;;  %6478 = vmatpush3.bf16.msra.mxu0 %v8727_v44  ;;  %v6416_v50 = vpop.f32.mrb[86].mxu0  ;;  %v7034_v41 = vpop.eup %7033 }
 0x730   : > { %v2746_v17 = vmul.f32 %v7016_v36, %v6416_v50  ;;  %6479 = vmatprep.subr.bf16.mxu0 %v8739_v59  ;;  %v2679_v49 = vpop.f32.mrb[87].mxu0 }
 0x731   : > { %v2744_v54 = vmul.f32 %v7018_v42, %v2679_v49 }
 0x732   : > { %v2758_v23 = vpack.c.bf16 %v2746_v17, %v2745_v62 }
 0x733   : > { %v2757_v31 = vpack.c.bf16 %v2744_v54, %v2743_v60  ;;  %6480 = vmatpush3.bf16.msra.mxu0 %v8739_v59 }
 0x734   : > { %6481 = vmatprep.subr.bf16.mxu0 %v8743_v14 }
 0x735   : > { %v6419_v44 = vpop.f32.mrb[88].mxu0  ;;  %6433 = vmatprep.mubr.msk.bf16.mxu0 %vm1113_vm0, %v2757_v31 }
 0x736   : > { %v2749_v8 = vmul.f32 %v7020_v34, %v6419_v44  ;;  %v2692_v38 = vpop.f32.mrb[89].mxu0  ;;  %6434 = vmatmul.mubr.msk.bf16.gmra.mrb[52].mxu0 %vm1113_vm0, %v2758_v23 }
 0x737   : > { %v2747_v58 = vmul.f32 %v7022_v29, %v2692_v38  ;;  %6482 = vmatpush3.bf16.msra.mxu0 %v8743_v14  ;;  %v6420_v59 = vpop.f32.mrb[90].mxu0 }
 0x738   : > { %v2750_v12 = vmul.f32 %v7024_v61, %v6420_v59  ;;  %6483 = vmatprep.subr.bf16.mxu0 %v8753_v11  ;;  %v2695_v56 = vpop.f32.mrb[91].mxu0 }
 0x739   : > { %v2748_v63 = vmul.f32 %v7026_v39, %v2695_v56 }
 0x73a   : > { %v2760_v52 = vpack.c.bf16 %v2750_v12, %v2749_v8 }
 0x73b   : > { %v2759_v43 = vpack.c.bf16 %v2748_v63, %v2747_v58  ;;  %6484 = vmatpush3.bf16.msra.mxu0 %v8753_v11 }
 0x73c   : > { %6485 = vmatprep.subr.bf16.mxu0 %v8755_v45 }
 0x73d   : > { %v6423_v3 = vpop.f32.mrb[92].mxu0  ;;  %6437 = vmatprep.mubr.msk.bf16.mxu0 %vm1113_vm0, %v2759_v43 }
 0x73e   : > { %v2753_v7 = vmul.f32 %v7028_v48, %v6423_v3  ;;  %v2708_v14 = vpop.f32.mrb[93].mxu0  ;;  %6438 = vmatmul.mubr.msk.bf16.gmra.mrb[56].mxu0 %vm1113_vm0, %v2760_v52 }
 0x73f   : > { %v2751_v1 = vmul.f32 %v7030_v13, %v2708_v14  ;;  %6486 = vmatpush3.bf16.msra.mxu0 %v8755_v45  ;;  %v6424_v35 = vpop.f32.mrb[94].mxu0 }
 0x740   : > { %v2754_v47 = vmul.f32 %v7032_v10, %v6424_v35  ;;  %6487 = vmatprep.subr.bf16.mxu0 %v8765_v25  ;;  %v2711_v11 = vpop.f32.mrb[95].mxu0 }
 0x741   : > { %v2752_v62 = vmul.f32 %v7034_v41, %v2711_v11 }
 0x742   : > { %v2762_v2 = vpack.c.bf16 %v2754_v47, %v2753_v7 }
 0x743   : > { %v2761_v36 = vpack.c.bf16 %v2752_v62, %v2751_v1  ;;  %6488 = vmatpush3.bf16.msra.mxu0 %v8765_v25 }
 0x744   : > { %6489 = vmatprep.subr.bf16.mxu0 %v8846_v5 }
 0x745   : > { %6441 = vmatprep.mubr.msk.bf16.mxu0 %vm1113_vm0, %v2761_v36 }
 0x746   : > { %6442 = vmatmul.mubr.msk.bf16.gmra.mrb[60].mxu0 %vm1113_vm0, %v2762_v2 }
 0x747   : > { %6490 = vmatpush3.bf16.msra.mxu0 %v8846_v5  ;;  %6493 = vmatprep.mubr.bf16.mxu0 %v3182_v4 }
 0x748   : > { %6491 = vmatprep.subr.bf16.mxu0 %v8907_v37 }
 0x74b   : > { %6492 = vmatpush3.bf16.msra.mxu0 %v8907_v37 }
 0x74e   : > { %6494 = vmatmul.mubr.bf16.vlgmr.msra.gmra.mrb[96].mxu0 %v3183_v57 }
 0x74f   : > { %6497 = vmatprep.mubr.bf16.mxu0 %v3184_v33 }
 0x756   : > { %6498 = vmatmul.mubr.bf16.gmra.mrb[100].mxu0 %v3185_v21 }
 0x757   : > { %6501 = vmatprep.mubr.bf16.mxu0 %v3186_v19 }
 0x75e   : > { %6502 = vmatmul.mubr.bf16.gmra.mrb[104].mxu0 %v3187_v16 }
 0x761   : > { %v3095_v45 = vpop.xlane.xlu0 %3094 }
 0x762   : > { %v3114_v25 = vsub.f32 %v9016_v53, %v3095_v45 }
 0x763   : > { %v3097_v5 = vpop.xlane.xlu1 %3096 }
 0x764   : > { %v3142_v37 = vmul.f32 1.442695, %v3114_v25  ;;  %v3115_v24 = vsub.f32 %v9023_v26, %v3097_v5 }
 0x765   : > { %v3099_v22 = vpop.xlane.xlu0 %3098 }
 0x766   : > { %7035 = vpow2.f32 %v3142_v37  ;;  %v3144_v4 = vmul.f32 1.442695, %v3115_v24  ;;  %v3116_v20 = vsub.f32 %v9029_v28, %v3099_v22  ;;  %v6753_v28 = vld [vmem:[#allocation2 + $0x30] sm:$0xff]  }
 0x767   : > { %v3101_v27 = vpop.xlane.xlu1 %3100  ;;  %6509 = vmatprep.subr.bf16.mxu0 %v6753_v28 }
 0x768   : > { %7037 = vpow2.f32 %v3144_v4  ;;  %v3146_v57 = vmul.f32 1.442695, %v3116_v20  ;;  %v3117_v18 = vsub.f32 %v9039_v46, %v3101_v27  ;;  %6510 = vmatpush3.bf16.msra.mxu0 %v6753_v28 }
 0x769   : > { %6511 = vmatprep.subr.bf16.mxu0 %v6754_v40  ;;  %v3151_v46 = vpop.xlane.xlu0 %3150 }
 0x76a   : > { %7039 = vpow2.f32 %v3146_v57  ;;  %v3148_v0 = vmul.f32 1.442695, %v3117_v18 }
 0x76b   : > { %v3153_v15 = vpop.xlane.xlu1 %3152 }
 0x76c   : > { %7041 = vpow2.f32 %v3148_v0  ;;  %6512 = vmatpush3.bf16.msra.mxu0 %v6754_v40 }
 0x76d   : > { %v3155_v19 = vpop.xlane.xlu0 %3154  ;;  %7043 = vrcp.f32 %v3151_v46 }
 0x76e   : > { %7045 = vrcp.f32 %v3155_v19 }
 0x76f   : > { %v3157_v6 = vpop.xlane.xlu1 %3156 }
 0x770   : > { %v7036_v33 = vpop.eup %7035  ;;  %7047 = vrcp.f32 %v3157_v6 }
 0x771   : > { %3174 = vadd.xlane.f32.xlu0 %v7036_v33  ;;  %v3159_v51 = vpop.xlane.xlu0 %3158  ;;  %7049 = vrcp.f32 %v3153_v15 }
 0x772   : > { %v7038_v53 = vpop.eup %7037  ;;  %7051 = vrcp.f32 %v3159_v51 }
 0x773   : > { %3176 = vadd.xlane.f32.xlu1 %v7038_v53  ;;  %v3188_v55 = vpack.c.bf16 %v7038_v53, %v7036_v33  ;;  %v3161_v16 = vpop.xlane.xlu1 %3160 }
 0x774   : > { %v7040_v32 = vpop.eup %7039 }
 0x775   : > { %6505 = vmatprep.mubr.bf16.mxu0 %v3188_v55  ;;  %3178 = vadd.xlane.f32.xlu0 %v7040_v32  ;;  %v3163_v60 = vpop.xlane.xlu0 %3162 }
 0x776   : > { %v7042_v26 = vpop.eup %7041  ;;  %7053 = vrcp.f32 %v3163_v60 }
 0x777   : > { %3180 = vadd.xlane.f32.xlu1 %v7042_v26  ;;  %v3189_v21 = vpack.c.bf16 %v7042_v26, %v7040_v32  ;;  %v3165_v50 = vpop.xlane.xlu1 %3164  ;;  %v7044_v49 = vpop.eup %7043 }
 0x778   : > { %7055 = vrcp.f32 %v3165_v50  ;;  %v7046_v23 = vpop.eup %7045 }
 0x779   : > { %6506 = vmatmul.mubr.bf16.gmra.mrb[108].mxu0 %v3189_v21  ;;  %v3167_v42 = vpop.xlane.xlu0 %3166  ;;  %7057 = vrcp.f32 %v3161_v16 }
 0x77a   : > { %v7048_v34 = vpop.eup %7047  ;;  %7059 = vrcp.f32 %v3167_v42 }
 0x77b   : > { %v3169_v17 = vpop.xlane.xlu1 %3168  ;;  %v7050_v29 = vpop.eup %7049 }
 0x77c   : > { %v7052_v52 = vpop.eup %7051 }
 0x77d   : > { %v3171_v58 = vpop.xlane.xlu0 %3170 }
 0x77e   : > { %7061 = vrcp.f32 %v3171_v58 }
 0x77f   : > { %v3173_v12 = vpop.xlane.xlu1 %3172 }
 0x780   : > { %7063 = vrcp.f32 %v3173_v12  ;;  %v7054_v48 = vpop.eup %7053  ;;  %v3617_v12 = vld [vmem:[%s10715_s5 + $0x80] sm:$0xff] }
 0x781   : > { %7065 = vrcp.f32 %v3169_v17 }
 0x782   : > { %v7056_v13 = vpop.eup %7055 }
 0x783   : > { %v7058_v14 = vpop.eup %7057 }
 0x784   : > { %v7060_v2 = vpop.eup %7059 }
 0x788   : > { %v7062_v45 = vpop.eup %7061 }
 0x78a   : > { %v7064_v5 = vpop.eup %7063 }
 0x78b   : > { %v7066_v24 = vpop.eup %7065 }
 0x7fe   : > { %v3175_v33 = vpop.xlane.xlu0 %3174 }
 0x7ff   : > { %7067 = vrcp.f32 %v3175_v33 }
 0x800   : > { %v3177_v53 = vpop.xlane.xlu1 %3176 }
 0x802   : > { %v3179_v55 = vpop.xlane.xlu0 %3178 }
 0x803   : > { %7069 = vrcp.f32 %v3179_v55  ;;  %v7368_v55 = vld [vmem:[%s7632_s16 + $0x30] sm:$0xff] }
 0x804   : > { %v3181_v32 = vpop.xlane.xlu1 %3180 }
 0x805   : > { %7071 = vrcp.f32 %v3181_v32 }
 0x806   : > { %7073 = vrcp.f32 %v3177_v53 }
 0x809   : > { %v7068_v26 = vpop.eup %7067 }
 0x80d   : > { %v7070_v28 = vpop.eup %7069 }
 0x80f   : > { %v7072_v46 = vpop.eup %7071 }
 0x810   : > { %v7074_v19 = vpop.eup %7073 }
 0x821   : > { %v6495_v54 = vpop.f32.mrb[96].mxu0 }
 0x822   : > { %v3224_v31 = vpop.f32.mrb[97].mxu0  ;;  %v3305_v8 = vmul.f32 %v7046_v23, %v6495_v54  ;;  %v3605_v54 = vld [vmem:[%s10715_s5 + $0x20] sm:$0xff]  ;;  %v3602_v23 = vld [vmem:[%s10715_s5 + $0x8] sm:$0xff] }
 0x823   : > { %v6496_v44 = vpop.f32.mrb[98].mxu0  ;;  %v3303_v59 = vmul.f32 %v7044_v49, %v3224_v31  ;;  %v3601_v49 = vld [vmem:[%s10715_s5] sm:$0xff] }
 0x824   : > { %v3306_v38 = vmul.f32 %v7048_v34, %v6496_v44  ;;  %v3227_v61 = vpop.f32.mrb[99].mxu0  ;;  %v5729_v31 = vcombine.low %v3601_v49, %v3605_v54  ;;  %v5730_v34 = vcombine.high %v3601_v49, %v3605_v54  ;;  %v3606_v44 = vld [vmem:[%s10715_s5 + $0x28] sm:$0xff]  ;;  %v3625_v49 = vld [vmem:[%s10715_s5 + $0xc0] sm:$0xff] }
 0x825   : > { %v3304_v39 = vmul.f32 %v7050_v29, %v3227_v61  ;;  %v3609_v29 = vld [vmem:[%s10715_s5 + $0x40] sm:$0xff]  ;;  %v5732_v61 = vcombine.high %v3602_v23, %v3606_v44 }
 0x826   : > { %v3320_v56 = vpack.c.bf16 %v3306_v38, %v3305_v8  ;;  %v3613_v8 = vld [vmem:[%s10715_s5 + $0x60] sm:$0xff]  ;;  %v5731_v38 = vcombine.low %v3602_v23, %v3606_v44  ;;  %4027 = vmatprep.subr.bf16.mxu1 %v5730_v34  ;;  %v3626_v23 = vld [vmem:[%s10715_s5 + $0xc8] sm:$0xff] }
 0x827   : > { %v3319_v63 = vpack.c.bf16 %v3304_v39, %v3303_v59  ;;  %v5738_v58 = vcombine.high %v3609_v29, %v3613_v8  ;;  %v3610_v59 = vld [vmem:[%s10715_s5 + $0x48] sm:$0xff]  ;;  %4140 = vmatprep.subr.bf16.mxu0 %v5732_v61  ;;  %4028 = vmatpush1.bf16.msra.mxu1 %v5729_v31  ;;  %v3629_v54 = vld [vmem:[%s10715_s5 + $0xe0] sm:$0xff]  ;;  %v7372_v31 = vld [vmem:[%s7632_s16 + $0x50] sm:$0xff] }
 0x828   : > { %v3614_v39 = vld [vmem:[%s10715_s5 + $0x68] sm:$0xff] }
 0x829   : > { %v6499_v43 = vpop.f32.mrb[100].mxu0  ;;  %6513 = vmatprep.mubr.msk.bf16.mxu0 %vm1113_vm0, %v3319_v63  ;;  %v3621_v63 = vld [vmem:[%s10715_s5 + $0xa0] sm:$0xff]  ;;  %4029 = vmatprep.subr.bf16.mxu1 %v5738_v58  ;;  %v7373_v44 = vld [vmem:[%s7632_s16 + $0x48] sm:$0xff]  ;;  %v5753_v58 = vcombine.low %v3625_v49, %v3629_v54 }
 0x82a   : > { %v3240_v3 = vpop.f32.mrb[101].mxu0  ;;  %6514 = vmatmul.mubr.msk.bf16.vlgmr.msra.gmra.mrb[48].mxu0 %vm1113_vm0, %v3320_v56  ;;  %v3309_v10 = vmul.f32 %v7054_v48, %v6499_v43  ;;  %v5740_v56 = vcombine.high %v3610_v59, %v3614_v39  ;;  %v3622_v43 = vld [vmem:[%s10715_s5 + $0xa8] sm:$0xff]  ;;  %v5737_v48 = vcombine.low %v3609_v29, %v3613_v8 }
 0x82b   : > { %v6500_v7 = vpop.f32.mrb[102].mxu0  ;;  %v3307_v41 = vmul.f32 %v7052_v52, %v3240_v3  ;;  %v3618_v52 = vld [vmem:[%s10715_s5 + $0x88] sm:$0xff]  ;;  %4141 = vmatpush1.bf16.msra.mxu0 %v5731_v38  ;;  %v5739_v3 = vcombine.low %v3610_v59, %v3614_v39  ;;  %v5754_v38 = vcombine.high %v3625_v49, %v3629_v54  ;;  %v9325_v49 = vld [vmem:[%s10715_s5 + $0x30] sm:$0xff]  ;;  %v7375_v54 = vld [vmem:[%s7632_s16 + $0x60] sm:$0xff] }
 0x82c   : > { %v3310_v1 = vmul.f32 %v7056_v13, %v6500_v7  ;;  %v3243_v35 = vpop.f32.mrb[103].mxu0  ;;  %v5746_v13 = vcombine.high %v3617_v12, %v3621_v63  ;;  %4142 = vmatprep.subr.bf16.mxu0 %v5740_v56  ;;  %v5748_v7 = vcombine.high %v3618_v52, %v3622_v43  ;;  %4030 = vmatpush1.bf16.msra.mxu1 %v5737_v48  ;;  %v3630_v61 = vld [vmem:[%s10715_s5 + $0xe8] sm:$0xff] }
 0x82d   : > { %v3308_v47 = vmul.f32 %v7058_v14, %v3243_v35  ;;  %v5745_v14 = vcombine.low %v3617_v12, %v3621_v63  ;;  %v5755_v59 = vcombine.low %v3626_v23, %v3630_v61  ;;  %v5756_v39 = vcombine.high %v3626_v23, %v3630_v61  ;;  %v7374_v12 = vld [vmem:[%s7632_s16 + $0x58] sm:$0xff]  ;;  %v3634_v48 = vld [vmem:[%s10715_s5 + $0x108] sm:$0xff]  ;;  %v7376_v61 = vld [vmem:[%s7632_s16 + $0x70] sm:$0xff] }
 0x82e   : > { %v3322_v11 = vpack.c.bf16 %v3310_v1, %v3309_v10  ;;  %4031 = vmatprep.subr.bf16.mxu1 %v5746_v13  ;;  %v5747_v10 = vcombine.low %v3618_v52, %v3622_v43  ;;  %v3633_v52 = vld [vmem:[%s10715_s5 + $0x100] sm:$0xff] }
 0x82f   : > { %v3321_v62 = vpack.c.bf16 %v3308_v47, %v3307_v41  ;;  %4143 = vmatpush1.bf16.msra.mxu0 %v5739_v3  ;;  %v7363_v41 = vld [vmem:[%s7632_s16] sm:$0xff] }
 0x830   : > { %4144 = vmatprep.subr.bf16.mxu0 %v5748_v7  ;;  %4032 = vmatpush1.bf16.msra.mxu1 %v5745_v14  ;;  %v3637_v43 = vld [vmem:[%s10715_s5 + $0x120] sm:$0xff]  ;;  %v3638_v7 = vld [vmem:[%s10715_s5 + $0x128] sm:$0xff] }
 0x831   : > { %v6503_v36 = vpop.f32.mrb[104].mxu0  ;;  %6517 = vmatprep.mubr.msk.bf16.mxu0 %vm1113_vm0, %v3321_v62  ;;  %4033 = vmatprep.subr.bf16.mxu1 %v5754_v38  ;;  %v5762_v13 = vcombine.high %v3633_v52, %v3637_v43  ;;  %v5761_v14 = vcombine.low %v3633_v52, %v3637_v43 }
 0x832   : > { %v3256_v25 = vpop.f32.mrb[105].mxu0  ;;  %6518 = vmatmul.mubr.msk.bf16.gmra.mrb[52].mxu0 %vm1113_vm0, %v3322_v11  ;;  %v3313_v22 = vmul.f32 %v7062_v45, %v6503_v36  ;;  %v7365_v45 = vld [vmem:[%s7632_s16 + $0x8] sm:$0xff] }
 0x833   : > { %v6504_v37 = vpop.f32.mrb[106].mxu0  ;;  %v3311_v27 = vmul.f32 %v7060_v2, %v3256_v25  ;;  %4145 = vmatpush1.bf16.msra.mxu0 %v5747_v10  ;;  %v7364_v2 = vld [vmem:[%s7632_s16 + $0x10] sm:$0xff]  ;;  %v5763_v10 = vcombine.low %v3634_v48, %v3638_v7 }
 0x834   : > { %v3314_v4 = vmul.f32 %v7064_v5, %v6504_v37  ;;  %v3259_v20 = vpop.f32.mrb[107].mxu0  ;;  %v7366_v37 = vld [vmem:[%s7632_s16 + $0x18] sm:$0xff]  ;;  %4146 = vmatprep.subr.bf16.mxu0 %v5756_v39  ;;  %4034 = vmatpush1.bf16.msra.mxu1 %v5753_v58 }
 0x835   : > { %v3312_v57 = vmul.f32 %v7066_v24, %v3259_v20  ;;  %4035 = vmatprep.subr.bf16.mxu1 %v5762_v13  ;;  %v3604_v13 = vld [vmem:[%s10715_s5 + $0x18] sm:$0xff] }
 0x836   : > { %v3324_v18 = vpack.c.bf16 %v3314_v4, %v3313_v22 }
 0x837   : > { %v3323_v0 = vpack.c.bf16 %v3312_v57, %v3311_v27  ;;  %v7367_v57 = vld [vmem:[%s7632_s16 + $0x20] sm:$0xff]  ;;  %4147 = vmatpush1.bf16.msra.mxu0 %v5755_v59  ;;  %v7377_v59 = vld [vmem:[%s7632_s16 + $0x68] sm:$0xff] }
 0x838   : > { %4036 = vmatpush1.bf16.msra.mxu1 %v5761_v14 }
 0x839   : > { %6521 = vmatprep.mubr.msk.bf16.mxu0 %vm1113_vm0, %v3323_v0 }
 0x83a   : > { %6522 = vmatmul.mubr.msk.bf16.gmra.mrb[56].mxu0 %vm1113_vm0, %v3324_v18 }
 0x84c   : > { %v6507_v21 = vpop.f32.mrb[108].mxu0 }
 0x84d   : > { %v3272_v40 = vpop.f32.mrb[109].mxu0  ;;  %v3317_v6 = vmul.f32 %v7070_v28, %v6507_v21 }
 0x84e   : > { %v6508_v15 = vpop.f32.mrb[110].mxu0  ;;  %v3315_v60 = vmul.f32 %v7068_v26, %v3272_v40  ;;  %v7369_v26 = vld [vmem:[%s7632_s16 + $0x28] sm:$0xff]  ;;  %v7370_v40 = vld [vmem:[%s7632_s16 + $0x38] sm:$0xff] }
 0x84f   : > { %v3318_v51 = vmul.f32 %v7072_v46, %v6508_v15  ;;  %v3275_v16 = vpop.f32.mrb[111].mxu0 }
 0x850   : > { %v3316_v50 = vmul.f32 %v7074_v19, %v3275_v16  ;;  %v7371_v16 = vld [vmem:[%s7632_s16 + $0x40] sm:$0xff] }
 0x851   : > { %v3326_v42 = vpack.c.bf16 %v3318_v51, %v3317_v6 }
 0x852   : > { %v3325_v17 = vpack.c.bf16 %v3316_v50, %v3315_v60 }
 0x854   : > { %6525 = vmatprep.mubr.msk.bf16.mxu0 %vm1113_vm0, %v3325_v17 }
 0x855   : > { %6526 = vmatmul.mubr.msk.bf16.gmra.mrb[60].mxu0 %vm1113_vm0, %v3326_v42 }
 0x856   : > { %4172 = vmatprep.mubr.bf16.mxu0 %v10818_v9 }
 0x8fd   : > { %v6515_v1 = vpop.f32.mrb[48].mxu0 }
 0x8fe   : > { %v3402_v35 = vpop.f32.mrb[49].mxu0  ;;  %v9201_v36 = vadd.f32 %v7364_v2, %v6515_v1  ;;  %v5764_v1 = vcombine.high %v3634_v48, %v3638_v7  ;;  %v3608_v7 = vld [vmem:[%s10715_s5 + $0x38] sm:$0xff] }
 0x8ff   : > { %v9198_v47 = vadd.f32 %v7363_v41, %v3402_v35  ;;  %v6516_v11 = vpop.f32.mrb[50].mxu0  ;;  %v3641_v41 = vld [vmem:[%s10715_s5 + $0x140] sm:$0xff]  ;;  %v5735_v14 = vcombine.low %v3604_v13, %v3608_v7 }
 0x900   : > { %v3405_v62 = vpop.f32.mrb[51].mxu0  ;;  %10832 = vst [vmem:[#allocation20_spill] sm:$0xff] %v9201_v36  ;;  %v9209_v24 = vadd.f32 %v7366_v37, %v6516_v11  ;;  %v3483_v20 = vmul.f32 %v9201_v36, %v9201_v36  ;;  %4148 = vmatprep.subr.bf16.mxu0 %v5764_v1  ;;  %v3645_v11 = vld [vmem:[%s10715_s5 + $0x160] sm:$0xff] }
 0x901   : > { %10831 = vst [vmem:[#allocation16_spill] sm:$0xff] %v9198_v47  ;;  %v9204_v25 = vadd.f32 %v7365_v45, %v3405_v62  ;;  %v3481_v5 = vmul.f32 %v9198_v47, %v9198_v47  ;;  %v3642_v62 = vld [vmem:[%s10715_s5 + $0x148] sm:$0xff]  ;;  %4149 = vmatpush1.bf16.msra.mxu0 %v5763_v10  ;;  %v5770_v2 = vcombine.high %v3641_v41, %v3645_v11 }
 0x902   : > { %10834 = vst [vmem:[#allocation18_spill] sm:$0xff] %v9209_v24  ;;  %v3484_v33 = vmul.f32 %v9209_v24, %v9209_v24  ;;  %v3646_v45 = vld [vmem:[%s10715_s5 + $0x168] sm:$0xff]  ;;  %v5736_v10 = vcombine.high %v3604_v13, %v3608_v7 }
 0x903   : > { %10833 = vst [vmem:[#allocation14_spill] sm:$0xff] %v9204_v25  ;;  %3497 = vadd.xlane.f32.xlu0 %v3481_v5  ;;  %v3482_v22 = vmul.f32 %v9204_v25, %v9204_v25  ;;  %v5769_v5 = vcombine.low %v3641_v41, %v3645_v11  ;;  %v5771_v37 = vcombine.low %v3642_v62, %v3646_v45 }
 0x904   : > { %4037 = vmatprep.subr.bf16.mxu1 %v5770_v2 }
 0x905   : > { %3499 = vadd.xlane.f32.xlu1 %v3482_v22  ;;  %v6519_v4 = vpop.f32.mrb[52].mxu0  ;;  %v5772_v22 = vcombine.high %v3642_v62, %v3646_v45  ;;  %4038 = vmatpush1.bf16.msra.mxu1 %v5769_v5 }
 0x906   : > { %v3418_v27 = vpop.f32.mrb[53].mxu0  ;;  %v9221_v32 = vadd.f32 %v7368_v55, %v6519_v4  ;;  %v3649_v4 = vld [vmem:[%s10715_s5 + $0x180] sm:$0xff] }
 0x907   : > { %v9216_v18 = vadd.f32 %v7367_v57, %v3418_v27  ;;  %3501 = vadd.xlane.f32.xlu0 %v3483_v20  ;;  %v6520_v0 = vpop.f32.mrb[54].mxu0  ;;  %4150 = vmatprep.subr.bf16.mxu0 %v5772_v22  ;;  %v3653_v20 = vld [vmem:[%s10715_s5 + $0x1a0] sm:$0xff]  ;;  %v3650_v27 = vld [vmem:[%s10715_s5 + $0x188] sm:$0xff] }
 0x908   : > { %v3421_v53 = vpop.f32.mrb[55].mxu0  ;;  %10836 = vst [vmem:[#allocation10_spill] sm:$0xff] %v9221_v32  ;;  %v9229_v46 = vadd.f32 %v7370_v40, %v6520_v0  ;;  %v3487_v6 = vmul.f32 %v9221_v32, %v9221_v32  ;;  %4151 = vmatpush1.bf16.msra.mxu0 %v5771_v37  ;;  %v5778_v57 = vcombine.high %v3649_v4, %v3653_v20  ;;  %v3654_v0 = vld [vmem:[%s10715_s5 + $0x1a8] sm:$0xff] }
 0x909   : > { %10835 = vst [vmem:[#allocation8_spill] sm:$0xff] %v9216_v18  ;;  %v9224_v21 = vadd.f32 %v7369_v26, %v3421_v53  ;;  %3503 = vadd.xlane.f32.xlu1 %v3484_v33  ;;  %v3485_v28 = vmul.f32 %v9216_v18, %v9216_v18  ;;  %v5777_v33 = vcombine.low %v3649_v4, %v3653_v20  ;;  %v3657_v26 = vld [vmem:[%s10715_s5 + $0x1c0] sm:$0xff]  ;;  %v3658_v40 = vld [vmem:[%s10715_s5 + $0x1c8] sm:$0xff] }
 0x90a   : > { %10838 = vst [vmem:[#allocation11_spill] sm:$0xff] %v9229_v46  ;;  %v3488_v42 = vmul.f32 %v9229_v46, %v9229_v46  ;;  %v5779_v53 = vcombine.low %v3650_v27, %v3654_v0  ;;  %v5780_v55 = vcombine.high %v3650_v27, %v3654_v0  ;;  %4039 = vmatprep.subr.bf16.mxu1 %v5778_v57 }
 0x90b   : > { %10837 = vst [vmem:[#allocation9_spill] sm:$0xff] %v9224_v21  ;;  %3505 = vadd.xlane.f32.xlu0 %v3485_v28  ;;  %v3486_v15 = vmul.f32 %v9224_v21, %v9224_v21  ;;  %4040 = vmatpush1.bf16.msra.mxu1 %v5777_v33  ;;  %v3661_v28 = vld [vmem:[%s10715_s5 + $0x1e0] sm:$0xff] }
 0x90c   : > { %4152 = vmatprep.subr.bf16.mxu0 %v5780_v55 }
 0x90d   : > { %3507 = vadd.xlane.f32.xlu1 %v3486_v15  ;;  %v6523_v19 = vpop.f32.mrb[56].mxu0  ;;  %4153 = vmatpush1.bf16.msra.mxu0 %v5779_v53  ;;  %v5786_v15 = vcombine.high %v3657_v26, %v3661_v28 }
 0x90e   : > { %v3434_v51 = vpop.f32.mrb[57].mxu0  ;;  %v9250_v34 = vadd.f32 %v7372_v31, %v6523_v19  ;;  %v3662_v19 = vld [vmem:[%s10715_s5 + $0x1e8] sm:$0xff] }
 0x90f   : > { %v9236_v60 = vadd.f32 %v7371_v16, %v3434_v51  ;;  %3509 = vadd.xlane.f32.xlu0 %v3487_v6  ;;  %v6524_v50 = vpop.f32.mrb[58].mxu0  ;;  %v5785_v6 = vcombine.low %v3657_v26, %v3661_v28  ;;  %v5787_v51 = vcombine.low %v3658_v40, %v3662_v19  ;;  %v5788_v16 = vcombine.high %v3658_v40, %v3662_v19  ;;  %v3615_v19 = vld [vmem:[%s10715_s5 + $0x70] sm:$0xff] }
 0x910   : > { %v3437_v17 = vpop.f32.mrb[59].mxu0  ;;  %10840 = vst [vmem:[#allocation13_spill] sm:$0xff] %v9250_v34  ;;  %v9261_v56 = vadd.f32 %v7374_v12, %v6524_v50  ;;  %v3491_v3 = vmul.f32 %v9250_v34, %v9250_v34  ;;  %4041 = vmatprep.subr.bf16.mxu1 %v5786_v15  ;;  %v3611_v15 = vld [vmem:[%s10715_s5 + $0x50] sm:$0xff] }
 0x911   : > { %10839 = vst [vmem:[#allocation12_spill] sm:$0xff] %v9236_v60  ;;  %v9253_v29 = vadd.f32 %v7373_v44, %v3437_v17  ;;  %3511 = vadd.xlane.f32.xlu1 %v3488_v42  ;;  %v3489_v8 = vmul.f32 %v9236_v60, %v9236_v60  ;;  %4154 = vmatprep.subr.bf16.mxu0 %v5788_v16  ;;  %v9320_v17 = vld [vmem:[%s10715_s5 + $0x10] sm:$0xff] }
 0x912   : > { %10842 = vst [vmem:[#allocation19_spill] sm:$0xff] %v9261_v56  ;;  %v3492_v35 = vmul.f32 %v9261_v56, %v9261_v56  ;;  %4042 = vmatpush1.bf16.msra.mxu1 %v5785_v6  ;;  %4155 = vmatpush1.bf16.msra.mxu0 %v5787_v51  ;;  %v5733_v44 = vcombine.low %v9320_v17, %v9325_v49 }
 0x913   : > { %10841 = vst [vmem:[#allocation15_spill] sm:$0xff] %v9253_v29  ;;  %3513 = vadd.xlane.f32.xlu0 %v3489_v8  ;;  %v3490_v63 = vmul.f32 %v9253_v29, %v9253_v29  ;;  %v5734_v8 = vcombine.high %v9320_v17, %v9325_v49  ;;  %4366 = vmatprep.subr.bf16.mxu0 %v5736_v10  ;;  %v3624_v17 = vld [vmem:[%s10715_s5 + $0xb8] sm:$0xff] }
 0x915   : > { %3515 = vadd.xlane.f32.xlu1 %v3490_v63  ;;  %4253 = vmatprep.subr.bf16.mxu1 %v5734_v8  ;;  %v7378_v63 = vld [vmem:[%s7632_s16 + $0x78] sm:$0xff]  ;;  %v5742_v8 = vcombine.high %v3611_v15, %v3615_v19  ;;  %s7422_s16 = scalar_lea.vmem %s7421_s14, 4096 }
 0x916   : > { %p7424_p3 = scmp.lt.s32.totalorder %s7422_s16, %s7416_s26 }
 0x917   : > { %3517 = vadd.xlane.f32.xlu0 %v3491_v3 }
 0x918   : > { %p7425_p4 = por %p7424_p3, %p7423_p2 }
 0x919   : > { %3519 = vadd.xlane.f32.xlu1 %v3492_v35 }
 0x91a   : > { %p7426_p7 = pnand %p7425_p4, %p7419_p12 }
 0x928   : > { %v6527_v50 = vpop.f32.mrb[60].mxu0 }
 0x929   : > { %v3450_v42 = vpop.f32.mrb[61].mxu0  ;;  %v9335_v58 = vadd.f32 %v7376_v61, %v6527_v50 }
 0x92a   : > { %v9328_v23 = vadd.f32 %v7375_v54, %v3450_v42  ;;  %v6528_v31 = vpop.f32.mrb[62].mxu0  ;;  %v3612_v42 = vld [vmem:[%s10715_s5 + $0x58] sm:$0xff] }
 0x92b   : > { %v3453_v38 = vpop.f32.mrb[63].mxu0  ;;  %10844 = vst [vmem:[#allocation21_spill] sm:$0xff] %v9335_v58  ;;  %v9343_v52 = vadd.f32 %v7378_v63, %v6528_v31  ;;  %v3495_v48 = vmul.f32 %v9335_v58, %v9335_v58  ;;  %v3616_v54 = vld [vmem:[%s10715_s5 + $0x78] sm:$0xff] }
 0x92c   : > { %10843 = vst [vmem:[#allocation17_spill] sm:$0xff] %v9328_v23  ;;  %v9338_v39 = vadd.f32 %v7377_v59, %v3453_v38  ;;  %v3493_v12 = vmul.f32 %v9328_v23, %v9328_v23  ;;  %v3619_v59 = vld [vmem:[%s10715_s5 + $0x90] sm:$0xff]  ;;  %v5744_v63 = vcombine.high %v3612_v42, %v3616_v54 }
 0x92d   : > { %10846 = vst [vmem:[#allocation23_spill] sm:$0xff] %v9343_v52  ;;  %v3496_v3 = vmul.f32 %v9343_v52, %v9343_v52 }
 0x92e   : > { %10845 = vst [vmem:[#allocation22_spill] sm:$0xff] %v9338_v39  ;;  %3521 = vadd.xlane.f32.xlu0 %v3493_v12  ;;  %v3494_v43 = vmul.f32 %v9338_v39, %v9338_v39  ;;  %v3623_v12 = vld [vmem:[%s10715_s5 + $0xb0] sm:$0xff] }
 0x92f   : > { %v5750_v10 = vcombine.high %v3619_v59, %v3623_v12 }
 0x930   : > { %3523 = vadd.xlane.f32.xlu1 %v3494_v43 }
 0x932   : > { %3525 = vadd.xlane.f32.xlu0 %v3495_v48 }
 0x934   : > { %3527 = vadd.xlane.f32.xlu1 %v3496_v3  ;;  %v5741_v3 = vcombine.low %v3611_v15, %v3615_v19 }
 0x990   : > { %v3498_v1 = vpop.xlane.xlu0 %3497 }
 0x991   : > { %v3529_v35 = vmul.f32 0.0078125, %v3498_v1 }
 0x992   : > { %v3500_v41 = vpop.xlane.xlu1 %3499 }
 0x993   : > { %v3545_v11 = vadd.f32 1e-08, %v3529_v35  ;;  %v3530_v62 = vmul.f32 0.0078125, %v3500_v41  ;;  %v5743_v35 = vcombine.low %v3612_v42, %v3616_v54  ;;  %v3620_v41 = vld [vmem:[%s10715_s5 + $0x98] sm:$0xff] }
 0x994   : > { %v3502_v2 = vpop.xlane.xlu0 %3501 }
 0x995   : > { %7075 = vrsqrt.f32 %v3545_v11  ;;  %v3546_v45 = vadd.f32 1e-08, %v3530_v62  ;;  %v3531_v5 = vmul.f32 0.0078125, %v3502_v2  ;;  %v3627_v11 = vld [vmem:[%s10715_s5 + $0xd0] sm:$0xff]  ;;  %v3628_v2 = vld [vmem:[%s10715_s5 + $0xd8] sm:$0xff] }
 0x996   : > { %v3504_v37 = vpop.xlane.xlu1 %3503 }
 0x997   : > { %7077 = vrsqrt.f32 %v3546_v45  ;;  %v3532_v22 = vmul.f32 0.0078125, %v3504_v37  ;;  %v3547_v4 = vadd.f32 1e-08, %v3531_v5  ;;  %v3632_v45 = vld [vmem:[%s10715_s5 + $0xf8] sm:$0xff]  ;;  %v5749_v37 = vcombine.low %v3619_v59, %v3623_v12 }
 0x998   : > { %v3506_v27 = vpop.xlane.xlu0 %3505  ;;  %v3644_v59 = vld [vmem:[%s10715_s5 + $0x158] sm:$0xff] }
 0x999   : > { %v3548_v20 = vadd.f32 1e-08, %v3532_v22  ;;  %v3533_v33 = vmul.f32 0.0078125, %v3506_v27  ;;  %v5752_v22 = vcombine.high %v3620_v41, %v3624_v17  ;;  %v3648_v12 = vld [vmem:[%s10715_s5 + $0x178] sm:$0xff] }
 0x99a   : > { %v3508_v57 = vpop.xlane.xlu1 %3507 }
 0x99b   : > { %7079 = vrsqrt.f32 %v3548_v20  ;;  %v3534_v0 = vmul.f32 0.0078125, %v3508_v57  ;;  %v3549_v40 = vadd.f32 1e-08, %v3533_v33  ;;  %v5751_v57 = vcombine.low %v3620_v41, %v3624_v17  ;;  %v3639_v33 = vld [vmem:[%s10715_s5 + $0x130] sm:$0xff] }
 0x99c   : > { %7081 = vrsqrt.f32 %v3547_v4  ;;  %v3510_v16 = vpop.xlane.xlu0 %3509  ;;  %v5776_v41 = vcombine.high %v3644_v59, %v3648_v12 }
 0x99d   : > { %v3550_v55 = vadd.f32 1e-08, %v3534_v0  ;;  %v3535_v61 = vmul.f32 0.0078125, %v3510_v16  ;;  %v3635_v0 = vld [vmem:[%s10715_s5 + $0x110] sm:$0xff]  ;;  %v3636_v16 = vld [vmem:[%s10715_s5 + $0x118] sm:$0xff] }
 0x99e   : > { %v3512_v26 = vpop.xlane.xlu1 %3511 }
 0x99f   : > { %v7076_v53 = vpop.eup %7075  ;;  %7083 = vrsqrt.f32 %v3550_v55  ;;  %v3536_v50 = vmul.f32 0.0078125, %v3512_v26  ;;  %v3551_v1 = vadd.f32 1e-08, %v3535_v61 }
 0x9a0   : > { %v3577_v6 = vmul.f32 %v7076_v53, %v9198_v47  ;;  %7085 = vrsqrt.f32 %v3549_v40  ;;  %v3514_v49 = vpop.xlane.xlu0 %3513  ;;  %v5760_v53 = vcombine.high %v3628_v2, %v3632_v45 }
 0x9a1   : > { %v7078_v28 = vpop.eup %7077  ;;  %v3552_v48 = vadd.f32 1e-08, %v3536_v50  ;;  %v3537_v20 = vmul.f32 0.0078125, %v3514_v49  ;;  %v3640_v50 = vld [vmem:[%s10715_s5 + $0x138] sm:$0xff] }
 0x9a2   : > { %v3578_v51 = vmul.f32 %v7078_v28, %v9204_v25  ;;  %v3516_v13 = vpop.xlane.xlu1 %3515 }
 0x9a3   : > { %7087 = vrsqrt.f32 %v3552_v48  ;;  %v3538_v62 = vmul.f32 0.0078125, %v3516_v13  ;;  %v3553_v19 = vadd.f32 1e-08, %v3537_v20  ;;  %v5768_v48 = vcombine.high %v3636_v16, %v3640_v50  ;;  %v3663_v20 = vld [vmem:[%s10715_s5 + $0x1f0] sm:$0xff] }
 0x9a4   : > { %v9371_v31 = vpack.c.bf16 %v3578_v51, %v3577_v6  ;;  %7089 = vrsqrt.f32 %v3551_v1  ;;  %v5766_v6 = vcombine.high %v3635_v0, %v3639_v33  ;;  %v5759_v51 = vcombine.low %v3628_v2, %v3632_v45  ;;  %v3518_v42 = vpop.xlane.xlu0 %3517  ;;  %v3651_v1 = vld [vmem:[%s10715_s5 + $0x190] sm:$0xff]  ;;  %v3652_v45 = vld [vmem:[%s10715_s5 + $0x198] sm:$0xff] }
 0x9a5   : > { %v7080_v38 = vpop.eup %7079  ;;  %v3554_v26 = vadd.f32 1e-08, %v3538_v62  ;;  %v3539_v13 = vmul.f32 0.0078125, %v3518_v42  ;;  %v5775_v2 = vcombine.low %v3644_v59, %v3648_v12 }
 0x9a6   : > { %4060 = vmatmul.mubr.bf16.vlgmr.msra.gmra.mrb[96].mxu1 %v9371_v31  ;;  %4173 = vmatmul.mubr.bf16.vlgmr.msra.gmra.mrb[112].mxu0 %v9371_v31  ;;  %v7082_v43 = vpop.eup %7081  ;;  %v3580_v7 = vmul.f32 %v7080_v38, %v9209_v24  ;;  %v3520_v28 = vpop.xlane.xlu1 %3519  ;;  %v3647_v38 = vld [vmem:[%s10715_s5 + $0x170] sm:$0xff] }
 0x9a7   : > { %4254 = vmatpush1.bf16.msra.mxu1 %v5733_v44  ;;  %4069 = vmatprep.mubr.bf16.mxu1 %v10818_v9  ;;  %v3579_v44 = vmul.f32 %v7082_v43, %v9201_v36  ;;  %7091 = vrsqrt.f32 %v3554_v26  ;;  %v3540_v61 = vmul.f32 0.0078125, %v3520_v28  ;;  %v5765_v43 = vcombine.low %v3635_v0, %v3639_v33  ;;  %v3664_v0 = vld [vmem:[%s10715_s5 + $0x1f8] sm:$0xff] }
 0x9a8   : > { %4182 = vmatprep.mubr.bf16.mxu0 %v10818_v9  ;;  %4255 = vmatprep.subr.bf16.mxu1 %v5742_v8  ;;  %v3643_v8 = vld [vmem:[%s10715_s5 + $0x150] sm:$0xff]  ;;  %7093 = vrsqrt.f32 %v3553_v19 }
 0x9a9   : > { %4367 = vmatpush1.bf16.msra.mxu0 %v5735_v14  ;;  %v3631_v14 = vld [vmem:[%s10715_s5 + $0xf0] sm:$0xff]  ;;  %v9406_v5 = vpack.c.bf16 %v3580_v7, %v3579_v44  ;;  %v7084_v4 = vpop.eup %7083  ;;  %v5774_v7 = vcombine.high %v3643_v8, %v3647_v38  ;;  %v3556_v49 = vadd.f32 1e-08, %v3540_v61 }
 0x9aa   : > { %4368 = vmatprep.subr.bf16.mxu0 %v5744_v63  ;;  %v5758_v27 = vcombine.high %v3627_v11, %v3631_v14  ;;  %v7086_v55 = vpop.eup %7085  ;;  %v3582_v40 = vmul.f32 %v7084_v4, %v9224_v21  ;;  %v5757_v15 = vcombine.low %v3627_v11, %v3631_v14  ;;  %v5773_v11 = vcombine.low %v3643_v8, %v3647_v38  ;;  %v3659_v4 = vld [vmem:[%s10715_s5 + $0x1d0] sm:$0xff] }
 0x9ab   : > { %4256 = vmatpush1.bf16.msra.mxu1 %v5741_v3  ;;  %v3581_v54 = vmul.f32 %v7086_v55, %v9216_v18  ;;  %v3555_v14 = vadd.f32 1e-08, %v3539_v13  ;;  %7095 = vrsqrt.f32 %v3556_v49 }
 0x9ac   : > { %4257 = vmatprep.subr.bf16.mxu1 %v5750_v10  ;;  %v5767_v10 = vcombine.low %v3636_v16, %v3640_v50 }
 0x9ad   : > { %4369 = vmatpush1.bf16.msra.mxu0 %v5743_v35  ;;  %v9438_v63 = vpack.c.bf16 %v3582_v40, %v3581_v54  ;;  %v7088_v3 = vpop.eup %7087  ;;  %v3655_v35 = vld [vmem:[%s10715_s5 + $0x1b0] sm:$0xff]  ;;  %7097 = vrsqrt.f32 %v3555_v14  ;;  %v5789_v54 = vcombine.low %v3659_v4, %v3663_v20 }
 0x9ae   : > { %4070 = vmatmul.mubr.bf16.gmra.mrb[100].mxu1 %v9406_v5  ;;  %4183 = vmatmul.mubr.bf16.gmra.mrb[116].mxu0 %v9406_v5  ;;  %v7090_v17 = vpop.eup %7089  ;;  %v3584_v44 = vmul.f32 %v7088_v3, %v9229_v46  ;;  %v5782_v62 = vcombine.high %v3651_v1, %v3655_v35 }
 0x9af   : > { %4079 = vmatprep.mubr.bf16.mxu1 %v10818_v9  ;;  %4192 = vmatprep.mubr.bf16.mxu0 %v10818_v9 }
 0x9b0   : > { %4258 = vmatpush1.bf16.msra.mxu1 %v5749_v37  ;;  %4370 = vmatprep.subr.bf16.mxu0 %v5752_v22  ;;  %v3656_v37 = vld [vmem:[%s10715_s5 + $0x1b8] sm:$0xff]  ;;  %v3583_v22 = vmul.f32 %v7090_v17, %v9221_v32 }
 0x9b1   : > { %4259 = vmatprep.subr.bf16.mxu1 %v5758_v27  ;;  %4371 = vmatpush1.bf16.msra.mxu0 %v5751_v57  ;;  %v3660_v57 = vld [vmem:[%s10715_s5 + $0x1d8] sm:$0xff]  ;;  %v5784_v55 = vcombine.high %v3652_v45, %v3656_v37  ;;  %v7092_v26 = vpop.eup %7091  ;;  %v5783_v19 = vcombine.low %v3652_v45, %v3656_v37 }
 0x9b2   : > { %4372 = vmatprep.subr.bf16.mxu0 %v5760_v53  ;;  %v9470_v33 = vpack.c.bf16 %v3584_v44, %v3583_v22  ;;  %v5781_v53 = vcombine.low %v3651_v1, %v3655_v35  ;;  %v7094_v16 = vpop.eup %7093  ;;  %v3586_v42 = vmul.f32 %v7092_v26, %v9253_v29  ;;  %v5791_v61 = vcombine.low %v3660_v57, %v3664_v0  ;;  %v6765_v26 = vld [vmem:[%s10717_s7 + $0x20] sm:$0xff]  }
 0x9b3   : > { %v3585_v12 = vmul.f32 %v7094_v16, %v9236_v60  ;;  %v6776_v16 = vld [vmem:[%s10717_s7 + $0xe0] sm:$0xff]  }
 0x9b4   : > { %4260 = vmatpush1.bf16.msra.mxu1 %v5757_v15  ;;  %v5790_v15 = vcombine.high %v3659_v4, %v3663_v20  ;;  %v6759_v20 = vld [vmem:[%s10717_s7 + $0x50] sm:$0xff]  }
 0x9b5   : > { %4261 = vmatprep.subr.bf16.mxu1 %v5766_v6  ;;  %4373 = vmatpush1.bf16.msra.mxu0 %v5759_v51  ;;  %v5792_v51 = vcombine.high %v3660_v57, %v3664_v0  ;;  %v7096_v3 = vpop.eup %7095  ;;  %v6761_v57 = vld [vmem:[%s10717_s7 + $0x58] sm:$0xff]   ;;  %v6764_v0 = vld [vmem:[%s10717_s7 + $0xc0] sm:$0xff]  }
 0x9b6   : > { %4080 = vmatmul.mubr.bf16.gmra.mrb[104].mxu1 %v9438_v63  ;;  %4193 = vmatmul.mubr.bf16.gmra.mrb[120].mxu0 %v9438_v63  ;;  %v3588_v1 = vmul.f32 %v7096_v3, %v9261_v56 }
 0x9b7   : > { %4089 = vmatprep.mubr.bf16.mxu1 %v10818_v9  ;;  %4202 = vmatprep.mubr.bf16.mxu0 %v10818_v9 }
 0x9b8   : > { %4262 = vmatpush1.bf16.msra.mxu1 %v5765_v43  ;;  %4374 = vmatprep.subr.bf16.mxu0 %v5768_v48  ;;  %v3597_v48 = vpack.c.bf16 %v3586_v42, %v3585_v12  ;;  %v6769_v42 = vld [vmem:[%s10717_s7 + $0x68] sm:$0xff]   ;;  %v6782_v12 = vld [vmem:[%s10717_s7 + $0xf0] sm:$0xff]  }
 0x9b9   : > { %4263 = vmatprep.subr.bf16.mxu1 %v5774_v7  ;;  %4375 = vmatpush1.bf16.msra.mxu0 %v5767_v10  ;;  %v7098_v7 = vpop.eup %7097 }
 0x9ba   : > { %4376 = vmatprep.subr.bf16.mxu0 %v5776_v41  ;;  %v3587_v41 = vmul.f32 %v7098_v7, %v9250_v34  ;;  %v6783_v7 = vld [vmem:[%s10717_s7 + $0x38] sm:$0xff]  }
 0x9bb   : > { %v3522_v27 = vpop.xlane.xlu0 %3521 }
 0x9bc   : > { %4264 = vmatpush1.bf16.msra.mxu1 %v5773_v11  ;;  %v3541_v28 = vmul.f32 0.0078125, %v3522_v27  ;;  %v3598_v17 = vpack.c.bf16 %v3588_v1, %v3587_v41  ;;  %v6760_v27 = vld [vmem:[%s10717_s7 + $0x10] sm:$0xff]  }
 0x9bd   : > { %v3524_v40 = vpop.xlane.xlu1 %3523  ;;  %4265 = vmatprep.subr.bf16.mxu1 %v5782_v62  ;;  %4377 = vmatpush1.bf16.msra.mxu0 %v5775_v2 }
 0x9be   : > { %v3542_v6 = vmul.f32 0.0078125, %v3524_v40  ;;  %4090 = vmatmul.mubr.bf16.gmra.mrb[108].mxu1 %v9470_v33  ;;  %4203 = vmatmul.mubr.bf16.gmra.mrb[124].mxu0 %v9470_v33  ;;  %v3557_v8 = vadd.f32 1e-08, %v3541_v28  ;;  %v9556_v28 = vld [vmem:[%s10717_s7 + $0xc8] sm:$0xff]  }
 0x9bf   : > { %4099 = vmatprep.mubr.bf16.mxu1 %v10818_v9  ;;  %4212 = vmatprep.mubr.bf16.mxu0 %v10818_v9  ;;  %v3526_v59 = vpop.xlane.xlu0 %3525  ;;  %10848 = vst [vmem:[#allocation25_spill] sm:$0xff] %v9556_v28  ;;  %v9561_v40 = vld [vmem:[%s10717_s7 + $0x88] sm:$0xff]  }
 0x9c0   : > { %v3558_v50 = vadd.f32 1e-08, %v3542_v6  ;;  %4266 = vmatpush1.bf16.msra.mxu1 %v5781_v53  ;;  %4378 = vmatprep.subr.bf16.mxu0 %v5784_v55  ;;  %v3543_v13 = vmul.f32 0.0078125, %v3526_v59  ;;  %v6762_v53 = vld [vmem:[%s10717_s7 + $0x18] sm:$0xff]   ;;  %v6763_v55 = vld [vmem:[%s10717_s7 + $0x60] sm:$0xff]   ;;  %10849 = vst [vmem:[#allocation26_spill] sm:$0xff] %v9561_v40 }
 0x9c1   : > { %v3528_v38 = vpop.xlane.xlu1 %3527  ;;  %4267 = vmatprep.subr.bf16.mxu1 %v5790_v15  ;;  %4379 = vmatpush1.bf16.msra.mxu0 %v5783_v19  ;;  %v9568_v15 = vld [vmem:[%s10717_s7 + $0xd0] sm:$0xff]   ;;  %v9580_v6 = vld [vmem:[%s10717_s7 + $0xd8] sm:$0xff]   ;;  %v6780_v59 = vld [vmem:[%s10717_s7 + $0xa8] sm:$0xff]  }
 0x9c2   : > { %4380 = vmatprep.subr.bf16.mxu0 %v5792_v51  ;;  %7099 = vrsqrt.f32 %v3558_v50  ;;  %v3544_v43 = vmul.f32 0.0078125, %v3528_v38  ;;  %v3559_v35 = vadd.f32 1e-08, %v3543_v13  ;;  %10850 = vst [vmem:[#allocation27_spill] sm:$0xff] %v9568_v15  ;;  %v9573_v19 = vld [vmem:[%s10717_s7 + $0x90] sm:$0xff]   ;;  %10852 = vst [vmem:[#allocation29_spill] sm:$0xff] %v9580_v6 }
 0x9c3   : > { %7101 = vrsqrt.f32 %v3557_v8  ;;  %10851 = vst [vmem:[#allocation28_spill] sm:$0xff] %v9573_v19  ;;  %v6774_v51 = vld [vmem:[%s10717_s7 + $0x98] sm:$0xff]   ;;  %v6778_v50 = vld [vmem:[%s10717_s7 + $0xa0] sm:$0xff]   ;;  %v6775_v8 = vld [vmem:[%s10717_s7 + $0x70] sm:$0xff]  }
 0x9c4   : > { %4268 = vmatpush1.bf16.msra.mxu1 %v5789_v54  ;;  %v3560_v10 = vadd.f32 1e-08, %v3544_v43  ;;  %v6771_v54 = vld [vmem:[%s10717_s7 + $0x28] sm:$0xff]   ;;  %v6777_v38 = vld [vmem:[%s10717_s7 + $0x30] sm:$0xff]  }
 0x9c5   : > { %4381 = vmatpush1.bf16.msra.mxu0 %v5791_v61  ;;  %v6779_v61 = vld [vmem:[%s10717_s7 + $0xe8] sm:$0xff]   ;;  %v6784_v43 = vld [vmem:[%s10717_s7 + $0xb0] sm:$0xff]  }
 0x9c6   : > { %4100 = vmatmul.mubr.bf16.gmra.mrb[112].mxu1 %v3597_v48  ;;  %4213 = vmatmul.mubr.bf16.gmra.mrb[128].mxu0 %v3597_v48  ;;  %7103 = vrsqrt.f32 %v3560_v10 }
 0x9c7   : > { %4109 = vmatprep.mubr.bf16.mxu1 %v10818_v9  ;;  %4222 = vmatprep.mubr.bf16.mxu0 %v10818_v9  ;;  %7105 = vrsqrt.f32 %v3559_v35 }
 0x9c8   : > { %6129 = vmatprep.subr.bf16.mxu0 %v6764_v0 }
 0x9cc   : > { %v7100_v49 = vpop.eup %7099 }
 0x9cd   : > { %v7102_v44 = vpop.eup %7101  ;;  %v3590_v11 = vmul.f32 %v7100_v49, %v9338_v39  ;;  %v3673_v39 = vsub.s32 1, %v8175_v30 }
 0x9ce   : > { %4110 = vmatmul.mubr.bf16.gmra.mrb[116].mxu1 %v3598_v17  ;;  %4223 = vmatmul.mubr.bf16.gmra.mrb[132].mxu0 %v3598_v17  ;;  %v3589_v14 = vmul.f32 %v7102_v44, %v9328_v23  ;;  %v3681_v23 = vsub.s32 3, %v8175_v30 }
 0x9cf   : > { %4119 = vmatprep.mubr.bf16.mxu1 %v10818_v9  ;;  %4232 = vmatprep.mubr.bf16.mxu0 %v10818_v9 }
 0x9d0   : > { %v3599_v62 = vpack.c.bf16 %v3590_v11, %v3589_v14  ;;  %v7104_v2 = vpop.eup %7103 }
 0x9d1   : > { %v7106_v45 = vpop.eup %7105  ;;  %v3592_v37 = vmul.f32 %v7104_v2, %v9343_v52 }
 0x9d2   : > { %v3591_v22 = vmul.f32 %v7106_v45, %v9335_v58  ;;  %v3665_v58 = vld [vmem:[%s10716_s6] sm:$0xff] }
 0x9d3   : > { %v9719_v29 = vrot.slane %v3665_v58, %v3673_v39  ;;  %v9721_v60 = vrot.slane %v3665_v58, %v3681_v23 }
 0x9d4   : > { %v3600_v4 = vpack.c.bf16 %v3592_v37, %v3591_v22 }
 0x9d6   : > { %4120 = vmatmul.mubr.bf16.gmra.mrb[120].mxu1 %v3599_v62  ;;  %4233 = vmatmul.mubr.bf16.gmra.mrb[136].mxu0 %v3599_v62 }
 0x9d7   : > { %4129 = vmatprep.mubr.bf16.mxu1 %v10818_v9  ;;  %4242 = vmatprep.mubr.bf16.mxu0 %v10818_v9 }
 0x9de   : > { %4130 = vmatmul.mubr.bf16.gmra.mrb[124].mxu1 %v3600_v4  ;;  %4243 = vmatmul.mubr.bf16.gmra.mrb[140].mxu0 %v3600_v4 }
 0x9df   : > { %4285 = vmatprep.mubr.bf16.mxu1 %v10818_v9  ;;  %4398 = vmatprep.mubr.bf16.mxu0 %v10818_v9 }
 0x9e6   : > { %4286 = vmatmul.mubr.bf16.vlgmr.msra.gmra.mrb[128].mxu1 %v9371_v31  ;;  %4399 = vmatmul.mubr.bf16.vlgmr.msra.gmra.mrb[144].mxu0 %v9371_v31  ;;  %v6755_v31 = vld [vmem:[%s10717_s7 + $0x40] sm:$0xff]  }
 0x9e7   : > { %4295 = vmatprep.mubr.bf16.mxu1 %v10818_v9  ;;  %4408 = vmatprep.mubr.bf16.mxu0 %v10818_v9 }
 0x9e8   : > { %6065 = vmatprep.subr.bf16.mxu1 %v6755_v31  ;;  %v6786_v31 = vld [vmem:[%s10717_s7 + $0xb8] sm:$0xff]  }
 0x9ee   : > { %4296 = vmatmul.mubr.bf16.gmra.mrb[132].mxu1 %v9406_v5  ;;  %4409 = vmatmul.mubr.bf16.gmra.mrb[148].mxu0 %v9406_v5  ;;  %v6756_v5 = vld [vmem:[%s10717_s7] sm:$0xff]  }
 0x9ef   : > { %4305 = vmatprep.mubr.bf16.mxu1 %v10818_v9  ;;  %4418 = vmatprep.mubr.bf16.mxu0 %v10818_v9 }
 0x9f0   : > { %6066 = vmatpush3.bf16.msra.mxu1 %v6756_v5 }
 0x9f6   : > { %4306 = vmatmul.mubr.bf16.gmra.mrb[136].mxu1 %v9438_v63  ;;  %4419 = vmatmul.mubr.bf16.gmra.mrb[152].mxu0 %v9438_v63  ;;  %v6757_v63 = vld [vmem:[%s10717_s7 + $0x48] sm:$0xff]  }
 0x9f7   : > { %4315 = vmatprep.mubr.bf16.mxu1 %v10818_v9  ;;  %4428 = vmatprep.mubr.bf16.mxu0 %v10818_v9 }
 0x9f8   : > { %6067 = vmatprep.subr.bf16.mxu1 %v6757_v63 }
 0x9fe   : > { %4316 = vmatmul.mubr.bf16.gmra.mrb[140].mxu1 %v9470_v33  ;;  %4429 = vmatmul.mubr.bf16.gmra.mrb[156].mxu0 %v9470_v33  ;;  %v9541_v33 = vld [vmem:[%s10717_s7 + $0x80] sm:$0xff]  }
 0x9ff   : > { %4325 = vmatprep.mubr.bf16.mxu1 %v10818_v9  ;;  %4438 = vmatprep.mubr.bf16.mxu0 %v10818_v9  ;;  %10847 = vst [vmem:[#allocation24_spill] sm:$0xff] %v9541_v33 }
 0xa00   : > { %6130 = vmatpush3.bf16.msra.mxu0 %v9541_v33 }
 0xa01   : > { %6131 = vmatprep.subr.bf16.mxu0 %v9556_v28 }
 0xa04   : > { %6132 = vmatpush3.bf16.msra.mxu0 %v9561_v40 }
 0xa05   : > { %6133 = vmatprep.subr.bf16.mxu0 %v9568_v15 }
 0xa06   : > { %4326 = vmatmul.mubr.bf16.gmra.mrb[144].mxu1 %v3597_v48  ;;  %4439 = vmatmul.mubr.bf16.gmra.mrb[160].mxu0 %v3597_v48  ;;  %v6781_v48 = vld [vmem:[%s10717_s7 + $0x78] sm:$0xff]  }
 0xa07   : > { %4335 = vmatprep.mubr.bf16.mxu1 %v10818_v9  ;;  %4448 = vmatprep.mubr.bf16.mxu0 %v10818_v9 }
 0xa08   : > { %6134 = vmatpush3.bf16.msra.mxu0 %v9573_v19 }
 0xa09   : > { %6135 = vmatprep.subr.bf16.mxu0 %v9580_v6 }
 0xa0c   : > { %6136 = vmatpush3.bf16.msra.mxu0 %v6774_v51 }
 0xa0d   : > { %6137 = vmatprep.subr.bf16.mxu0 %v6776_v16 }
 0xa0e   : > { %4336 = vmatmul.mubr.bf16.gmra.mrb[148].mxu1 %v3598_v17  ;;  %4449 = vmatmul.mubr.bf16.gmra.mrb[164].mxu0 %v3598_v17 }
 0xa0f   : > { %4345 = vmatprep.mubr.bf16.mxu1 %v10818_v9  ;;  %4458 = vmatprep.mubr.bf16.mxu0 %v10818_v9 }
 0xa10   : > { %6138 = vmatpush3.bf16.msra.mxu0 %v6778_v50 }
 0xa11   : > { %6139 = vmatprep.subr.bf16.mxu0 %v6779_v61 }
 0xa14   : > { %6140 = vmatpush3.bf16.msra.mxu0 %v6780_v59 }
 0xa15   : > { %6141 = vmatprep.subr.bf16.mxu0 %v6782_v12 }
 0xa16   : > { %4346 = vmatmul.mubr.bf16.gmra.mrb[152].mxu1 %v3599_v62  ;;  %4459 = vmatmul.mubr.bf16.gmra.mrb[168].mxu0 %v3599_v62 }
 0xa17   : > { %4355 = vmatprep.mubr.bf16.mxu1 %v10818_v9  ;;  %4468 = vmatprep.mubr.bf16.mxu0 %v10818_v9  ;;  %v6758_v9 = vld [vmem:[%s10717_s7 + $0x8] sm:$0xff]  }
 0xa18   : > { %6068 = vmatpush3.bf16.msra.mxu1 %v6758_v9  ;;  %6142 = vmatpush3.bf16.msra.mxu0 %v6784_v43 }
 0xa19   : > { %6069 = vmatprep.subr.bf16.mxu1 %v6759_v20 }
 0xa1c   : > { %6070 = vmatpush3.bf16.msra.mxu1 %v6760_v27 }
 0xa1d   : > { %6071 = vmatprep.subr.bf16.mxu1 %v6761_v57 }
 0xa1e   : > { %4356 = vmatmul.mubr.bf16.gmra.mrb[156].mxu1 %v3600_v4  ;;  %4469 = vmatmul.mubr.bf16.gmra.mrb[172].mxu0 %v3600_v4  ;;  %v6785_v4 = vld [vmem:[%s10717_s7 + $0xf8] sm:$0xff]  }
 0xa1f   : > { %6143 = vmatprep.subr.bf16.mxu0 %v6785_v4  ;;  %v3677_v4 = vsub.s32 2, %v8175_v30 }
 0xa20   : > { %6072 = vmatpush3.bf16.msra.mxu1 %v6762_v53  ;;  %6144 = vmatpush3.bf16.msra.mxu0 %v6786_v31 }
 0xa21   : > { %6073 = vmatprep.subr.bf16.mxu1 %v6763_v55  ;;  %v9717_v34 = vrot.slane %v3665_v58, %v3677_v4 }
 0xa24   : > { %6074 = vmatpush3.bf16.msra.mxu1 %v6765_v26 }
 0xa25   : > { %6075 = vmatprep.subr.bf16.mxu1 %v6769_v42 }
 0xa28   : > { %6076 = vmatpush3.bf16.msra.mxu1 %v6771_v54 }
 0xa29   : > { %6077 = vmatprep.subr.bf16.mxu1 %v6775_v8 }
 0xa2c   : > { %6078 = vmatpush3.bf16.msra.mxu1 %v6777_v38 }
 0xa2d   : > { %6079 = vmatprep.subr.bf16.mxu1 %v6781_v48 }
 0xa30   : > { %6080 = vmatpush3.bf16.msra.mxu1 %v6783_v7  ;;  %v3669_v7 = vsub.s32 0, %v8175_v30 }
 0xa31   : > { %6529 = vmatprep.subr.bf16.mxu1 %v6764_v0 }
 0xa32   : > { %v9715_v56 = vrot.slane %v3665_v58, %v3669_v7 }
 0xa79   : > { %v9619_v3 = vpop.f32.mrb[96].mxu1  ;;  %v9621_v13 = vpop.f32.mrb[112].mxu0 }
 0xa7a   : > { %v9626_v10 = vpop.f32.mrb[97].mxu1  ;;  %v9628_v1 = vpop.f32.mrb[113].mxu0 }
 0xa7b   : > { %v9630_v35 = vpop.f32.mrb[98].mxu1  ;;  %v9632_v41 = vpop.f32.mrb[114].mxu0 }
 0xa7c   : > { %v9634_v17 = vpop.f32.mrb[99].mxu1  ;;  %v9636_v49 = vpop.f32.mrb[115].mxu0 }
 0xa81   : > { %v9638_v44 = vpop.f32.mrb[100].mxu1  ;;  %v9640_v11 = vpop.f32.mrb[116].mxu0 }
 0xa82   : > { %v9642_v14 = vpop.f32.mrb[101].mxu1  ;;  %v9644_v62 = vpop.f32.mrb[117].mxu0 }
 0xa83   : > { %v9646_v2 = vpop.f32.mrb[102].mxu1  ;;  %v9648_v45 = vpop.f32.mrb[118].mxu0 }
 0xa84   : > { %v9650_v37 = vpop.f32.mrb[103].mxu1  ;;  %v9652_v22 = vpop.f32.mrb[119].mxu0 }
 0xa89   : > { %v9660_v5 = vpop.f32.mrb[104].mxu1  ;;  %v9662_v63 = vpop.f32.mrb[120].mxu0 }
 0xa8a   : > { %v9664_v9 = vpop.f32.mrb[105].mxu1  ;;  %v9666_v20 = vpop.f32.mrb[121].mxu0 }
 0xa8b   : > { %v9668_v27 = vpop.f32.mrb[106].mxu1  ;;  %v9670_v57 = vpop.f32.mrb[122].mxu0 }
 0xa8c   : > { %v9672_v0 = vpop.f32.mrb[107].mxu1  ;;  %v9674_v53 = vpop.f32.mrb[123].mxu0 }
 0xa91   : > { %v9676_v55 = vpop.f32.mrb[108].mxu1  ;;  %v9678_v26 = vpop.f32.mrb[124].mxu0 }
 0xa92   : > { %v9680_v51 = vpop.f32.mrb[109].mxu1  ;;  %v9682_v16 = vpop.f32.mrb[125].mxu0 }
 0xa93   : > { %v9684_v50 = vpop.f32.mrb[110].mxu1  ;;  %v9686_v42 = vpop.f32.mrb[126].mxu0 }
 0xa94   : > { %10853 = vst [vmem:[#allocation30_spill] sm:$0xff] %v9684_v50  ;;  %10854 = vst [vmem:[#allocation31_spill] sm:$0xff] %v9686_v42  ;;  %v9688_v54 = vpop.f32.mrb[111].mxu1  ;;  %v9690_v8 = vpop.f32.mrb[127].mxu0 }
 0xa95   : > { %10855 = vst [vmem:[#allocation32_spill] sm:$0xff] %v9688_v54  ;;  %10856 = vst [vmem:[#allocation33_spill] sm:$0xff] %v9690_v8  ;;  %v9888_v8 = vadd.f32 %v9636_v49, %v9721_v60  ;;  %v9901_v54 = vadd.f32 %v9642_v14, %v9719_v29  ;;  %v9905_v49 = vadd.f32 %v9644_v62, %v9721_v60 }
 0xa96   : > { %v9917_v14 = vadd.f32 %v9650_v37, %v9719_v29 }
 0xa98   : > { %10891 = vst [vmem:[#allocation68_spill] sm:$0xff] %v9917_v14 }
 0xa99   : > { %v9692_v38 = vpop.f32.mrb[112].mxu1  ;;  %v9694_v61 = vpop.f32.mrb[128].mxu0 }
 0xa9a   : > { %10857 = vst [vmem:[#allocation34_spill] sm:$0xff] %v9692_v38  ;;  %10858 = vst [vmem:[#allocation35_spill] sm:$0xff] %v9694_v61  ;;  %v9696_v59 = vpop.f32.mrb[113].mxu1  ;;  %v9698_v12 = vpop.f32.mrb[129].mxu0 }
 0xa9b   : > { %10859 = vst [vmem:[#allocation36_spill] sm:$0xff] %v9696_v59  ;;  %10860 = vst [vmem:[#allocation37_spill] sm:$0xff] %v9698_v12  ;;  %v9700_v43 = vpop.f32.mrb[114].mxu1  ;;  %v9702_v48 = vpop.f32.mrb[130].mxu0 }
 0xa9c   : > { %10861 = vst [vmem:[#allocation38_spill] sm:$0xff] %v9700_v43  ;;  %10862 = vst [vmem:[#allocation39_spill] sm:$0xff] %v9702_v48  ;;  %v9706_v31 = vpop.f32.mrb[115].mxu1  ;;  %v9708_v52 = vpop.f32.mrb[131].mxu0 }
 0xa9d   : > { %10863 = vst [vmem:[#allocation40_spill] sm:$0xff] %v9706_v31  ;;  %10864 = vst [vmem:[#allocation41_spill] sm:$0xff] %v9708_v52 }
 0xaa1   : > { %v4111_v46 = vpop.f32.mrb[116].mxu1  ;;  %v4224_v32 = vpop.f32.mrb[132].mxu0 }
 0xaa2   : > { %v9724_v21 = vadd.f32 %v4111_v46, %v9715_v56  ;;  %v9727_v18 = vadd.f32 %v4224_v32, %v9717_v34  ;;  %v4113_v24 = vpop.f32.mrb[117].mxu1  ;;  %v4226_v36 = vpop.f32.mrb[133].mxu0 }
 0xaa3   : > { %v9730_v25 = vadd.f32 %v4113_v24, %v9719_v29  ;;  %v9733_v7 = vadd.f32 %v4226_v36, %v9721_v60  ;;  %v4115_v39 = vpop.f32.mrb[118].mxu1  ;;  %v4228_v4 = vpop.f32.mrb[134].mxu0 }
 0xaa4   : > { %10865 = vst [vmem:[#allocation42_spill] sm:$0xff] %v9724_v21  ;;  %10866 = vst [vmem:[#allocation43_spill] sm:$0xff] %v9727_v18  ;;  %v9736_v23 = vadd.f32 %v4115_v39, %v9715_v56  ;;  %v9739_v47 = vadd.f32 %v4228_v4, %v9717_v34  ;;  %v4117_v46 = vpop.f32.mrb[119].mxu1  ;;  %v4230_v21 = vpop.f32.mrb[135].mxu0 }
 0xaa5   : > { %10867 = vst [vmem:[#allocation44_spill] sm:$0xff] %v9730_v25  ;;  %10868 = vst [vmem:[#allocation45_spill] sm:$0xff] %v9733_v7  ;;  %v9742_v32 = vadd.f32 %v4117_v46, %v9719_v29  ;;  %v9745_v18 = vadd.f32 %v4230_v21, %v9721_v60 }
 0xaa6   : > { %10869 = vst [vmem:[#allocation46_spill] sm:$0xff] %v9736_v23  ;;  %10870 = vst [vmem:[#allocation47_spill] sm:$0xff] %v9739_v47 }
 0xaa7   : > { %10871 = vst [vmem:[#allocation48_spill] sm:$0xff] %v9742_v32  ;;  %10872 = vst [vmem:[#allocation49_spill] sm:$0xff] %v9745_v18 }
 0xaa9   : > { %v4121_v24 = vpop.f32.mrb[120].mxu1  ;;  %v4234_v25 = vpop.f32.mrb[136].mxu0 }
 0xaaa   : > { %v9748_v36 = vadd.f32 %v4121_v24, %v9715_v56  ;;  %v9751_v7 = vadd.f32 %v4234_v25, %v9717_v34  ;;  %v4123_v39 = vpop.f32.mrb[121].mxu1  ;;  %v4236_v23 = vpop.f32.mrb[137].mxu0 }
 0xaab   : > { %v9754_v4 = vadd.f32 %v4123_v39, %v9719_v29  ;;  %v9757_v47 = vadd.f32 %v4236_v23, %v9721_v60  ;;  %v4125_v46 = vpop.f32.mrb[122].mxu1  ;;  %v4238_v32 = vpop.f32.mrb[138].mxu0 }
 0xaac   : > { %10873 = vst [vmem:[#allocation50_spill] sm:$0xff] %v9748_v36  ;;  %10874 = vst [vmem:[#allocation51_spill] sm:$0xff] %v9751_v7  ;;  %v9760_v21 = vadd.f32 %v4125_v46, %v9715_v56  ;;  %v9763_v18 = vadd.f32 %v4238_v32, %v9717_v34  ;;  %v4127_v24 = vpop.f32.mrb[123].mxu1  ;;  %v4240_v36 = vpop.f32.mrb[139].mxu0  ;;  %v3685_v32 = vsub.s32 4, %v8175_v30 }
 0xaad   : > { %10875 = vst [vmem:[#allocation52_spill] sm:$0xff] %v9754_v4  ;;  %10876 = vst [vmem:[#allocation53_spill] sm:$0xff] %v9757_v47  ;;  %v9766_v25 = vadd.f32 %v4127_v24, %v9719_v29  ;;  %v9769_v7 = vadd.f32 %v4240_v36, %v9721_v60 }
 0xaae   : > { %10877 = vst [vmem:[#allocation54_spill] sm:$0xff] %v9760_v21  ;;  %10878 = vst [vmem:[#allocation55_spill] sm:$0xff] %v9763_v18  ;;  %v3693_v18 = vsub.s32 6, %v8175_v30 }
 0xaaf   : > { %10879 = vst [vmem:[#allocation56_spill] sm:$0xff] %v9766_v25  ;;  %10880 = vst [vmem:[#allocation57_spill] sm:$0xff] %v9769_v7 }
 0xab1   : > { %v4131_v39 = vpop.f32.mrb[124].mxu1  ;;  %v4244_v4 = vpop.f32.mrb[140].mxu0 }
 0xab2   : > { %v9772_v23 = vadd.f32 %v4131_v39, %v9715_v56  ;;  %v9775_v47 = vadd.f32 %v4244_v4, %v9717_v34  ;;  %v4133_v46 = vpop.f32.mrb[125].mxu1  ;;  %v4246_v21 = vpop.f32.mrb[141].mxu0  ;;  %v3689_v39 = vsub.s32 5, %v8175_v30 }
 0xab3   : > { %v9780_v24 = vadd.f32 %v4133_v46, %v9719_v29  ;;  %v9783_v36 = vadd.f32 %v4246_v21, %v9721_v60  ;;  %v4135_v7 = vpop.f32.mrb[126].mxu1  ;;  %v4248_v25 = vpop.f32.mrb[142].mxu0 }
 0xab4   : > { %10881 = vst [vmem:[#allocation58_spill] sm:$0xff] %v9772_v23  ;;  %10882 = vst [vmem:[#allocation59_spill] sm:$0xff] %v9775_v47  ;;  %v3697_v23 = vsub.s32 7, %v8175_v30  ;;  %v9788_v4 = vadd.f32 %v4135_v7, %v9715_v56  ;;  %v9791_v47 = vadd.f32 %v4248_v25, %v9717_v34  ;;  %v4137_v52 = vpop.f32.mrb[127].mxu1  ;;  %v4250_v31 = vpop.f32.mrb[143].mxu0  ;;  %v9803_v48 = vrot.slane %v3665_v58, %v3689_v39 }
 0xab5   : > { %10883 = vst [vmem:[#allocation60_spill] sm:$0xff] %v9780_v24  ;;  %10884 = vst [vmem:[#allocation61_spill] sm:$0xff] %v9783_v36  ;;  %v9794_v46 = vadd.f32 %v4137_v52, %v9719_v29  ;;  %v9797_v21 = vadd.f32 %v4250_v31, %v9721_v60  ;;  %v9799_v36 = vrot.slane %v3665_v58, %v3685_v32 }
 0xab6   : > { %10885 = vst [vmem:[#allocation62_spill] sm:$0xff] %v9788_v4  ;;  %10886 = vst [vmem:[#allocation63_spill] sm:$0xff] %v9791_v47  ;;  %v9801_v24 = vrot.slane %v3665_v58, %v3693_v18  ;;  %v9805_v30 = vrot.slane %v3665_v58, %v3697_v23 }
 0xab7   : > { %10887 = vst [vmem:[#allocation64_spill] sm:$0xff] %v9794_v46  ;;  %10888 = vst [vmem:[#allocation65_spill] sm:$0xff] %v9797_v21 }
 0xab9   : > { %v4287_v7 = vpop.f32.mrb[128].mxu1  ;;  %v4400_v4 = vpop.f32.mrb[144].mxu0 }
 0xaba   : > { %v9808_v25 = vadd.f32 %v4287_v7, %v9799_v36  ;;  %v9811_v47 = vadd.f32 %v4400_v4, %v9801_v24  ;;  %v4289_v52 = vpop.f32.mrb[129].mxu1  ;;  %v4402_v46 = vpop.f32.mrb[145].mxu0 }
 0xabb   : > { %v9814_v31 = vadd.f32 %v4289_v52, %v9803_v48  ;;  %v9817_v18 = vadd.f32 %v4402_v46, %v9805_v30  ;;  %v4291_v32 = vpop.f32.mrb[130].mxu1  ;;  %v4404_v39 = vpop.f32.mrb[146].mxu0 }
 0xabc   : > { %v5793_v58 = vmul.f32 -1.442695, %v9808_v25  ;;  %v5795_v23 = vmul.f32 -1.442695, %v9811_v47  ;;  %v9822_v7 = vadd.f32 %v4291_v32, %v9799_v36  ;;  %v9825_v4 = vadd.f32 %v4404_v39, %v9801_v24  ;;  %v4293_v21 = vpop.f32.mrb[131].mxu1  ;;  %v4406_v43 = vpop.f32.mrb[147].mxu0 }
 0xabd   : > { %v5794_v52 = vmul.f32 -1.442695, %v9814_v31  ;;  %v5796_v12 = vmul.f32 -1.442695, %v9817_v18  ;;  %v9830_v46 = vadd.f32 %v4293_v21, %v9803_v48  ;;  %v9833_v59 = vadd.f32 %v4406_v43, %v9805_v30 }
 0xabe   : > { %7107 = vpow2.f32 %v5793_v58  ;;  %v5797_v61 = vmul.f32 -1.442695, %v9822_v7  ;;  %v5799_v32 = vmul.f32 -1.442695, %v9825_v4  ;;  %v9839_v39 = vadd.f32 %v9619_v3, %v9715_v56 }
 0xabf   : > { %7109 = vpow2.f32 %v5795_v23  ;;  %v5798_v38 = vmul.f32 -1.442695, %v9830_v46  ;;  %v9844_v21 = vadd.f32 %v9621_v13, %v9717_v34  ;;  %v9848_v43 = vadd.f32 %v9626_v10, %v9719_v29 }
 0xac0   : > { %7111 = vpow2.f32 %v5794_v52  ;;  %v5800_v58 = vmul.f32 -1.442695, %v9833_v59  ;;  %v9853_v3 = vadd.f32 %v9628_v1, %v9721_v60  ;;  %v9863_v10 = vadd.f32 %v9630_v35, %v9715_v56 }
 0xac1   : > { %7113 = vpow2.f32 %v5796_v12  ;;  %v4297_v23 = vpop.f32.mrb[132].mxu1  ;;  %v4410_v6 = vpop.f32.mrb[148].mxu0 }
 0xac2   : > { %7115 = vpow2.f32 %v5797_v61  ;;  %v9856_v52 = vadd.f32 %v4297_v23, %v9799_v36  ;;  %v9859_v13 = vadd.f32 %v4410_v6, %v9801_v24  ;;  %v4299_v19 = vpop.f32.mrb[133].mxu1  ;;  %v4412_v15 = vpop.f32.mrb[149].mxu0 }
 0xac3   : > { %7117 = vpow2.f32 %v5799_v32  ;;  %v9866_v12 = vadd.f32 %v4299_v19, %v9803_v48  ;;  %v9869_v1 = vadd.f32 %v4412_v15, %v9805_v30  ;;  %v4301_v61 = vpop.f32.mrb[134].mxu1  ;;  %v4414_v40 = vpop.f32.mrb[150].mxu0  ;;  %v9878_v32 = vadd.f32 %v9632_v41, %v9717_v34 }
 0xac4   : > { %7119 = vpow2.f32 %v5798_v38  ;;  %v5801_v23 = vmul.f32 -1.442695, %v9856_v52  ;;  %v5803_v6 = vmul.f32 -1.442695, %v9859_v13  ;;  %v9874_v28 = vadd.f32 %v4301_v61, %v9799_v36  ;;  %v4303_v33 = vpop.f32.mrb[135].mxu1  ;;  %v4416_v35 = vpop.f32.mrb[151].mxu0 }
 0xac5   : > { %7121 = vpow2.f32 %v5800_v58  ;;  %v5802_v15 = vmul.f32 -1.442695, %v9866_v12  ;;  %v5804_v19 = vmul.f32 -1.442695, %v9869_v1  ;;  %v9884_v38 = vadd.f32 %v9634_v17, %v9719_v29 }
 0xac6   : > { %7123 = vpow2.f32 %v5801_v23  ;;  %v5805_v61 = vmul.f32 -1.442695, %v9874_v28  ;;  %v9893_v41 = vadd.f32 %v9638_v44, %v9715_v56  ;;  %v9897_v58 = vadd.f32 %v9640_v11, %v9717_v34 }
 0xac7   : > { %7125 = vpow2.f32 %v5803_v6  ;;  %v9909_v23 = vadd.f32 %v9646_v2, %v9715_v56  ;;  %v9913_v44 = vadd.f32 %v9648_v45, %v9717_v34  ;;  %v9921_v6 = vadd.f32 %v9652_v22, %v9721_v60 }
 0xac8   : > { %v7108_v17 = vpop.eup %7107  ;;  %7127 = vpow2.f32 %v5802_v15  ;;  %v9929_v45 = vadd.f32 %v9662_v63, %v9717_v34  ;;  %v9933_v22 = vadd.f32 %v9664_v9, %v9719_v29  ;;  %v9941_v63 = vadd.f32 %v9668_v27, %v9715_v56 }
 0xac9   : > { %10889 = vst [vmem:[#allocation66_spill] sm:$0xff] %v9909_v23  ;;  %10890 = vst [vmem:[#allocation67_spill] sm:$0xff] %v9913_v44  ;;  %v7110_v11 = vpop.eup %7109  ;;  %v4671_v62 = vadd.f32 1.0, %v7108_v17  ;;  %7129 = vpow2.f32 %v5804_v19  ;;  %v4307_v42 = vpop.f32.mrb[136].mxu1  ;;  %v9925_v23 = vadd.f32 %v9660_v5, %v9715_v56  ;;  %v9937_v19 = vadd.f32 %v9666_v20, %v9721_v60 }
 0xaca   : > { %10892 = vst [vmem:[#allocation69_spill] sm:$0xff] %v9921_v6  ;;  %v4420_v50 = vpop.f32.mrb[152].mxu0  ;;  %v7112_v2 = vpop.eup %7111  ;;  %10894 = vst [vmem:[#allocation71_spill] sm:$0xff] %v9929_v45  ;;  %v4673_v15 = vadd.f32 1.0, %v7110_v11  ;;  %7131 = vpow2.f32 %v5805_v61  ;;  %v9944_v11 = vadd.f32 %v4414_v40, %v9801_v24  ;;  %v9948_v20 = vadd.f32 %v9670_v57, %v9717_v34 }
 0xacb   : > { %10893 = vst [vmem:[#allocation70_spill] sm:$0xff] %v9925_v23  ;;  %v4309_v37 = vpop.f32.mrb[137].mxu1  ;;  %v4422_v14 = vpop.f32.mrb[153].mxu0  ;;  %10895 = vst [vmem:[#allocation72_spill] sm:$0xff] %v9933_v22  ;;  %7133 = vrcp.f32 %v4671_v62  ;;  %v4672_v5 = vadd.f32 1.0, %v7112_v2  ;;  %v9952_v62 = vadd.f32 %v9672_v0, %v9719_v29  ;;  %v9963_v57 = vadd.f32 %v9676_v55, %v9715_v56 }
 0xacc   : > { %v7114_v44 = vpop.eup %7113  ;;  %10896 = vst [vmem:[#allocation73_spill] sm:$0xff] %v9937_v19  ;;  %v4311_v17 = vpop.f32.mrb[138].mxu1  ;;  %10897 = vst [vmem:[#allocation74_spill] sm:$0xff] %v9941_v63  ;;  %7135 = vrcp.f32 %v4673_v15  ;;  %v9959_v15 = vadd.f32 %v4303_v33, %v9803_v48  ;;  %v9976_v55 = vadd.f32 %v4309_v37, %v9803_v48 }
 0xacd   : > { %v4424_v23 = vpop.f32.mrb[154].mxu0  ;;  %v7116_v6 = vpop.eup %7115  ;;  %v4674_v61 = vadd.f32 1.0, %v7114_v44  ;;  %10898 = vst [vmem:[#allocation75_spill] sm:$0xff] %v9944_v11  ;;  %10899 = vst [vmem:[#allocation76_spill] sm:$0xff] %v9948_v20  ;;  %7137 = vrcp.f32 %v4672_v5  ;;  %v9956_v44 = vadd.f32 %v9674_v53, %v9721_v60  ;;  %v5807_v53 = vmul.f32 -1.442695, %v9944_v11 }
 0xace   : > { %v4313_v9 = vpop.f32.mrb[139].mxu1  ;;  %v7118_v22 = vpop.eup %7117  ;;  %10900 = vst [vmem:[#allocation77_spill] sm:$0xff] %v9952_v62  ;;  %v4675_v2 = vadd.f32 1.0, %v7116_v6  ;;  %10902 = vst [vmem:[#allocation79_spill] sm:$0xff] %v9959_v15  ;;  %v9966_v6 = vadd.f32 %v4416_v35, %v9805_v30  ;;  %v9986_v37 = vadd.f32 %v4311_v17, %v9799_v36 }
 0xacf   : > { %v4426_v19 = vpop.f32.mrb[155].mxu0  ;;  %v7120_v27 = vpop.eup %7119  ;;  %10901 = vst [vmem:[#allocation78_spill] sm:$0xff] %v9956_v44  ;;  %7139 = vrcp.f32 %v4674_v61  ;;  %v4677_v40 = vadd.f32 1.0, %v7118_v22  ;;  %10903 = vst [vmem:[#allocation80_spill] sm:$0xff] %v9963_v57  ;;  %v9970_v22 = vadd.f32 %v4307_v42, %v9799_v36  ;;  %v9973_v44 = vadd.f32 %v4420_v50, %v9801_v24 }
 0xad0   : > { %v7122_v63 = vpop.eup %7121  ;;  %7141 = vrcp.f32 %v4675_v2  ;;  %v4676_v0 = vadd.f32 1.0, %v7120_v27  ;;  %10904 = vst [vmem:[#allocation81_spill] sm:$0xff] %v9966_v6  ;;  %10907 = vst [vmem:[#allocation84_spill] sm:$0xff] %v9976_v55  ;;  %v5808_v50 = vmul.f32 -1.442695, %v9966_v6 }
 0xad1   : > { %v7124_v5 = vpop.eup %7123  ;;  %7143 = vrcp.f32 %v4677_v40  ;;  %v4678_v62 = vadd.f32 1.0, %v7122_v63  ;;  %10905 = vst [vmem:[#allocation82_spill] sm:$0xff] %v9970_v22  ;;  %10906 = vst [vmem:[#allocation83_spill] sm:$0xff] %v9973_v44  ;;  %v4317_v2 = vpop.f32.mrb[140].mxu1  ;;  %v5806_v63 = vmul.f32 -1.442695, %v9959_v15  ;;  %v9980_v40 = vadd.f32 %v4422_v14, %v9805_v30 }
 0xad2   : > { %v7126_v33 = vpop.eup %7125  ;;  %7145 = vrcp.f32 %v4676_v0  ;;  %v4679_v61 = vadd.f32 1.0, %v7124_v5  ;;  %v4430_v42 = vpop.f32.mrb[156].mxu0  ;;  %v5809_v14 = vmul.f32 -1.442695, %v9970_v22  ;;  %v9994_v15 = vadd.f32 %v4424_v23, %v9801_v24 }
 0xad3   : > { %v7128_v35 = vpop.eup %7127  ;;  %7147 = vrcp.f32 %v4678_v62  ;;  %v4681_v27 = vadd.f32 1.0, %v7126_v33  ;;  %v9982_v57 = vpop.f32.mrb[141].mxu1  ;;  %v5811_v6 = vmul.f32 -1.442695, %v9973_v44  ;;  %v5812_v23 = vmul.f32 -1.442695, %v9980_v40 }
 0xad4   : > { %v7130_v0 = vpop.eup %7129  ;;  %7149 = vrcp.f32 %v4679_v61  ;;  %v4680_v5 = vadd.f32 1.0, %v7128_v35  ;;  %v9988_v20 = vpop.f32.mrb[157].mxu0  ;;  %v10007_v22 = vadd.f32 %v4313_v9, %v9803_v48 }
 0xad5   : > { %10908 = vst [vmem:[#allocation85_spill] sm:$0xff] %v9988_v20  ;;  %v9990_v62 = vpop.f32.mrb[142].mxu1  ;;  %v7132_v33 = vpop.eup %7131  ;;  %7151 = vrcp.f32 %v4681_v27  ;;  %v4682_v45 = vadd.f32 1.0, %v7130_v0  ;;  %v5810_v20 = vmul.f32 -1.442695, %v9976_v55 }
 0xad6   : > { %10909 = vst [vmem:[#allocation86_spill] sm:$0xff] %v9990_v62  ;;  %v9996_v11 = vpop.f32.mrb[158].mxu0  ;;  %v9998_v61 = vpop.f32.mrb[143].mxu1  ;;  %7153 = vrcp.f32 %v4680_v5  ;;  %v4683_v17 = vadd.f32 1.0, %v7132_v33  ;;  %v5813_v5 = vmul.f32 -1.442695, %v9986_v37  ;;  %v10012_v33 = vadd.f32 %v4426_v19, %v9805_v30 }
 0xad7   : > { %10910 = vst [vmem:[#allocation87_spill] sm:$0xff] %v9996_v11  ;;  %10911 = vst [vmem:[#allocation88_spill] sm:$0xff] %v9998_v61  ;;  %v7134_v35 = vpop.eup %7133  ;;  %v10002_v62 = vpop.f32.mrb[159].mxu0  ;;  %7155 = vrcp.f32 %v4682_v45  ;;  %v5815_v45 = vmul.f32 -1.442695, %v9994_v15 }
 0xad8   : > { %v7136_v27 = vpop.eup %7135  ;;  %v4863_v0 = vmul.f32 %v7134_v35, %v9808_v25  ;;  %7157 = vrcp.f32 %v4683_v17  ;;  %v10024_v17 = vadd.f32 %v4317_v2, %v9799_v36 }
 0xad9   : > { %v7138_v11 = vpop.eup %7137  ;;  %v4865_v61 = vmul.f32 %v7136_v27, %v9811_v47  ;;  %7159 = vpow2.f32 %v5807_v53  ;;  %v10026_v19 = vpop.f32.mrb[144].mxu1 }
 0xada   : > { %v7140_v55 = vpop.eup %7139  ;;  %v10015_v44 = vmul.f32 %v4863_v0, %v9839_v39  ;;  %v4864_v25 = vmul.f32 %v7138_v11, %v9814_v31  ;;  %7161 = vpow2.f32 %v5806_v63  ;;  %v10028_v27 = vpop.f32.mrb[160].mxu0 }
 0xadb   : > { %v7142_v9 = vpop.eup %7141  ;;  %v10020_v35 = vmul.f32 %v4865_v61, %v9844_v21  ;;  %v4866_v47 = vmul.f32 %v7140_v55, %v9817_v18  ;;  %7163 = vpow2.f32 %v5808_v50  ;;  %v5814_v21 = vmul.f32 -1.442695, %v10007_v22  ;;  %v10035_v53 = vpop.f32.mrb[145].mxu1 }
 0xadc   : > { %v7144_v39 = vpop.eup %7143  ;;  %v10031_v31 = vmul.f32 %v4864_v25, %v9848_v43  ;;  %v4867_v11 = vmul.f32 %v7142_v9, %v9822_v7  ;;  %v10037_v18 = vpop.f32.mrb[161].mxu0  ;;  %7165 = vpow2.f32 %v5809_v14  ;;  %v5816_v61 = vmul.f32 -1.442695, %v10012_v33 }
 0xadd   : > { %v7146_v55 = vpop.eup %7145  ;;  %v10040_v2 = vmul.f32 %v4866_v47, %v9853_v3  ;;  %v4869_v63 = vmul.f32 %v7144_v39, %v9825_v4  ;;  %v10044_v43 = vpop.f32.mrb[146].mxu1  ;;  %7167 = vpow2.f32 %v5811_v6  ;;  %v10053_v9 = vadd.f32 %v4430_v42, %v9801_v24 }
 0xade   : > { %v10046_v0 = vpop.f32.mrb[162].mxu0  ;;  %v7148_v7 = vpop.eup %7147  ;;  %v10049_v50 = vmul.f32 %v4867_v11, %v9863_v10  ;;  %v4868_v25 = vmul.f32 %v7146_v55, %v9830_v46  ;;  %7169 = vpow2.f32 %v5810_v20  ;;  %v5817_v10 = vmul.f32 -1.442695, %v10024_v17 }
 0xadf   : > { %v10055_v3 = vpop.f32.mrb[147].mxu1  ;;  %v10057_v4 = vpop.f32.mrb[163].mxu0  ;;  %v10060_v47 = vmul.f32 %v4869_v63, %v9878_v32  ;;  %v4870_v39 = vmul.f32 %v7148_v7, %v9833_v59  ;;  %7171 = vpow2.f32 %v5812_v23 }
 0xae0   : > { %v7150_v14 = vpop.eup %7149  ;;  %v10067_v6 = vmul.f32 %v4868_v25, %v9884_v38  ;;  %7173 = vpow2.f32 %v5813_v5  ;;  %v10083_v25 = vadd.f32 %v9678_v26, %v9717_v34 }
 0xae1   : > { %v7152_v11 = vpop.eup %7151  ;;  %v4871_v42 = vmul.f32 %v7150_v14, %v9856_v52  ;;  %v10073_v63 = vmul.f32 %v4870_v39, %v9888_v8  ;;  %7175 = vpow2.f32 %v5815_v45  ;;  %v5819_v52 = vmul.f32 -1.442695, %v10053_v9  ;;  %v10089_v5 = vpop.f32.mrb[148].mxu1 }
 0xae2   : > { %v7154_v55 = vpop.eup %7153  ;;  %v4873_v59 = vmul.f32 %v7152_v11, %v9859_v13  ;;  %7177 = vpow2.f32 %v5814_v21 }
 0xae3   : > { %v7156_v20 = vpop.eup %7155  ;;  %v10077_v7 = vmul.f32 %v4871_v42, %v9893_v41  ;;  %v4872_v38 = vmul.f32 %v7154_v55, %v9866_v12  ;;  %v10091_v41 = vpop.f32.mrb[164].mxu0  ;;  %v10095_v12 = vadd.f32 %v9680_v51, %v9719_v29  ;;  %7179 = vpow2.f32 %v5816_v61  ;;  %v10915_v55 = vld [vmem:[#allocation66_spill] sm:$0xff] }
 0xae4   : > { %v7158_v23 = vpop.eup %7157  ;;  %v10086_v8 = vmul.f32 %v4873_v59, %v9897_v58  ;;  %v4874_v13 = vmul.f32 %v7156_v20, %v9869_v1  ;;  %v10101_v58 = vpop.f32.mrb[149].mxu1  ;;  %7181 = vpow2.f32 %v5817_v10  ;;  %v10110_v51 = vadd.f32 %v9982_v57, %v9803_v48 }
 0xae5   : > { %v7160_v14 = vpop.eup %7159  ;;  %10912 = vst [vmem:[#allocation89_spill] sm:$0xff] %v10095_v12  ;;  %v10098_v45 = vmul.f32 %v4872_v38, %v9901_v54  ;;  %v4875_v26 = vmul.f32 %v7158_v23, %v9874_v28  ;;  %v10103_v39 = vpop.f32.mrb[165].mxu0  ;;  %v10118_v61 = vadd.f32 %v9682_v16, %v9721_v60  ;;  %7183 = vpow2.f32 %v5819_v52  ;;  %v10916_v38 = vld [vmem:[#allocation30_spill] sm:$0xff]  ;;  %v10922_v52 = vld [vmem:[#allocation33_spill] sm:$0xff] }
 0xae6   : > { %v7162_v1 = vpop.eup %7161  ;;  %v10106_v21 = vmul.f32 %v4874_v13, %v9905_v49  ;;  %v4685_v11 = vadd.f32 1.0, %v7160_v14  ;;  %10913 = vst [vmem:[#allocation90_spill] sm:$0xff] %v10110_v51  ;;  %v10112_v42 = vpop.f32.mrb[150].mxu1  ;;  %v10129_v23 = vadd.f32 %v10916_v38, %v9715_v56  ;;  %v10918_v13 = vld [vmem:[#allocation31_spill] sm:$0xff] }
 0xae7   : > { %v10114_v54 = vpop.f32.mrb[166].mxu0  ;;  %v7164_v28 = vpop.eup %7163  ;;  %10914 = vst [vmem:[#allocation91_spill] sm:$0xff] %v10118_v61  ;;  %v10121_v59 = vmul.f32 %v4875_v26, %v10915_v55  ;;  %v4684_v49 = vadd.f32 1.0, %v7162_v1  ;;  %v10133_v14 = vadd.f32 %v10918_v13, %v9717_v34  ;;  %v10920_v26 = vld [vmem:[#allocation32_spill] sm:$0xff]  ;;  %v10141_v55 = vadd.f32 %v10922_v52, %v9721_v60 }
 0xae8   : > { %v10123_v20 = vpop.f32.mrb[151].mxu1  ;;  %v10125_v10 = vpop.f32.mrb[167].mxu0  ;;  %10917 = vst [vmem:[#allocation66_spill] sm:$0xff] %v10129_v23  ;;  %7185 = vrcp.f32 %v4685_v11  ;;  %v4686_v16 = vadd.f32 1.0, %v7164_v28  ;;  %v10137_v1 = vadd.f32 %v10920_v26, %v9719_v29  ;;  %v10144_v23 = vmul.f32 -1.442695, %v10110_v51 }
 0xae9   : > { %v7166_v57 = vpop.eup %7165  ;;  %10919 = vst [vmem:[#allocation30_spill] sm:$0xff] %v10133_v14  ;;  %10923 = vst [vmem:[#allocation32_spill] sm:$0xff] %v10141_v55  ;;  %7187 = vrcp.f32 %v4684_v49  ;;  %v10924_v11 = vld [vmem:[#allocation85_spill] sm:$0xff]  ;;  %v10927_v49 = vld [vmem:[#allocation87_spill] sm:$0xff] }
 0xaea   : > { %v7168_v32 = vpop.eup %7167  ;;  %10921 = vst [vmem:[#allocation31_spill] sm:$0xff] %v10137_v1  ;;  %v4687_v46 = vadd.f32 1.0, %v7166_v57  ;;  %7189 = vrcp.f32 %v4686_v16  ;;  %v10148_v28 = vadd.f32 %v10924_v11, %v9805_v30  ;;  %v10925_v1 = vld [vmem:[#allocation86_spill] sm:$0xff]  ;;  %v10156_v57 = vadd.f32 %v10927_v49, %v9801_v24  ;;  %v10929_v52 = vld [vmem:[#allocation88_spill] sm:$0xff] }
 0xaeb   : > { %v7170_v61 = vpop.eup %7169  ;;  %v4689_v38 = vadd.f32 1.0, %v7168_v32  ;;  %v10152_v14 = vadd.f32 %v10925_v1, %v9799_v36  ;;  %v10160_v55 = vadd.f32 %v10929_v52, %v9803_v48  ;;  %v4992_v11 = vpack.c.bf16 %v10067_v6, %v10031_v31 }
 0xaec   : > { %v7172_v13 = vpop.eup %7171  ;;  %7191 = vrcp.f32 %v4687_v46  ;;  %v4688_v26 = vadd.f32 1.0, %v7170_v61  ;;  %10928 = vst [vmem:[#allocation85_spill] sm:$0xff] %v10156_v57  ;;  %v10164_v46 = vpop.f32.mrb[152].mxu1  ;;  %v10170_v49 = vadd.f32 %v10002_v62, %v9805_v30  ;;  %v5820_v6 = vmul.f32 -1.442695, %v10148_v28 }
 0xaed   : > { %10926 = vst [vmem:[#allocation33_spill] sm:$0xff] %v10152_v14  ;;  %v7174_v16 = vpop.eup %7173  ;;  %7193 = vrcp.f32 %v4689_v38  ;;  %v4690_v32 = vadd.f32 1.0, %v7172_v13  ;;  %10930 = vst [vmem:[#allocation86_spill] sm:$0xff] %v10160_v55  ;;  %v10166_v61 = vpop.f32.mrb[168].mxu0  ;;  %v4994_v38 = vpack.c.bf16 %v10073_v63, %v10040_v2  ;;  %5311 = vmatprep.mubr.bf16.mxu1 %v4992_v11  ;;  %v10189_v63 = vadd.f32 %v10028_v27, %v9801_v24 }
 0xaee   : > { %10931 = vst [vmem:[#allocation87_spill] sm:$0xff] %v10166_v61  ;;  %v7176_v1 = vpop.eup %7175  ;;  %7195 = vrcp.f32 %v4688_v26  ;;  %v4691_v12 = vadd.f32 1.0, %v7174_v16  ;;  %10932 = vst [vmem:[#allocation88_spill] sm:$0xff] %v10170_v49  ;;  %v10174_v13 = vpop.f32.mrb[153].mxu1  ;;  %v10181_v26 = vadd.f32 %v10026_v19, %v9799_v36  ;;  %v10939_v19 = vpack.c.bf16 %v10049_v50, %v10015_v44 }
 0xaef   : > { %v10176_v52 = vpop.f32.mrb[169].mxu0  ;;  %v7178_v51 = vpop.eup %7177  ;;  %7197 = vrcp.f32 %v4690_v32  ;;  %v4693_v31 = vadd.f32 1.0, %v7176_v1  ;;  %10937 = vst [vmem:[#allocation96_spill] sm:$0xff] %v10189_v63  ;;  %v10193_v32 = vadd.f32 %v10035_v53, %v9803_v48  ;;  %5408 = vmatprep.mubr.bf16.mxu0 %v4994_v38  ;;  %v5823_v27 = vmul.f32 -1.442695, %v10156_v57  ;;  %v10943_v38 = vld [vmem:[#allocation24_spill] sm:$0xff] }
 0xaf0   : > { %10933 = vst [vmem:[#allocation92_spill] sm:$0xff] %v10176_v52  ;;  %10934 = vst [vmem:[#allocation93_spill] sm:$0xff] %v10181_v26  ;;  %v10183_v16 = vpop.f32.mrb[154].mxu1  ;;  %v10185_v62 = vpop.f32.mrb[170].mxu0  ;;  %7199 = vrcp.f32 %v4691_v12  ;;  %v4692_v2 = vadd.f32 1.0, %v7178_v51  ;;  %5312 = vmatmul.mubr.bf16.vlgmr.msra.gmra.mrb[160].mxu1 %v10939_v19  ;;  %v10942_v53 = vpack.c.bf16 %v10060_v47, %v10020_v35  ;;  %v10214_v35 = vadd.f32 %v10037_v18, %v9805_v30 }
 0xaf1   : > { %10935 = vst [vmem:[#allocation94_spill] sm:$0xff] %v10183_v16  ;;  %10936 = vst [vmem:[#allocation95_spill] sm:$0xff] %v10185_v62  ;;  %v7180_v61 = vpop.eup %7179  ;;  %v10198_v11 = vpop.f32.mrb[155].mxu1  ;;  %7201 = vrcp.f32 %v4693_v31  ;;  %v5821_v51 = vmul.f32 -1.442695, %v10152_v14  ;;  %6537 = vmatpush3.bf16.msra.mxu1 %v10943_v38  ;;  %v10228_v18 = vadd.f32 %v10046_v0, %v9801_v24 }
 0xaf2   : > { %10938 = vst [vmem:[#allocation97_spill] sm:$0xff] %v10193_v32  ;;  %10940 = vst [vmem:[#allocation98_spill] sm:$0xff] %v10198_v11  ;;  %v10200_v1 = vpop.f32.mrb[171].mxu0  ;;  %v7182_v62 = vpop.eup %7181  ;;  %v4694_v12 = vadd.f32 1.0, %v7180_v61  ;;  %5409 = vmatmul.mubr.bf16.vlgmr.msra.gmra.mrb[176].mxu0 %v10942_v53  ;;  %7203 = vrcp.f32 %v4692_v2  ;;  %v5822_v50 = vmul.f32 -1.442695, %v10160_v55 }
 0xaf3   : > { %10941 = vst [vmem:[#allocation99_spill] sm:$0xff] %v10200_v1  ;;  %v7184_v16 = vpop.eup %7183  ;;  %v4695_v44 = vadd.f32 1.0, %v7182_v62  ;;  %v5824_v19 = vmul.f32 -1.442695, %v10170_v49  ;;  %v10944_v1 = vld [vmem:[#allocation25_spill] sm:$0xff]  ;;  %v10945_v53 = vld [vmem:[#allocation75_spill] sm:$0xff] }
 0xaf4   : > { %6530 = vmatprep.subr.bf16.mxu1 %v10944_v1  ;;  %v7186_v61 = vpop.eup %7185  ;;  %7205 = vrcp.f32 %v4694_v12  ;;  %v4697_v31 = vadd.f32 1.0, %v7184_v16  ;;  %v5825_v11 = vmul.f32 -1.442695, %v10181_v26  ;;  %v5827_v62 = vmul.f32 -1.442695, %v10189_v63  ;;  %v10946_v1 = vld [vmem:[#allocation79_spill] sm:$0xff] }
 0xaf5   : > { %v7188_v47 = vpop.eup %7187  ;;  %v4877_v38 = vmul.f32 %v7186_v61, %v10945_v53  ;;  %7207 = vrcp.f32 %v4695_v44  ;;  %v10219_v2 = vmul.f32 -1.442695, %v10193_v32  ;;  %v10224_v16 = vadd.f32 %v10044_v43, %v9799_v36  ;;  %v10947_v12 = vld [vmem:[#allocation26_spill] sm:$0xff]  ;;  %v10231_v44 = vpop.f32.mrb[156].mxu1  ;;  %v10950_v32 = vld [vmem:[#allocation67_spill] sm:$0xff]  ;;  %v10951_v26 = vld [vmem:[#allocation81_spill] sm:$0xff] }
 0xaf6   : > { %v7190_v49 = vpop.eup %7189  ;;  %v4876_v52 = vmul.f32 %v7188_v47, %v10946_v1  ;;  %7209 = vrcp.f32 %v4697_v31  ;;  %6538 = vmatpush3.bf16.msra.mxu1 %v10947_v12  ;;  %10948 = vst [vmem:[#allocation24_spill] sm:$0xff] %v10231_v44  ;;  %v10233_v61 = vpop.f32.mrb[172].mxu0  ;;  %v10240_v43 = vadd.f32 %v10055_v3, %v9803_v48  ;;  %v10952_v31 = vld [vmem:[#allocation27_spill] sm:$0xff]  ;;  %v10955_v44 = vld [vmem:[#allocation68_spill] sm:$0xff]  ;;  %v10956_v55 = vld [vmem:[#allocation82_spill] sm:$0xff] }
 0xaf7   : > { %10949 = vst [vmem:[#allocation25_spill] sm:$0xff] %v10233_v61  ;;  %v7192_v53 = vpop.eup %7191  ;;  %v4941_v63 = vmul.f32 %v4877_v38, %v10950_v32  ;;  %v4878_v47 = vmul.f32 %v7190_v49, %v10951_v26  ;;  %7211 = vpow2.f32 %v10144_v23  ;;  %6531 = vmatprep.subr.bf16.mxu1 %v10952_v31  ;;  %v10243_v0 = vpop.f32.mrb[157].mxu1  ;;  %v5828_v49 = vmul.f32 -1.442695, %v10214_v35  ;;  %v10959_v32 = vld [vmem:[#allocation69_spill] sm:$0xff]  ;;  %v10960_v31 = vld [vmem:[#allocation83_spill] sm:$0xff] }
 0xaf8   : > { %10953 = vst [vmem:[#allocation75_spill] sm:$0xff] %v10243_v0  ;;  %v10245_v1 = vpop.f32.mrb[173].mxu0  ;;  %v7194_v12 = vpop.eup %7193  ;;  %v4940_v61 = vmul.f32 %v4876_v52, %v10955_v44  ;;  %v4879_v57 = vmul.f32 %v7192_v53, %v10956_v55  ;;  %7213 = vpow2.f32 %v5820_v6  ;;  %v10962_v6 = vld [vmem:[#allocation70_spill] sm:$0xff]  ;;  %v10963_v53 = vld [vmem:[#allocation84_spill] sm:$0xff] }
 0xaf9   : > { %10954 = vst [vmem:[#allocation79_spill] sm:$0xff] %v10245_v1  ;;  %v10250_v26 = vpop.f32.mrb[158].mxu1  ;;  %v10252_v23 = vpop.f32.mrb[174].mxu0  ;;  %v4942_v38 = vmul.f32 %v4878_v47, %v10959_v32  ;;  %v4881_v14 = vmul.f32 %v7194_v12, %v10960_v31  ;;  %7215 = vpow2.f32 %v5821_v51  ;;  %v4995_v1 = vpack.c.bf16 %v10121_v59, %v10077_v7  ;;  %v10964_v47 = vld [vmem:[#allocation28_spill] sm:$0xff]  ;;  %v10965_v51 = vld [vmem:[#allocation71_spill] sm:$0xff]  ;;  %v10966_v31 = vld [vmem:[#allocation29_spill] sm:$0xff] }
 0xafa   : > { %10957 = vst [vmem:[#allocation26_spill] sm:$0xff] %v10250_v26  ;;  %10958 = vst [vmem:[#allocation67_spill] sm:$0xff] %v10252_v23  ;;  %v7196_v3 = vpop.eup %7195  ;;  %v10258_v0 = vpop.f32.mrb[159].mxu1  ;;  %v10263_v44 = vmul.f32 %v4879_v57, %v10962_v6  ;;  %7217 = vpow2.f32 %v5823_v27  ;;  %v4996_v23 = vpack.c.bf16 %v4940_v61, %v10098_v45  ;;  %6539 = vmatpush3.bf16.msra.mxu1 %v10964_v47  ;;  %v10967_v6 = vld [vmem:[#allocation72_spill] sm:$0xff]  ;;  %v10972_v47 = vld [vmem:[#allocation77_spill] sm:$0xff] }
 0xafb   : > { %v10260_v52 = vpop.f32.mrb[175].mxu0  ;;  %v7198_v55 = vpop.eup %7197  ;;  %v4880_v26 = vmul.f32 %v7196_v3, %v10963_v53  ;;  %v10269_v32 = vmul.f32 %v4881_v14, %v10965_v51  ;;  %7219 = vpow2.f32 %v5822_v50  ;;  %v4998_v59 = vpack.c.bf16 %v4942_v38, %v10106_v21  ;;  %6532 = vmatprep.subr.bf16.mxu1 %v10966_v31  ;;  %v10968_v14 = vld [vmem:[#allocation73_spill] sm:$0xff] }
 0xafc   : > { %10961 = vst [vmem:[#allocation81_spill] sm:$0xff] %v10260_v52  ;;  %v7200_v12 = vpop.eup %7199  ;;  %v4882_v7 = vmul.f32 %v7198_v55, %v9980_v40  ;;  %7221 = vpow2.f32 %v5824_v19  ;;  %5319 = vmatprep.mubr.bf16.mxu1 %v4996_v23  ;;  %v4997_v45 = vpack.c.bf16 %v4941_v63, %v10086_v8  ;;  %v5829_v21 = vmul.f32 -1.442695, %v10224_v16  ;;  %v7379_v63 = vld [vmem:[%s10717_s7 + $0x98] sm:$0xff]   ;;  %v10971_v55 = vld [vmem:[#allocation34_spill] sm:$0xff] }
 0xafd   : > { %v7202_v57 = vpop.eup %7201  ;;  %v10275_v52 = vmul.f32 %v4880_v26, %v10967_v6  ;;  %v4883_v27 = vmul.f32 %v7200_v12, %v9986_v37  ;;  %7223 = vpow2.f32 %v5825_v11  ;;  %5416 = vmatprep.mubr.bf16.mxu0 %v4998_v59  ;;  %5320 = vmatmul.mubr.bf16.gmra.mrb[164].mxu1 %v4995_v1  ;;  %v10969_v26 = vld [vmem:[#allocation74_spill] sm:$0xff]  ;;  %v5831_v8 = vmul.f32 -1.442695, %v10228_v18  ;;  %v10970_v11 = vld [vmem:[#allocation76_spill] sm:$0xff] }
 0xafe   : > { %v7204_v61 = vpop.eup %7203  ;;  %v10280_v3 = vmul.f32 %v4882_v7, %v10968_v14  ;;  %v4885_v40 = vmul.f32 %v7202_v57, %v9994_v15  ;;  %7225 = vpow2.f32 %v5827_v62  ;;  %5417 = vmatmul.mubr.bf16.gmra.mrb[180].mxu0 %v4997_v45  ;;  %6540 = vmatpush3.bf16.msra.mxu1 %v7379_v63  ;;  %v5830_v23 = vmul.f32 -1.442695, %v10240_v43  ;;  %v10973_v7 = vld [vmem:[#allocation78_spill] sm:$0xff]  ;;  %v10974_v6 = vld [vmem:[#allocation80_spill] sm:$0xff] }
 0xaff   : > { %v7206_v50 = vpop.eup %7205  ;;  %v10285_v38 = vmul.f32 %v4883_v27, %v10969_v26  ;;  %v4884_v37 = vmul.f32 %v7204_v61, %v10007_v22  ;;  %7227 = vpow2.f32 %v10219_v2  ;;  %v7380_v22 = vld [vmem:[%s10717_s7 + $0xe0] sm:$0xff]   ;;  %v10303_v53 = vadd.f32 %v10971_v55, %v9715_v56 }
 0xb00   : > { %v7208_v15 = vpop.eup %7207  ;;  %v10293_v19 = vmul.f32 %v4885_v40, %v10970_v11  ;;  %v4886_v1 = vmul.f32 %v7206_v50, %v10012_v33  ;;  %6533 = vmatprep.subr.bf16.mxu1 %v7380_v22  ;;  %7229 = vpow2.f32 %v5828_v49  ;;  %v10313_v31 = vadd.f32 %v10057_v4, %v9805_v30  ;;  %v7381_v49 = vld [vmem:[%s10717_s7 + $0xa0] sm:$0xff]  }
 0xb01   : > { %v7210_v62 = vpop.eup %7209  ;;  %v4948_v12 = vmul.f32 %v4884_v37, %v10972_v47  ;;  %v4887_v51 = vmul.f32 %v7208_v15, %v10024_v17  ;;  %7231 = vpow2.f32 %v5829_v21  ;;  %v10320_v17 = vadd.f32 %v10089_v5, %v9799_v36  ;;  %v7382_v5 = vld [vmem:[%s10717_s7 + $0xe8] sm:$0xff]   ;;  %v10975_v21 = vld [vmem:[#allocation35_spill] sm:$0xff]  ;;  %v10976_v26 = vld [vmem:[#allocation36_spill] sm:$0xff] }
 0xb02   : > { %v7212_v33 = vpop.eup %7211  ;;  %v10308_v2 = vmul.f32 %v4886_v1, %v10973_v7  ;;  %v4889_v59 = vmul.f32 %v7210_v62, %v10053_v9  ;;  %7233 = vpow2.f32 %v5831_v8  ;;  %6541 = vmatpush3.bf16.msra.mxu1 %v7381_v49  ;;  %v10330_v14 = vadd.f32 %v10091_v41, %v9801_v24  ;;  %v10977_v41 = vld [vmem:[#allocation37_spill] sm:$0xff]  ;;  %v10978_v15 = vld [vmem:[#allocation38_spill] sm:$0xff] }
 0xb03   : > { %v7214_v57 = vpop.eup %7213  ;;  %v10316_v27 = vmul.f32 %v4887_v51, %v10974_v6  ;;  %v4696_v45 = vadd.f32 1.0, %v7212_v33  ;;  %7235 = vpow2.f32 %v5830_v23  ;;  %6534 = vmatprep.subr.bf16.mxu1 %v7382_v5  ;;  %v10337_v50 = vadd.f32 %v10975_v21, %v9717_v34  ;;  %v7383_v47 = vld [vmem:[%s10717_s7 + $0xa8] sm:$0xff]  }
 0xb04   : > { %v7216_v9 = vpop.eup %7215  ;;  %v10326_v61 = vmul.f32 %v4889_v59, %v10083_v25  ;;  %v4698_v4 = vadd.f32 1.0, %v7214_v57  ;;  %v10341_v25 = vadd.f32 %v10976_v26, %v9719_v29  ;;  %v10345_v63 = vadd.f32 %v10977_v41, %v9721_v60  ;;  %v7384_v59 = vld [vmem:[%s10717_s7 + $0xf0] sm:$0xff]  }
 0xb05   : > { %v7218_v40 = vpop.eup %7217  ;;  %7237 = vrcp.f32 %v4696_v45  ;;  %v4699_v37 = vadd.f32 1.0, %v7216_v9  ;;  %v10349_v11 = vadd.f32 %v10978_v15, %v9715_v56  ;;  %v10352_v62 = vmul.f32 -1.442695, %v10313_v31 }
 0xb06   : > { %v7220_v8 = vpop.eup %7219  ;;  %7239 = vrcp.f32 %v4698_v4  ;;  %v4701_v1 = vadd.f32 1.0, %v7218_v40  ;;  %v10355_v55 = vmul.f32 -1.442695, %v10320_v17  ;;  %6542 = vmatpush3.bf16.msra.mxu1 %v7383_v47  ;;  %v10361_v33 = vmul.f32 -1.442695, %v10330_v14  ;;  %v7387_v47 = vld [vmem:[%s10717_s7 + $0xb8] sm:$0xff]  }
 0xb07   : > { %v7222_v23 = vpop.eup %7221  ;;  %7241 = vrcp.f32 %v4699_v37  ;;  %v4700_v22 = vadd.f32 1.0, %v7220_v8  ;;  %v10365_v7 = vadd.f32 %v10101_v58, %v9803_v48  ;;  %6535 = vmatprep.subr.bf16.mxu1 %v7384_v59  ;;  %v10372_v45 = vadd.f32 %v10103_v39, %v9805_v30 }
 0xb08   : > { %v7224_v51 = vpop.eup %7223  ;;  %7243 = vrcp.f32 %v4701_v1  ;;  %v4702_v56 = vadd.f32 1.0, %v7222_v23  ;;  %v5000_v49 = vpack.c.bf16 %v4948_v12, %v10275_v52  ;;  %v5002_v58 = vpack.c.bf16 %v10308_v2, %v10280_v3  ;;  %v7385_v52 = vld [vmem:[%s10717_s7 + $0xb0] sm:$0xff]   ;;  %v10979_v23 = vld [vmem:[#allocation87_spill] sm:$0xff] }
 0xb09   : > { %v7226_v57 = vpop.eup %7225  ;;  %7245 = vrcp.f32 %v4700_v22  ;;  %v4703_v6 = vadd.f32 1.0, %v7224_v51  ;;  %v4999_v5 = vpack.c.bf16 %v10285_v38, %v10263_v44  ;;  %v10381_v26 = vadd.f32 %v10112_v42, %v9799_v36 }
 0xb0a   : > { %v7228_v9 = vpop.eup %7227  ;;  %7247 = vrcp.f32 %v4702_v56  ;;  %v4705_v4 = vadd.f32 1.0, %v7226_v57  ;;  %5327 = vmatprep.mubr.bf16.mxu1 %v5000_v49  ;;  %v5001_v39 = vpack.c.bf16 %v10293_v19, %v10269_v32  ;;  %6543 = vmatpush3.bf16.msra.mxu1 %v7385_v52  ;;  %v10390_v44 = vadd.f32 %v10114_v54, %v9801_v24  ;;  %v7386_v54 = vld [vmem:[%s10717_s7 + $0xf8] sm:$0xff]   ;;  %v10980_v56 = vld [vmem:[#allocation90_spill] sm:$0xff] }
 0xb0b   : > { %v7230_v40 = vpop.eup %7229  ;;  %7249 = vrcp.f32 %v4703_v6  ;;  %v4704_v21 = vadd.f32 1.0, %v7228_v9  ;;  %v10394_v42 = vadd.f32 %v10123_v20, %v9803_v48  ;;  %5424 = vmatprep.mubr.bf16.mxu0 %v5002_v58  ;;  %5328 = vmatmul.mubr.bf16.gmra.mrb[168].mxu1 %v4999_v5  ;;  %v5834_v19 = vmul.f32 -1.442695, %v10365_v7  ;;  %v10981_v5 = vld [vmem:[#allocation89_spill] sm:$0xff] }
 0xb0c   : > { %v7232_v3 = vpop.eup %7231  ;;  %7251 = vrcp.f32 %v4705_v4  ;;  %v4706_v12 = vadd.f32 1.0, %v7230_v40  ;;  %v10399_v2 = vadd.f32 %v10125_v10, %v9805_v30  ;;  %5425 = vmatmul.mubr.bf16.gmra.mrb[184].mxu0 %v5001_v39  ;;  %6536 = vmatprep.subr.bf16.mxu1 %v7386_v54  ;;  %v5836_v8 = vmul.f32 -1.442695, %v10372_v45 }
 0xb0d   : > { %v7234_v38 = vpop.eup %7233  ;;  %7253 = vrcp.f32 %v4704_v21  ;;  %v4707_v32 = vadd.f32 1.0, %v7232_v3  ;;  %v10407_v41 = vadd.f32 %v10164_v46, %v9799_v36  ;;  %v5837_v10 = vmul.f32 -1.442695, %v10381_v26  ;;  %v10982_v21 = vld [vmem:[#allocation33_spill] sm:$0xff] }
 0xb0e   : > { %v7236_v37 = vpop.eup %7235  ;;  %7255 = vrcp.f32 %v4706_v12  ;;  %v4709_v20 = vadd.f32 1.0, %v7234_v38  ;;  %v10412_v22 = vadd.f32 %v10979_v23, %v9801_v24  ;;  %6544 = vmatpush3.bf16.msra.mxu1 %v7387_v47  ;;  %v5839_v46 = vmul.f32 -1.442695, %v10390_v44  ;;  %v10983_v12 = vld [vmem:[#allocation91_spill] sm:$0xff] }
 0xb0f   : > { %v7238_v15 = vpop.eup %7237  ;;  %7257 = vrcp.f32 %v4707_v32  ;;  %v4708_v1 = vadd.f32 1.0, %v7236_v37  ;;  %v5838_v57 = vmul.f32 -1.442695, %v10394_v42  ;;  %v5840_v9 = vmul.f32 -1.442695, %v10399_v2  ;;  %v10985_v37 = vld [vmem:[#allocation66_spill] sm:$0xff] }
 0xb10   : > { %v7240_v51 = vpop.eup %7239  ;;  %v4888_v59 = vmul.f32 %v7238_v15, %v10980_v56  ;;  %7259 = vrcp.f32 %v4709_v20  ;;  %v10424_v4 = vadd.f32 %v10174_v13, %v9803_v48  ;;  %v5841_v52 = vmul.f32 -1.442695, %v10407_v41  ;;  %v10986_v15 = vld [vmem:[#allocation86_spill] sm:$0xff] }
 0xb11   : > { %v7242_v6 = vpop.eup %7241  ;;  %v4890_v49 = vmul.f32 %v7240_v51, %v10148_v28  ;;  %7261 = vrcp.f32 %v4708_v1  ;;  %v10984_v28 = vld [vmem:[#allocation85_spill] sm:$0xff]  ;;  %v5843_v54 = vmul.f32 -1.442695, %v10412_v22  ;;  %v10988_v51 = vld [vmem:[#allocation30_spill] sm:$0xff] }
 0xb12   : > { %v7244_v58 = vpop.eup %7243  ;;  %v4952_v40 = vmul.f32 %v4888_v59, %v10981_v5  ;;  %v4891_v39 = vmul.f32 %v7242_v6, %v10982_v21  ;;  %7263 = vpow2.f32 %v10352_v62  ;;  %v10987_v62 = vld [vmem:[#allocation92_spill] sm:$0xff]  ;;  %v10991_v21 = vld [vmem:[#allocation93_spill] sm:$0xff] }
 0xb13   : > { %v7246_v3 = vpop.eup %7245  ;;  %v4954_v38 = vmul.f32 %v4890_v49, %v10983_v12  ;;  %v4893_v32 = vmul.f32 %v7244_v58, %v10984_v28  ;;  %7265 = vpow2.f32 %v10355_v55  ;;  %v10439_v23 = vadd.f32 %v10987_v62, %v9805_v30  ;;  %v10989_v59 = vld [vmem:[#allocation88_spill] sm:$0xff]  ;;  %v10990_v58 = vld [vmem:[#allocation31_spill] sm:$0xff]  ;;  %v10994_v62 = vld [vmem:[#allocation97_spill] sm:$0xff] }
 0xb14   : > { %v7248_v13 = vpop.eup %7247  ;;  %v4955_v20 = vmul.f32 %v4891_v39, %v10985_v37  ;;  %v4892_v1 = vmul.f32 %v7246_v3, %v10986_v15  ;;  %7267 = vpow2.f32 %v10361_v33  ;;  %v5842_v55 = vmul.f32 -1.442695, %v10424_v4  ;;  %v10992_v12 = vld [vmem:[#allocation32_spill] sm:$0xff] }
 0xb15   : > { %v7250_v47 = vpop.eup %7249  ;;  %v4957_v56 = vmul.f32 %v4893_v32, %v10988_v51  ;;  %v4894_v6 = vmul.f32 %v7248_v13, %v10989_v59  ;;  %7269 = vpow2.f32 %v5834_v19  ;;  %v10993_v37 = vld [vmem:[#allocation96_spill] sm:$0xff] }
 0xb16   : > { %v7252_v49 = vpop.eup %7251  ;;  %v4956_v5 = vmul.f32 %v4892_v1, %v10990_v58  ;;  %v4895_v39 = vmul.f32 %v7250_v47, %v10991_v21  ;;  %7271 = vpow2.f32 %v5836_v8  ;;  %v5003_v33 = vpack.c.bf16 %v4955_v20, %v10316_v27 }
 0xb17   : > { %v7254_v3 = vpop.eup %7253  ;;  %v4958_v28 = vmul.f32 %v4894_v6, %v10992_v12  ;;  %v4897_v15 = vmul.f32 %v7252_v49, %v10993_v37  ;;  %7273 = vpow2.f32 %v5837_v10  ;;  %v5005_v32 = vpack.c.bf16 %v4957_v56, %v10326_v61 }
 0xb18   : > { %v7256_v13 = vpop.eup %7255  ;;  %v4959_v19 = vmul.f32 %v4895_v39, %v10303_v53  ;;  %v4896_v51 = vmul.f32 %v7254_v3, %v10994_v62  ;;  %7275 = vpow2.f32 %v5839_v46  ;;  %v5004_v1 = vpack.c.bf16 %v4956_v5, %v4952_v40  ;;  %v10995_v46 = vld [vmem:[#allocation39_spill] sm:$0xff] }
 0xb19   : > { %v7258_v59 = vpop.eup %7257  ;;  %v10453_v8 = vmul.f32 %v4897_v15, %v10337_v50  ;;  %v4898_v27 = vmul.f32 %v7256_v13, %v10214_v35  ;;  %7277 = vpow2.f32 %v5838_v57  ;;  %v5006_v20 = vpack.c.bf16 %v4958_v28, %v4954_v38 }
 0xb1a   : > { %v7260_v47 = vpop.eup %7259  ;;  %v4960_v10 = vmul.f32 %v4896_v51, %v10341_v25  ;;  %v4899_v61 = vmul.f32 %v7258_v59, %v10224_v16  ;;  %7279 = vpow2.f32 %v5840_v9  ;;  %v5844_v53 = vmul.f32 -1.442695, %v10439_v23  ;;  %5335 = vmatprep.mubr.bf16.mxu1 %v5004_v1  ;;  %v10996_v25 = vld [vmem:[#allocation40_spill] sm:$0xff] }
 0xb1b   : > { %v7262_v56 = vpop.eup %7261  ;;  %v4219_v40 = vadd.f32 %v10995_v46, %v9717_v34  ;;  %v10462_v50 = vmul.f32 %v4898_v27, %v10345_v63  ;;  %v4901_v35 = vmul.f32 %v7260_v47, %v10228_v18  ;;  %7281 = vpow2.f32 %v5841_v52  ;;  %5432 = vmatprep.mubr.bf16.mxu0 %v5006_v20  ;;  %5336 = vmatmul.mubr.bf16.gmra.mrb[172].mxu1 %v5003_v33  ;;  %v11001_v27 = vld [vmem:[#allocation99_spill] sm:$0xff] }
 0xb1c   : > { %v7264_v57 = vpop.eup %7263  ;;  %v4108_v16 = vadd.f32 %v10996_v25, %v9719_v29  ;;  %v4963_v9 = vmul.f32 %v4899_v61, %v10349_v11  ;;  %v4900_v38 = vmul.f32 %v7262_v56, %v10240_v43  ;;  %7283 = vpow2.f32 %v5843_v54  ;;  %5433 = vmatmul.mubr.bf16.gmra.mrb[188].mxu0 %v5005_v32  ;;  %v10998_v32 = vld [vmem:[#allocation94_spill] sm:$0xff]  ;;  %v11002_v61 = vld [vmem:[#allocation24_spill] sm:$0xff]  ;;  %v11003_v56 = vld [vmem:[#allocation25_spill] sm:$0xff] }
 0xb1d   : > { %v7266_v6 = vpop.eup %7265  ;;  %v10469_v34 = vmul.f32 %v4901_v35, %v4219_v40  ;;  %v4710_v63 = vadd.f32 1.0, %v7264_v57  ;;  %7285 = vpow2.f32 %v5842_v55  ;;  %v10997_v55 = vld [vmem:[#allocation41_spill] sm:$0xff]  ;;  %v10477_v13 = vadd.f32 %v10998_v32, %v9799_v36  ;;  %v11004_v57 = vld [vmem:[#allocation75_spill] sm:$0xff] }
 0xb1e   : > { %v7268_v49 = vpop.eup %7267  ;;  %v4964_v18 = vmul.f32 %v4900_v38, %v4108_v16  ;;  %v4711_v52 = vadd.f32 1.0, %v7266_v6  ;;  %7287 = vpow2.f32 %v5844_v53  ;;  %v5007_v58 = vpack.c.bf16 %v4963_v9, %v4959_v19  ;;  %v10999_v19 = vld [vmem:[#allocation95_spill] sm:$0xff] }
 0xb1f   : > { %v7270_v5 = vpop.eup %7269  ;;  %7289 = vrcp.f32 %v4710_v63  ;;  %v4713_v21 = vadd.f32 1.0, %v7268_v49  ;;  %v5009_v29 = vpack.c.bf16 %v10469_v34, %v10453_v8  ;;  %v4221_v12 = vadd.f32 %v10997_v55, %v9721_v60  ;;  %v11000_v60 = vld [vmem:[#allocation98_spill] sm:$0xff]  ;;  %v11005_v16 = vld [vmem:[#allocation79_spill] sm:$0xff] }
 0xb20   : > { %v7272_v11 = vpop.eup %7271  ;;  %7291 = vrcp.f32 %v4711_v52  ;;  %v4712_v43 = vadd.f32 1.0, %v7270_v5  ;;  %v5008_v54 = vpack.c.bf16 %v4964_v18, %v4960_v10  ;;  %v10481_v62 = vadd.f32 %v10999_v19, %v9801_v24  ;;  %v11007_v19 = vld [vmem:[#allocation67_spill] sm:$0xff] }
 0xb21   : > { %v7274_v39 = vpop.eup %7273  ;;  %7293 = vrcp.f32 %v4713_v21  ;;  %v4714_v33 = vadd.f32 1.0, %v7272_v11  ;;  %v10485_v59 = vadd.f32 %v11000_v60, %v9803_v48  ;;  %v10489_v20 = vadd.f32 %v11001_v27, %v9805_v30 }
 0xb22   : > { %v7276_v3 = vpop.eup %7275  ;;  %7295 = vrcp.f32 %v4712_v43  ;;  %v4715_v28 = vadd.f32 1.0, %v7274_v39  ;;  %5343 = vmatprep.mubr.bf16.mxu1 %v5008_v54  ;;  %v10493_v53 = vadd.f32 %v11002_v61, %v9799_v36  ;;  %v10497_v46 = vadd.f32 %v11003_v56, %v9801_v24 }
 0xb23   : > { %v7278_v37 = vpop.eup %7277  ;;  %7297 = vrcp.f32 %v4714_v33  ;;  %v4717_v15 = vadd.f32 1.0, %v7276_v3  ;;  %5344 = vmatmul.mubr.bf16.gmra.mrb[176].mxu1 %v5007_v58  ;;  %v10501_v25 = vadd.f32 %v11004_v57, %v9803_v48  ;;  %v10505_v9 = vadd.f32 %v11005_v16, %v9805_v30 }
 0xb24   : > { %v7280_v51 = vpop.eup %7279  ;;  %7299 = vrcp.f32 %v4715_v28  ;;  %v4716_v1 = vadd.f32 1.0, %v7278_v37  ;;  %v5845_v63 = vmul.f32 -1.442695, %v10477_v13  ;;  %v5847_v49 = vmul.f32 -1.442695, %v10481_v62 }
 0xb25   : > { %v7282_v47 = vpop.eup %7281  ;;  %7301 = vrcp.f32 %v4717_v15  ;;  %v4718_v10 = vadd.f32 1.0, %v7280_v51  ;;  %v5846_v58 = vmul.f32 -1.442695, %v10485_v59  ;;  %v5848_v5 = vmul.f32 -1.442695, %v10489_v20  ;;  %v11006_v15 = vld [vmem:[#allocation26_spill] sm:$0xff] }
 0xb26   : > { %v7284_v40 = vpop.eup %7283  ;;  %7303 = vrcp.f32 %v4716_v1  ;;  %v4719_v35 = vadd.f32 1.0, %v7282_v47  ;;  %v5849_v43 = vmul.f32 -1.442695, %v10493_v53  ;;  %v5851_v54 = vmul.f32 -1.442695, %v10497_v46 }
 0xb27   : > { %v7286_v38 = vpop.eup %7285  ;;  %7305 = vrcp.f32 %v4718_v10  ;;  %v4721_v6 = vadd.f32 1.0, %v7284_v40  ;;  %v5850_v3 = vmul.f32 -1.442695, %v10501_v25  ;;  %v5852_v55 = vmul.f32 -1.442695, %v10505_v9  ;;  %v11010_v40 = vld [vmem:[#allocation43_spill] sm:$0xff] }
 0xb28   : > { %v7288_v18 = vpop.eup %7287  ;;  %7307 = vrcp.f32 %v4719_v35  ;;  %v4720_v52 = vadd.f32 1.0, %v7286_v38  ;;  %v10519_v32 = vadd.f32 %v11006_v15, %v9799_v36  ;;  %v10523_v51 = vadd.f32 %v11007_v19, %v9801_v24  ;;  %v11009_v36 = vld [vmem:[#allocation81_spill] sm:$0xff]  ;;  %v11017_v19 = vld [vmem:[#allocation50_spill] sm:$0xff] }
 0xb29   : > { %v7290_v21 = vpop.eup %7289  ;;  %7309 = vrcp.f32 %v4721_v6  ;;  %v4722_v11 = vadd.f32 1.0, %v7288_v18  ;;  %v10528_v27 = vadd.f32 %v10258_v0, %v9803_v48  ;;  %v10534_v56 = vadd.f32 %v11009_v36, %v9805_v30  ;;  %v11011_v0 = vld [vmem:[#allocation44_spill] sm:$0xff]  ;;  %v11012_v6 = vld [vmem:[#allocation45_spill] sm:$0xff]  ;;  %v11013_v18 = vld [vmem:[#allocation46_spill] sm:$0xff] }
 0xb2a   : > { %v7292_v39 = vpop.eup %7291  ;;  %v4902_v33 = vmul.f32 %v7290_v21, %v10313_v31  ;;  %7311 = vrcp.f32 %v4720_v52 }
 0xb2b   : > { %v7294_v28 = vpop.eup %7293  ;;  %v4903_v37 = vmul.f32 %v7292_v39, %v10320_v17  ;;  %7313 = vrcp.f32 %v4722_v11  ;;  %v11008_v17 = vld [vmem:[#allocation42_spill] sm:$0xff]  ;;  %v5856_v11 = vmul.f32 -1.442695, %v10534_v56  ;;  %v11015_v39 = vld [vmem:[#allocation48_spill] sm:$0xff] }
 0xb2c   : > { %v7296_v1 = vpop.eup %7295  ;;  %v4966_v60 = vmul.f32 %v4902_v33, %v4221_v12  ;;  %v4905_v31 = vmul.f32 %v7294_v28, %v10330_v14  ;;  %7315 = vpow2.f32 %v5845_v63 }
 0xb2d   : > { %v7298_v47 = vpop.eup %7297  ;;  %v4967_v10 = vmul.f32 %v4903_v37, %v11008_v17  ;;  %v4904_v61 = vmul.f32 %v7296_v1, %v10365_v7  ;;  %7317 = vpow2.f32 %v5847_v49  ;;  %v5853_v7 = vmul.f32 -1.442695, %v10519_v32  ;;  %v11016_v37 = vld [vmem:[#allocation49_spill] sm:$0xff] }
 0xb2e   : > { %v7300_v24 = vpop.eup %7299  ;;  %v4969_v12 = vmul.f32 %v4905_v31, %v11010_v40  ;;  %v4906_v14 = vmul.f32 %v7298_v47, %v10372_v45  ;;  %7319 = vpow2.f32 %v5846_v58  ;;  %v5010_v35 = vpack.c.bf16 %v4966_v60, %v10462_v50  ;;  %v11018_v31 = vld [vmem:[#allocation51_spill] sm:$0xff] }
 0xb2f   : > { %v7302_v48 = vpop.eup %7301  ;;  %v4968_v57 = vmul.f32 %v4904_v61, %v11011_v0  ;;  %v4907_v16 = vmul.f32 %v7300_v24, %v10381_v26  ;;  %7321 = vpow2.f32 %v5848_v5  ;;  %v5855_v49 = vmul.f32 -1.442695, %v10523_v51  ;;  %v11014_v5 = vld [vmem:[#allocation47_spill] sm:$0xff]  ;;  %v11020_v24 = vld [vmem:[#allocation53_spill] sm:$0xff] }
 0xb30   : > { %v7304_v38 = vpop.eup %7303  ;;  %v4970_v30 = vmul.f32 %v4906_v14, %v11012_v6  ;;  %v4909_v63 = vmul.f32 %v7302_v48, %v10390_v44  ;;  %7323 = vpow2.f32 %v5849_v43  ;;  %5440 = vmatprep.mubr.bf16.mxu0 %v5010_v35  ;;  %v5854_v26 = vmul.f32 -1.442695, %v10528_v27 }
 0xb31   : > { %v7306_v45 = vpop.eup %7305  ;;  %v4971_v50 = vmul.f32 %v4907_v16, %v11013_v18  ;;  %v4908_v52 = vmul.f32 %v7304_v38, %v10394_v42  ;;  %7325 = vpow2.f32 %v5851_v54  ;;  %5441 = vmatmul.mubr.bf16.gmra.mrb[192].mxu0 %v5009_v29 }
 0xb32   : > { %v7308_v58 = vpop.eup %7307  ;;  %v4973_v21 = vmul.f32 %v4909_v63, %v11014_v5  ;;  %v4910_v44 = vmul.f32 %v7306_v45, %v10399_v2  ;;  %7327 = vpow2.f32 %v5850_v3 }
 0xb33   : > { %v7310_v43 = vpop.eup %7309  ;;  %v4972_v33 = vmul.f32 %v4908_v52, %v11015_v39  ;;  %v4911_v42 = vmul.f32 %v7308_v58, %v10407_v41  ;;  %7329 = vpow2.f32 %v5852_v55  ;;  %v5011_v54 = vpack.c.bf16 %v4971_v50, %v4967_v10  ;;  %v11021_v39 = vld [vmem:[#allocation54_spill] sm:$0xff] }
 0xb34   : > { %v7312_v28 = vpop.eup %7311  ;;  %v4974_v15 = vmul.f32 %v4910_v44, %v11016_v37  ;;  %v4913_v8 = vmul.f32 %v7310_v43, %v10412_v22  ;;  %7331 = vpow2.f32 %v5853_v7  ;;  %v5013_v34 = vpack.c.bf16 %v4973_v21, %v4969_v12  ;;  %v11019_v22 = vld [vmem:[#allocation52_spill] sm:$0xff] }
 0xb35   : > { %v7314_v29 = vpop.eup %7313  ;;  %v10559_v2 = vmul.f32 %v4911_v42, %v11017_v19  ;;  %v4912_v3 = vmul.f32 %v7312_v28, %v10424_v4  ;;  %7333 = vpow2.f32 %v5855_v49  ;;  %v5012_v1 = vpack.c.bf16 %v4972_v33, %v4968_v57  ;;  %v11022_v28 = vld [vmem:[#allocation55_spill] sm:$0xff] }
 0xb36   : > { %v7316_v60 = vpop.eup %7315  ;;  %v10563_v41 = vmul.f32 %v4913_v8, %v11018_v31  ;;  %v4914_v55 = vmul.f32 %v7314_v29, %v10439_v23  ;;  %7335 = vpow2.f32 %v5854_v26  ;;  %v5014_v47 = vpack.c.bf16 %v4974_v15, %v4970_v30 }
 0xb37   : > { %v7318_v17 = vpop.eup %7317  ;;  %v10567_v10 = vmul.f32 %v4912_v3, %v11019_v22  ;;  %v4723_v61 = vadd.f32 1.0, %v7316_v60  ;;  %7337 = vpow2.f32 %v5856_v11  ;;  %5351 = vmatprep.mubr.bf16.mxu1 %v5012_v1  ;;  %v11024_v1 = vld [vmem:[#allocation57_spill] sm:$0xff] }
 0xb38   : > { %v7320_v36 = vpop.eup %7319  ;;  %v10570_v4 = vmul.f32 %v4914_v55, %v11020_v24  ;;  %v4725_v40 = vadd.f32 1.0, %v7318_v17  ;;  %5448 = vmatprep.mubr.bf16.mxu0 %v5014_v47  ;;  %5352 = vmatmul.mubr.bf16.gmra.mrb[180].mxu1 %v5011_v54  ;;  %v11025_v55 = vld [vmem:[#allocation58_spill] sm:$0xff] }
 0xb39   : > { %v7322_v12 = vpop.eup %7321  ;;  %7339 = vrcp.f32 %v4723_v61  ;;  %v4724_v14 = vadd.f32 1.0, %v7320_v36  ;;  %5449 = vmatmul.mubr.bf16.gmra.mrb[196].mxu0 %v5013_v34  ;;  %v11023_v34 = vld [vmem:[#allocation56_spill] sm:$0xff]  ;;  %v11026_v61 = vld [vmem:[#allocation59_spill] sm:$0xff] }
 0xb3a   : > { %v7324_v23 = vpop.eup %7323  ;;  %7341 = vrcp.f32 %v4725_v40  ;;  %v4726_v35 = vadd.f32 1.0, %v7322_v12 }
 0xb3b   : > { %v7326_v48 = vpop.eup %7325  ;;  %7343 = vrcp.f32 %v4724_v14  ;;  %v4727_v0 = vadd.f32 1.0, %v7324_v23  ;;  %v11028_v14 = vld [vmem:[#allocation61_spill] sm:$0xff] }
 0xb3c   : > { %v7328_v57 = vpop.eup %7327  ;;  %7345 = vrcp.f32 %v4726_v35  ;;  %v4729_v16 = vadd.f32 1.0, %v7326_v48  ;;  %v11029_v35 = vld [vmem:[#allocation62_spill] sm:$0xff] }
 0xb3d   : > { %v7330_v7 = vpop.eup %7329  ;;  %7347 = vrcp.f32 %v4727_v0  ;;  %v4728_v38 = vadd.f32 1.0, %v7328_v57 }
 0xb3e   : > { %v7332_v6 = vpop.eup %7331  ;;  %7349 = vrcp.f32 %v4729_v16  ;;  %v4730_v30 = vadd.f32 1.0, %v7330_v7  ;;  %v11031_v16 = vld [vmem:[#allocation64_spill] sm:$0xff] }
 0xb3f   : > { %v7334_v63 = vpop.eup %7333  ;;  %7351 = vrcp.f32 %v4728_v38  ;;  %v4731_v49 = vadd.f32 1.0, %v7332_v6  ;;  %v11032_v38 = vld [vmem:[#allocation65_spill] sm:$0xff] }
 0xb40   : > { %v7336_v45 = vpop.eup %7335  ;;  %7353 = vrcp.f32 %v4730_v30  ;;  %v4733_v18 = vadd.f32 1.0, %v7334_v63 }
 0xb41   : > { %v7338_v50 = vpop.eup %7337  ;;  %7355 = vrcp.f32 %v4731_v49  ;;  %v4732_v52 = vadd.f32 1.0, %v7336_v45 }
 0xb42   : > { %7357 = vrcp.f32 %v4733_v18  ;;  %v4734_v26 = vadd.f32 1.0, %v7338_v50 }
 0xb43   : > { %v7340_v58 = vpop.eup %7339  ;;  %7359 = vrcp.f32 %v4732_v52 }
 0xb44   : > { %v7342_v5 = vpop.eup %7341  ;;  %v4915_v21 = vmul.f32 %v7340_v58, %v10477_v13  ;;  %7361 = vrcp.f32 %v4734_v26 }
 0xb45   : > { %v7344_v44 = vpop.eup %7343  ;;  %v4917_v11 = vmul.f32 %v7342_v5, %v10481_v62 }
 0xb46   : > { %v7346_v43 = vpop.eup %7345  ;;  %v4979_v33 = vmul.f32 %v4915_v21, %v11021_v39  ;;  %v4916_v42 = vmul.f32 %v7344_v44, %v10485_v59  ;;  %v11033_v39 = vld [vmem:[#allocation16_spill] sm:$0xff] }
 0xb47   : > { %v7348_v54 = vpop.eup %7347  ;;  %v4981_v37 = vmul.f32 %v4917_v11, %v11022_v28  ;;  %v4918_v15 = vmul.f32 %v7346_v43, %v10489_v20  ;;  %v10606_v43 = vld [vmem:[%s10718_s8] ss:$0 sm:$0xff]  ;;  %v11034_v28 = vld [vmem:[#allocation14_spill] sm:$0xff] }
 0xb48   : > { %v7350_v8 = vpop.eup %7349  ;;  %v4980_v29 = vmul.f32 %v4916_v42, %v11023_v34  ;;  %v4919_v19 = vmul.f32 %v7348_v54, %v10493_v53  ;;  %v5015_v13 = vpack.c.bf16 %v4979_v33, %v10559_v2 }
 0xb49   : > { %v7352_v3 = vpop.eup %7351  ;;  %v5017_v62 = vpack.c.bf16 %v4981_v37, %v10563_v41  ;;  %v4982_v60 = vmul.f32 %v4918_v15, %v11024_v1  ;;  %v4921_v31 = vmul.f32 %v7350_v8, %v10497_v46  ;;  %v11027_v41 = vld [vmem:[#allocation60_spill] sm:$0xff] }
 0xb4a   : > { %v7354_v59 = vpop.eup %7353  ;;  %v4983_v47 = vmul.f32 %v4919_v19, %v11025_v55  ;;  %v4920_v17 = vmul.f32 %v7352_v3, %v10501_v25  ;;  %v5016_v20 = vpack.c.bf16 %v4980_v29, %v10567_v10 }
 0xb4b   : > { %v7356_v22 = vpop.eup %7355  ;;  %v4985_v36 = vmul.f32 %v4921_v31, %v11026_v61  ;;  %v4922_v53 = vmul.f32 %v7354_v59, %v10505_v9  ;;  %v5018_v2 = vpack.c.bf16 %v4982_v60, %v10570_v4  ;;  %v11030_v9 = vld [vmem:[#allocation63_spill] sm:$0xff] }
 0xb4c   : > { %v7358_v24 = vpop.eup %7357  ;;  %v4984_v40 = vmul.f32 %v4920_v17, %v11027_v41  ;;  %v4923_v12 = vmul.f32 %v7356_v22, %v10519_v32  ;;  %5359 = vmatprep.mubr.bf16.mxu1 %v5016_v20  ;;  %v11035_v17 = vld [vmem:[#allocation20_spill] sm:$0xff] }
 0xb4d   : > { %v7360_v46 = vpop.eup %7359  ;;  %v4986_v23 = vmul.f32 %v4922_v53, %v11028_v14  ;;  %v4925_v25 = vmul.f32 %v7358_v24, %v10523_v51  ;;  %5360 = vmatmul.mubr.bf16.gmra.mrb[184].mxu1 %v5015_v13 }
 0xb4e   : > { %v7362_v10 = vpop.eup %7361  ;;  %v4987_v48 = vmul.f32 %v4923_v12, %v11029_v35  ;;  %v4924_v0 = vmul.f32 %v7360_v46, %v10528_v27 }
 0xb4f   : > { %v4989_v57 = vmul.f32 %v4925_v25, %v11030_v9  ;;  %v4926_v4 = vmul.f32 %v7362_v10, %v10534_v56 }
 0xb50   : > { %v4988_v7 = vmul.f32 %v4924_v0, %v11031_v16  ;;  %v5019_v32 = vpack.c.bf16 %v4987_v48, %v4983_v47 }
 0xb51   : > { %v4990_v6 = vmul.f32 %v4926_v4, %v11032_v38  ;;  %v5021_v30 = vpack.c.bf16 %v4989_v57, %v4985_v36  ;;  %v11036_v36 = vld [vmem:[#allocation18_spill] sm:$0xff]  ;;  %v11037_v57 = vld [vmem:[#allocation8_spill] sm:$0xff] }
 0xb52   : > { %v5020_v63 = vpack.c.bf16 %v4988_v7, %v4984_v40 }
 0xb53   : > { %v5022_v49 = vpack.c.bf16 %v4990_v6, %v4986_v23 }
 0xb54   : > { %5367 = vmatprep.mubr.bf16.mxu1 %v5020_v63 }
 0xb55   : > { %5368 = vmatmul.mubr.bf16.gmra.mrb[188].mxu1 %v5019_v32  ;;  %v11038_v32 = vld [vmem:[#allocation9_spill] sm:$0xff] }
 0xb56   : > { %5456 = vmatprep.mubr.bf16.mxu1 %v5018_v2 }
 0xb5d   : > { %5457 = vmatmul.mubr.bf16.vlgmr.msra.gmra.mrb[192].mxu1 %v5017_v62 }
 0xb5e   : > { %5464 = vmatprep.mubr.bf16.mxu1 %v5022_v49 }
 0xb65   : > { %5465 = vmatmul.mubr.bf16.gmra.mrb[196].mxu1 %v5021_v30 }
 0xbc3   : > { %v6081_v51 = vpop.f32.mrb[160].mxu1 }
 0xbc4   : > { %v6082_v45 = vpop.f32.mrb[161].mxu1 }
 0xbc5   : > { %v6145_v27 = vpop.f32.mrb[176].mxu0  ;;  %v6083_v56 = vadd.f32 %v6082_v45, %v6081_v51  ;;  %v6084_v50 = vpop.f32.mrb[162].mxu1 }
 0xbc6   : > { %v6146_v18 = vpop.f32.mrb[177].mxu0  ;;  %v6085_v58 = vpop.f32.mrb[163].mxu1 }
 0xbc7   : > { %v6147_v52 = vadd.f32 %v6146_v18, %v6145_v27  ;;  %v6148_v26 = vpop.f32.mrb[178].mxu0  ;;  %v6086_v5 = vadd.f32 %v6085_v58, %v6084_v50 }
 0xbc8   : > { %v6149_v21 = vpop.f32.mrb[179].mxu0 }
 0xbc9   : > { %v5411_v44 = vadd.f32 %v6147_v52, %v6083_v56  ;;  %v6150_v11 = vadd.f32 %v6149_v21, %v6148_v26  ;;  %v11039_v21 = vld [vmem:[#allocation10_spill] sm:$0xff] }
 0xbcb   : > { %v5473_v33 = vadd.f32 %v11033_v39, %v5411_v44  ;;  %v5414_v42 = vadd.f32 %v6150_v11, %v6086_v5 }
 0xbcd   : > { %v5496_v54 = vadd.f32 %v10606_v43, %v5473_v33  ;;  %v5474_v37 = vadd.f32 %v11034_v28, %v5414_v42  ;;  %v11040_v42 = vld [vmem:[#allocation11_spill] sm:$0xff] }
 0xbcf   : > { %5512 = vst [vmem:[%s10611_s21] sm:$0xff] %v5496_v54  ;;  %v5497_v15 = vadd.f32 %v10606_v43, %v5474_v37 }
 0xbd0   : > { %v6087_v8 = vpop.f32.mrb[164].mxu1 }
 0xbd1   : > { %5513 = vst [vmem:[%s10611_s21 + $0x8] sm:$0xff] %v5497_v15  ;;  %v6151_v34 = vpop.f32.mrb[180].mxu0  ;;  %v6088_v29 = vpop.f32.mrb[165].mxu1 }
 0xbd2   : > { %v6089_v19 = vadd.f32 %v6088_v29, %v6087_v8  ;;  %v6152_v13 = vpop.f32.mrb[181].mxu0  ;;  %v6090_v3 = vpop.f32.mrb[166].mxu1 }
 0xbd3   : > { %v6153_v62 = vadd.f32 %v6152_v13, %v6151_v34  ;;  %v6154_v1 = vpop.f32.mrb[182].mxu0  ;;  %v6091_v60 = vpop.f32.mrb[167].mxu1 }
 0xbd4   : > { %v6092_v31 = vadd.f32 %v6091_v60, %v6090_v3  ;;  %v6155_v59 = vpop.f32.mrb[183].mxu0 }
 0xbd5   : > { %v5419_v55 = vadd.f32 %v6153_v62, %v6089_v19  ;;  %v6156_v47 = vadd.f32 %v6155_v59, %v6154_v1  ;;  %v11041_v59 = vld [vmem:[#allocation12_spill] sm:$0xff] }
 0xbd7   : > { %v5475_v20 = vadd.f32 %v11035_v17, %v5419_v55  ;;  %v5422_v22 = vadd.f32 %v6156_v47, %v6092_v31 }
 0xbd9   : > { %v5498_v61 = vadd.f32 %v10606_v43, %v5475_v20  ;;  %v5476_v53 = vadd.f32 %v11036_v36, %v5422_v22  ;;  %v11042_v22 = vld [vmem:[#allocation15_spill] sm:$0xff] }
 0xbdb   : > { %5514 = vst [vmem:[%s10611_s21 + $0x10] sm:$0xff] %v5498_v61  ;;  %v5499_v2 = vadd.f32 %v10606_v43, %v5476_v53 }
 0xbdd   : > { %5515 = vst [vmem:[%s10611_s21 + $0x18] sm:$0xff] %v5499_v2 }
 0xbde   : > { %v6093_v24 = vpop.f32.mrb[168].mxu1 }
 0xbdf   : > { %v6157_v41 = vpop.f32.mrb[184].mxu0  ;;  %v6094_v40 = vpop.f32.mrb[169].mxu1 }
 0xbe0   : > { %v6095_v12 = vadd.f32 %v6094_v40, %v6093_v24  ;;  %v6158_v46 = vpop.f32.mrb[185].mxu0  ;;  %v6096_v14 = vpop.f32.mrb[170].mxu1 }
 0xbe1   : > { %v6159_v23 = vadd.f32 %v6158_v46, %v6157_v41  ;;  %v6160_v25 = vpop.f32.mrb[186].mxu0  ;;  %v6097_v10 = vpop.f32.mrb[171].mxu1 }
 0xbe2   : > { %v6098_v35 = vadd.f32 %v6097_v10, %v6096_v14  ;;  %v6161_v48 = vpop.f32.mrb[187].mxu0 }
 0xbe3   : > { %v5427_v0 = vadd.f32 %v6159_v23, %v6095_v12  ;;  %v6162_v9 = vadd.f32 %v6161_v48, %v6160_v25  ;;  %v11043_v48 = vld [vmem:[#allocation13_spill] sm:$0xff] }
 0xbe5   : > { %v5477_v4 = vadd.f32 %v11037_v57, %v5427_v0  ;;  %v5430_v16 = vadd.f32 %v6162_v9, %v6098_v35 }
 0xbe7   : > { %v5500_v7 = vadd.f32 %v10606_v43, %v5477_v4  ;;  %v5478_v38 = vadd.f32 %v11038_v32, %v5430_v16  ;;  %v11044_v4 = vld [vmem:[#allocation19_spill] sm:$0xff] }
 0xbe9   : > { %5516 = vst [vmem:[%s10611_s21 + $0x20] sm:$0xff] %v5500_v7  ;;  %v5501_v6 = vadd.f32 %v10606_v43, %v5478_v38 }
 0xbeb   : > { %5517 = vst [vmem:[%s10611_s21 + $0x28] sm:$0xff] %v5501_v6 }
 0xbee   : > { %v6099_v30 = vpop.f32.mrb[172].mxu1 }
 0xbef   : > { %v6163_v63 = vpop.f32.mrb[188].mxu0  ;;  %v6100_v49 = vpop.f32.mrb[173].mxu1 }
 0xbf0   : > { %v6101_v51 = vadd.f32 %v6100_v49, %v6099_v30  ;;  %v6164_v27 = vpop.f32.mrb[189].mxu0  ;;  %v6102_v45 = vpop.f32.mrb[174].mxu1 }
 0xbf1   : > { %v6165_v56 = vadd.f32 %v6164_v27, %v6163_v63  ;;  %v6166_v18 = vpop.f32.mrb[190].mxu0  ;;  %v6103_v50 = vpop.f32.mrb[175].mxu1 }
 0xbf2   : > { %v6104_v52 = vadd.f32 %v6103_v50, %v6102_v45  ;;  %v6167_v26 = vpop.f32.mrb[191].mxu0 }
 0xbf3   : > { %v5435_v58 = vadd.f32 %v6165_v56, %v6101_v51  ;;  %v6168_v5 = vadd.f32 %v6167_v26, %v6166_v18 }
 0xbf5   : > { %v5479_v44 = vadd.f32 %v11039_v21, %v5435_v58  ;;  %v5438_v11 = vadd.f32 %v6168_v5, %v6104_v52 }
 0xbf6   : > { %v6105_v39 = vpop.f32.mrb[176].mxu1 }
 0xbf7   : > { %v5502_v33 = vadd.f32 %v10606_v43, %v5479_v44  ;;  %v5480_v54 = vadd.f32 %v11040_v42, %v5438_v11  ;;  %v6106_v28 = vpop.f32.mrb[177].mxu1 }
 0xbf8   : > { %v6107_v37 = vadd.f32 %v6106_v28, %v6105_v39  ;;  %v6108_v15 = vpop.f32.mrb[178].mxu1  ;;  %v11045_v39 = vld [vmem:[#allocation17_spill] sm:$0xff]  ;;  %v11046_v28 = vld [vmem:[#allocation22_spill] sm:$0xff] }
 0xbf9   : > { %5518 = vst [vmem:[%s10611_s21 + $0x30] sm:$0xff] %v5502_v33  ;;  %v5503_v8 = vadd.f32 %v10606_v43, %v5480_v54  ;;  %v6109_v34 = vpop.f32.mrb[179].mxu1 }
 0xbfa   : > { %v6110_v29 = vadd.f32 %v6109_v34, %v6108_v15 }
 0xbfb   : > { %5519 = vst [vmem:[%s10611_s21 + $0x38] sm:$0xff] %v5503_v8 }
 0xc04   : > { %v6169_v19 = vpop.f32.mrb[192].mxu0 }
 0xc05   : > { %v6170_v13 = vpop.f32.mrb[193].mxu0 }
 0xc06   : > { %v6171_v3 = vadd.f32 %v6170_v13, %v6169_v19  ;;  %v6172_v62 = vpop.f32.mrb[194].mxu0 }
 0xc07   : > { %v6173_v1 = vpop.f32.mrb[195].mxu0 }
 0xc08   : > { %v5443_v60 = vadd.f32 %v6171_v3, %v6107_v37  ;;  %v6174_v31 = vadd.f32 %v6173_v1, %v6172_v62  ;;  %v11047_v1 = vld [vmem:[#allocation21_spill] sm:$0xff] }
 0xc0a   : > { %v5481_v55 = vadd.f32 %v11041_v59, %v5443_v60  ;;  %v5446_v47 = vadd.f32 %v6174_v31, %v6110_v29 }
 0xc0b   : > { %v6111_v17 = vpop.f32.mrb[180].mxu1 }
 0xc0c   : > { %v5504_v20 = vadd.f32 %v10606_v43, %v5481_v55  ;;  %v5482_v61 = vadd.f32 %v11042_v22, %v5446_v47  ;;  %v6175_v36 = vpop.f32.mrb[196].mxu0  ;;  %v6112_v53 = vpop.f32.mrb[181].mxu1  ;;  %v11048_v55 = vld [vmem:[#allocation23_spill] sm:$0xff] }
 0xc0d   : > { %v6113_v2 = vadd.f32 %v6112_v53, %v6111_v17  ;;  %v6176_v24 = vpop.f32.mrb[197].mxu0  ;;  %v6114_v41 = vpop.f32.mrb[182].mxu1 }
 0xc0e   : > { %5520 = vst [vmem:[%s10611_s21 + $0x40] sm:$0xff] %v5504_v20  ;;  %v5505_v40 = vadd.f32 %v10606_v43, %v5482_v61  ;;  %v6177_v12 = vadd.f32 %v6176_v24, %v6175_v36  ;;  %v6178_v46 = vpop.f32.mrb[198].mxu0  ;;  %v6115_v14 = vpop.f32.mrb[183].mxu1 }
 0xc0f   : > { %v6116_v23 = vadd.f32 %v6115_v14, %v6114_v41  ;;  %v6179_v25 = vpop.f32.mrb[199].mxu0 }
 0xc10   : > { %5521 = vst [vmem:[%s10611_s21 + $0x48] sm:$0xff] %v5505_v40  ;;  %v5451_v10 = vadd.f32 %v6177_v12, %v6113_v2  ;;  %v6180_v35 = vadd.f32 %v6179_v25, %v6178_v46 }
 0xc12   : > { %v5483_v0 = vadd.f32 %v11043_v48, %v5451_v10  ;;  %v5454_v9 = vadd.f32 %v6180_v35, %v6116_v23 }
 0xc14   : > { %v5506_v57 = vadd.f32 %v10606_v43, %v5483_v0  ;;  %v5484_v16 = vadd.f32 %v11044_v4, %v5454_v9 }
 0xc16   : > { %5522 = vst [vmem:[%s10611_s21 + $0x50] sm:$0xff] %v5506_v57  ;;  %v5507_v7 = vadd.f32 %v10606_v43, %v5484_v16 }
 0xc18   : > { %5523 = vst [vmem:[%s10611_s21 + $0x58] sm:$0xff] %v5507_v7 }
 0xc20   : > { %v6117_v32 = vpop.f32.mrb[184].mxu1 }
 0xc21   : > { %v6118_v38 = vpop.f32.mrb[185].mxu1 }
 0xc22   : > { %v6119_v6 = vadd.f32 %v6118_v38, %v6117_v32  ;;  %v6120_v30 = vpop.f32.mrb[186].mxu1 }
 0xc23   : > { %v6121_v63 = vpop.f32.mrb[187].mxu1 }
 0xc24   : > { %v6122_v49 = vadd.f32 %v6121_v63, %v6120_v30 }
 0xc28   : > { %v6123_v51 = vpop.f32.mrb[188].mxu1 }
 0xc29   : > { %v6124_v27 = vpop.f32.mrb[189].mxu1 }
 0xc2a   : > { %v6125_v45 = vadd.f32 %v6124_v27, %v6123_v51  ;;  %v6126_v56 = vpop.f32.mrb[190].mxu1 }
 0xc2b   : > { %v6127_v18 = vpop.f32.mrb[191].mxu1 }
 0xc2c   : > { %v6128_v50 = vadd.f32 %v6127_v18, %v6126_v56 }
 0xc30   : > { %v6181_v52 = vpop.f32.mrb[192].mxu1 }
 0xc31   : > { %v6182_v26 = vpop.f32.mrb[193].mxu1 }
 0xc32   : > { %v6183_v58 = vadd.f32 %v6182_v26, %v6181_v52  ;;  %v6184_v5 = vpop.f32.mrb[194].mxu1 }
 0xc33   : > { %v6185_v21 = vpop.f32.mrb[195].mxu1 }
 0xc34   : > { %v5459_v44 = vadd.f32 %v6183_v58, %v6119_v6  ;;  %v6186_v11 = vadd.f32 %v6185_v21, %v6184_v5 }
 0xc36   : > { %v5485_v33 = vadd.f32 %v11045_v39, %v5459_v44  ;;  %v5462_v42 = vadd.f32 %v6186_v11, %v6122_v49 }
 0xc38   : > { %v5508_v54 = vadd.f32 %v10606_v43, %v5485_v33  ;;  %v5486_v37 = vadd.f32 %v11046_v28, %v5462_v42  ;;  %v6187_v15 = vpop.f32.mrb[196].mxu1 }
 0xc39   : > { %v6188_v8 = vpop.f32.mrb[197].mxu1 }
 0xc3a   : > { %5524 = vst [vmem:[%s10611_s21 + $0x60] sm:$0xff] %v5508_v54  ;;  %v5509_v34 = vadd.f32 %v10606_v43, %v5486_v37  ;;  %v6189_v29 = vadd.f32 %v6188_v8, %v6187_v15  ;;  %v6190_v19 = vpop.f32.mrb[198].mxu1 }
 0xc3b   : > { %v6191_v13 = vpop.f32.mrb[199].mxu1 }
 0xc3c   : > { %5525 = vst [vmem:[%s10611_s21 + $0x68] sm:$0xff] %v5509_v34  ;;  %v5467_v3 = vadd.f32 %v6189_v29, %v6125_v45  ;;  %v6192_v62 = vadd.f32 %v6191_v13, %v6190_v19 }
 0xc3e   : > { %v5487_v60 = vadd.f32 %v11047_v1, %v5467_v3  ;;  %v5470_v31 = vadd.f32 %v6192_v62, %v6128_v50 }
 0xc40   : > { %v5510_v59 = vadd.f32 %v10606_v43, %v5487_v60  ;;  %v5488_v47 = vadd.f32 %v11048_v55, %v5470_v31 }
 0xc42   : > { %5526 = vst [vmem:[%s10611_s21 + $0x70] sm:$0xff] %v5510_v59  ;;  %v5511_v17 = vadd.f32 %v10606_v43, %v5488_v47 }
 0xc44   : > { %5527 = vst [vmem:[%s10611_s21 + $0x78] sm:$0xff] %v5511_v17 }
 0xc45   : > { %7429 = shalt.err (!%p7426_p7)
}
 0xc46   : > { %s7430_s27 = scalar_lea.hbm %s10660_s29, 2048  ;;  %s7434_s23 = scalar_lea.hbm %s10719_s9, 4096 }
 0xc47   : > { %p7431_p8 = scmp.ne.s32.totalorder %s10660_s29, %s7430_s27  ;;  %p7435_p1 = scmp.lt.u32.totalorder %s10660_s29, %s10719_s9 }
 0xc48   : > { %p7436_p0 = scmp.lt.u32.totalorder %s7434_s23, %s7430_s27  ;;  %p7438_p6 = scmp.lt.u32.totalorder %s7430_s27, %s10660_s29 }
 0xc49   : > { %p7432_p11 = pnand %p7431_p8, %p11049_p9 }
 0xc4a   : > { %p7437_p5 = por %p7436_p0, %p7435_p1 }
 0xc4b   : > { %p7433_p13 = pneg %p7432_p11 }
 0xc4c   : > { %p7439_p10 = por %p7438_p6, %p7437_p5 }
 0xc4e   : > { %p7440_p12 = pnand %p7439_p10, %p7433_p13 }
 0xc50   : > { %7443 = shalt.err (!%p7440_p12)
}
 0xc51   : > { %s7492_s26 = smov 128   ;;  %s7493_s28 = smov 8  }
 0xc52   : > { %6645 = dma.vmem_to_hbm [thread:$0]  (%p11049_p9), %s10662_s17, 2048, %s10660_s29, %s10669_s13, %s7492_s26, %s7492_s26, %s7493_s28  }
 0xc53 PF: > { %p6657_p2 = scmp.ge.s32.totalorder %s7482_s12, 2  ;;  %s5557_s14 = sand.u32 1, %s7470_s30  }
 0xc54   : > { %p11050_p3 = scmp.ne.s32.totalorder %s10785_s20, 0  ;;  %s5558_s16 = scalar_lea.sflag [#allocation4], %s5557_s14 }
 0xc56   : > { %p6652_p4 = pnand %p6657_p2, %p11050_p3 }
 0xc58   : > { %7465 = dma.done.wait (!%p6652_p4), %s5558_s16, 2048  }
 0xc59   : > { %7467 = vsyncadd (!%p6652_p4), %s5558_s16, 4294965248  ;;  %p20_p7 = scmp.ge.s32.totalorder %s7569_s15, 4   ;;  %s11051_s30 = smov %s7474_s10 }
 0xc5a   : > { %s11052_s10 = smov %s7478_s11  ;;  %s11053_s11 = smov %s7580_s18 }
 0xc5b   : > { %s11054_s12 = smov %s7569_s15  ;;  %22 = sbr.rel (!%p20_p7) target bundleno = 4 (0x4), region = 99 }
 0xc62   :  { %5563 = vsyncpa [#allocation3], 1 }
 0xc63   :  { %5565 = vsyncpa [#allocation3 + $0x1], 1 }
 0xc64   :  { %5566 = vsyncpa [#allocation4], 1 }
 0xc65   :  { %5568 = vsyncpa [#allocation4 + $0x1], 1 }

</bundles_post_ra>
